<compile_context>
chip_gen: v6e
topology: v6e:2x2x1
jax: 0.10.0
libtpu: 0.0.40
codegen_flags: <defaults>
</compile_context>

<pallas_src>
import jax
import jax.numpy as jnp
from jax.experimental import pallas as pl
from jax.experimental.pallas import tpu as pltpu


# --------------------------------------------------------------------------- #
# Kernel
# --------------------------------------------------------------------------- #
def meta_adapter_kernel(x_ref, w1_ref, b1_ref, w2_ref, b2_ref, w3_ref, b3_ref,
                        o_ref):
    """One (TM, D) batch tile: 3 matmuls (bf16 MXU operands, f32 acc) + ReLU + residual."""
    x = x_ref[...]                         # f32 [TM, D], kept for the residual
    xb = x.astype(jnp.bfloat16)

    # Layer 1: Linear(input_dim -> hidden_dim) + ReLU
    h = jnp.dot(xb, w1_ref[...], preferred_element_type=jnp.float32) + b1_ref[...]
    h = jnp.maximum(h, 0.0)
    # TODO(synk): Dropout(0.1) is train-only in PyTorch; eval forward is identity.

    # Layer 2: Linear(hidden_dim -> hidden_dim) + ReLU
    h = jnp.dot(h.astype(jnp.bfloat16), w2_ref[...],
                preferred_element_type=jnp.float32) + b2_ref[...]
    h = jnp.maximum(h, 0.0)

    # Layer 3: Linear(hidden_dim -> input_dim)
    y = jnp.dot(h.astype(jnp.bfloat16), w3_ref[...],
                preferred_element_type=jnp.float32) + b3_ref[...]

    # Residual connection in f32
    o_ref[...] = x + y


# --------------------------------------------------------------------------- #
# Tile selection (VMEM-budgeted, pad-free when possible)
# --------------------------------------------------------------------------- #
def _choose_tm(n, d, h, *, tm_max=512, vmem_budget_bytes=40 << 20):
    """Pick the batch tile: multiple of 8 sublanes, divides n when possible,
    and fits an explicit VMEM budget (safe under v7x's 64 MiB physical VMEM).

    Budget model:
      x/out:   2 arrays x 2 pipeline buffers x TM x D x 4 B
      interm.: ~2 live f32 [TM, H] temporaries
      weights: 2 x (D*H + H*H + H*D) x 2 B (bf16, default double-buffered even
               though constant-index; pl.Buffered(1) would reclaim half if the
               weights ever get large)
    """
    weight_bytes = 2 * (d * h + h * h + h * d) * 2 + 2 * (2 * h + d) * 4
    row_bytes = 2 * 2 * d * 4 + 2 * h * 4
    cap = max(8, min(tm_max, (vmem_budget_bytes - weight_bytes) // row_bytes))
    cap = (cap // 8) * 8

    if n <= cap:
        return n                     # single full-batch block (no (8,128) issue: full dim)
    for tm in range(cap, 7, -8):     # largest multiple-of-8 divisor of n, <= cap
        if n % tm == 0:
            return tm
    return cap                       # ragged n: wrapper pads once (rare fallback)


# --------------------------------------------------------------------------- #
# Forward wrapper
# --------------------------------------------------------------------------- #
def meta_adapter_forward(x, kernel_params):
    """x: f32 [N, input_dim]; kernel_params from prepare_params() (bf16 W, f32 b)."""
    w1, b1, w2, b2, w3, b3 = kernel_params
    n, d = x.shape
    h = w1.shape[1]

    tm = _choose_tm(n, d, h)
    if n % tm:
        # TODO(synk): ragged-N fallback costs one extra HBM pad/slice pass; prefer
        # batch sizes with a multiple-of-8 divisor <= 512 so this path never runs.
        n_pad = pl.cdiv(n, tm) * tm
        x_in = jnp.pad(x, ((0, n_pad - n), (0, 0)))
    else:
        n_pad, x_in = n, x

    grid = (n_pad // tm,)
    const = lambda i: (0, 0)         # weights/biases: VMEM-resident across the grid

    flops = 2 * n_pad * (d * h + h * h + h * d)
    bytes_accessed = (
        2 * n_pad * d * 4                    # stream x in + out (f32)
        + (d * h + h * h + h * d) * 2        # bf16 weights (loaded once)
        + (2 * h + d) * 4                    # f32 biases
    )

    out = pl.pallas_call(
        meta_adapter_kernel,
        out_shape=jax.ShapeDtypeStruct((n_pad, d), x.dtype),
        grid_spec=pltpu.PrefetchScalarGridSpec(
            num_scalar_prefetch=0,
            grid=grid,
            in_specs=[
                pl.BlockSpec((tm, d), lambda i: (i, 0)),   # x tile streams
                pl.BlockSpec((d, h), const),               # w1 (resident, bf16)
                pl.BlockSpec((1, h), const),               # b1 (f32)
                pl.BlockSpec((h, h), const),               # w2
                pl.BlockSpec((1, h), const),               # b2
                pl.BlockSpec((h, d), const),               # w3
                pl.BlockSpec((1, d), const),               # b3
            ],
            out_specs=pl.BlockSpec((tm, d), lambda i: (i, 0)),
        ),
        compiler_params=pltpu.CompilerParams(
            # Independent batch tiles -> megacore sharding on v7x.
            dimension_semantics=("parallel",),
            # Above the 16/32 MiB scoped defaults, below v7x's 64 MiB physical.
            vmem_limit_bytes=48 << 20,
        ),
        cost_estimate=pl.CostEstimate(
            flops=flops, transcendentals=0, bytes_accessed=bytes_accessed),
    )(x_in, w1, b1, w2, b2, w3, b3)

    return out if n_pad == n else out[:n]


# --------------------------------------------------------------------------- #
# Parameters
# --------------------------------------------------------------------------- #
def init_params(key, input_dim, hidden_dim):
    """Kaiming-normal weights (fan_in, ReLU gain sqrt(2)), zero biases, f32.

    Weights are (in_dim, out_dim) — transposed vs. PyTorch's (out, in)
    Linear.weight — mathematically identical for y = x @ W.
    """
    k1, k2, k3 = jax.random.split(key, 3)

    def kaiming(k, fan_in, fan_out):
        std = jnp.sqrt(2.0 / fan_in)
        return jax.random.normal(k, (fan_in, fan_out), dtype=jnp.float32) * std

    w1 = kaiming(k1, input_dim, hidden_dim)
    b1 = jnp.zeros((1, hidden_dim), jnp.float32)
    w2 = kaiming(k2, hidden_dim, hidden_dim)
    b2 = jnp.zeros((1, hidden_dim), jnp.float32)
    w3 = kaiming(k3, hidden_dim, input_dim)
    b3 = jnp.zeros((1, input_dim), jnp.float32)
    return (w1, b1, w2, b2, w3, b3)


def prepare_params(params_f32):
    """One-time cast of the weight matrices to bf16 for the kernel.

    Done at parameter-setup time (not per forward call) so every forward avoids
    an extra f32-weight HBM read + bf16 write. Biases stay f32 (VPU adds in f32).
    """
    w1, b1, w2, b2, w3, b3 = params_f32
    bf = jnp.bfloat16
    return (w1.astype(bf), b1, w2.astype(bf), b2, w3.astype(bf), b3)


# --------------------------------------------------------------------------- #
# References
# --------------------------------------------------------------------------- #
def reference_forward_f32(x, params_f32):
    """True f32 math of the PyTorch eval-mode forward."""
    w1, b1, w2, b2, w3, b3 = params_f32
    h = jnp.maximum(x @ w1 + b1, 0.0)
    h = jnp.maximum(h @ w2 + b2, 0.0)
    return x + (h @ w3 + b3)


def reference_forward_bf16(x, params_f32):
    """Pure-JAX reference using the kernel's exact bf16-operand / f32-acc recipe."""
    w1, b1, w2, b2, w3, b3 = params_f32
    bf = jnp.bfloat16
    h = jnp.maximum(
        jnp.dot(x.astype(bf), w1.astype(bf),
                preferred_element_type=jnp.float32) + b1, 0.0)
    h = jnp.maximum(
        jnp.dot(h.astype(bf), w2.astype(bf),
                preferred_element_type=jnp.float32) + b2, 0.0)
    y = jnp.dot(h.astype(bf), w3.astype(bf),
                preferred_element_type=jnp.float32) + b3
    return x + y


# --------------------------------------------------------------------------- #
# Self-test
# --------------------------------------------------------------------------- #
if __name__ == "__main__":
    # Module-default feature dims (512 / 256), batch 2048 -> TM=512, 4-step grid.
    N, INPUT_DIM, HIDDEN_DIM = 2048, 512, 256

    key = jax.random.PRNGKey(0)
    kx, kp, kb = jax.random.split(key, 3)
    x = jax.random.normal(kx, (N, INPUT_DIM), dtype=jnp.float32)

    params = init_params(kp, INPUT_DIM, HIDDEN_DIM)
    # The PyTorch module zero-inits biases; use small nonzero biases in the test so
    # the (1, H) -> (TM, H) bias-broadcast path is actually exercised.
    w1, _, w2, _, w3, _ = params
    kb1, kb2, kb3 = jax.random.split(kb, 3)
    b1 = 0.1 * jax.random.normal(kb1, (1, HIDDEN_DIM), jnp.float32)
    b2 = 0.1 * jax.random.normal(kb2, (1, HIDDEN_DIM), jnp.float32)
    b3 = 0.1 * jax.random.normal(kb3, (1, INPUT_DIM), jnp.float32)
    params = (w1, b1, w2, b2, w3, b3)

    kernel_params = prepare_params(params)            # one-time bf16 weight cast
    out = jax.block_until_ready(meta_adapter_forward(x, kernel_params))
    assert out.shape == (N, INPUT_DIM)

    # (1) Exact same numerical recipe (bf16 operands, f32 accumulate): tight check.
    ref_bf16 = reference_forward_bf16(x, params)
    assert jnp.allclose(out, ref_bf16, atol=1e-3, rtol=1e-3), "mismatch vs bf16-recipe ref"

    # (2) True f32 PyTorch math: bounds the bf16-matmul error at the real D/H.
    ref_f32 = reference_forward_f32(x, params)
    assert jnp.allclose(out, ref_f32, atol=1e-1, rtol=5e-2), "bf16 error vs f32 ref too large"
    assert float(jnp.mean(jnp.abs(out - ref_f32))) < 2e-2

    print("KERNEL_OK")
</pallas_src>

<mosaic_0001>
module attributes {stable_mosaic.version = 11 : i64} {
  func.func @meta_adapter_kernel(%arg0: i32, %arg1: memref<512x512xf32, #tpu.memory_space<vmem>>, %arg2: memref<512x256xbf16, #tpu.memory_space<vmem>>, %arg3: memref<1x256xf32, #tpu.memory_space<vmem>>, %arg4: memref<256x256xbf16, #tpu.memory_space<vmem>>, %arg5: memref<1x256xf32, #tpu.memory_space<vmem>>, %arg6: memref<256x512xbf16, #tpu.memory_space<vmem>>, %arg7: memref<1x512xf32, #tpu.memory_space<vmem>>, %arg8: memref<512x512xf32, #tpu.memory_space<vmem>>) attributes {dimension_semantics = [#tpu.dimension_semantics<parallel>], iteration_bounds = array<i64: 4>, scalar_prefetch = 0 : i64, scratch_operands = 0 : i64, tpu.core_type = #tpu.core_type<tc>, window_params = [{transform_indices = @transform_0, window_bounds = array<i64: 512, 512>}, {pipeline_mode = #tpu.pipeline_mode<synchronous>, transform_indices = @transform_1, window_bounds = array<i64: 512, 256>}, {pipeline_mode = #tpu.pipeline_mode<synchronous>, transform_indices = @transform_2, window_bounds = array<i64: 1, 256>}, {pipeline_mode = #tpu.pipeline_mode<synchronous>, transform_indices = @transform_3, window_bounds = array<i64: 256, 256>}, {pipeline_mode = #tpu.pipeline_mode<synchronous>, transform_indices = @transform_4, window_bounds = array<i64: 1, 256>}, {pipeline_mode = #tpu.pipeline_mode<synchronous>, transform_indices = @transform_5, window_bounds = array<i64: 256, 512>}, {pipeline_mode = #tpu.pipeline_mode<synchronous>, transform_indices = @transform_6, window_bounds = array<i64: 1, 512>}, {transform_indices = @transform_7, window_bounds = array<i64: 512, 512>}]} {
    %c0 = arith.constant 0 : index
    %c0_0 = arith.constant 0 : index
    %0 = vector.load %arg1[%c0, %c0_0] : memref<512x512xf32, #tpu.memory_space<vmem>>, vector<512x512xf32>
    %1 = arith.truncf %0 : vector<512x512xf32> to vector<512x512xbf16>
    %c0_1 = arith.constant 0 : index
    %c0_2 = arith.constant 0 : index
    %2 = vector.load %arg2[%c0_1, %c0_2] : memref<512x256xbf16, #tpu.memory_space<vmem>>, vector<512x256xbf16>
    %cst = arith.constant dense<0.000000e+00> : vector<512x256xf32>
    %3 = tpu.matmul %1, %2, %cst {dimension_numbers = #tpu.dot_dimension_numbers<[1], [0], [0], [1], [0, 0, 1, 1], [], []>} : vector<512x512xbf16>, vector<512x256xbf16>, vector<512x256xf32> -> vector<512x256xf32>
    %c0_3 = arith.constant 0 : index
    %c0_4 = arith.constant 0 : index
    %4 = vector.load %arg3[%c0_3, %c0_4] : memref<1x256xf32, #tpu.memory_space<vmem>>, vector<1x256xf32>
    %5 = vector.broadcast %4 : vector<1x256xf32> to vector<512x256xf32>
    %6 = arith.addf %3, %5 : vector<512x256xf32>
    %cst_5 = arith.constant 0.000000e+00 : f32
    %7 = vector.broadcast %cst_5 : f32 to vector<512x256xf32>
    %8 = arith.maximumf %6, %7 : vector<512x256xf32>
    %9 = arith.truncf %8 : vector<512x256xf32> to vector<512x256xbf16>
    %c0_6 = arith.constant 0 : index
    %c0_7 = arith.constant 0 : index
    %10 = vector.load %arg4[%c0_6, %c0_7] : memref<256x256xbf16, #tpu.memory_space<vmem>>, vector<256x256xbf16>
    %cst_8 = arith.constant dense<0.000000e+00> : vector<512x256xf32>
    %11 = tpu.matmul %9, %10, %cst_8 {dimension_numbers = #tpu.dot_dimension_numbers<[1], [0], [0], [1], [0, 0, 1, 1], [], []>} : vector<512x256xbf16>, vector<256x256xbf16>, vector<512x256xf32> -> vector<512x256xf32>
    %c0_9 = arith.constant 0 : index
    %c0_10 = arith.constant 0 : index
    %12 = vector.load %arg5[%c0_9, %c0_10] : memref<1x256xf32, #tpu.memory_space<vmem>>, vector<1x256xf32>
    %13 = vector.broadcast %12 : vector<1x256xf32> to vector<512x256xf32>
    %14 = arith.addf %11, %13 : vector<512x256xf32>
    %cst_11 = arith.constant 0.000000e+00 : f32
    %15 = vector.broadcast %cst_11 : f32 to vector<512x256xf32>
    %16 = arith.maximumf %14, %15 : vector<512x256xf32>
    %17 = arith.truncf %16 : vector<512x256xf32> to vector<512x256xbf16>
    %c0_12 = arith.constant 0 : index
    %c0_13 = arith.constant 0 : index
    %18 = vector.load %arg6[%c0_12, %c0_13] : memref<256x512xbf16, #tpu.memory_space<vmem>>, vector<256x512xbf16>
    %cst_14 = arith.constant dense<0.000000e+00> : vector<512x512xf32>
    %19 = tpu.matmul %17, %18, %cst_14 {dimension_numbers = #tpu.dot_dimension_numbers<[1], [0], [0], [1], [0, 0, 1, 1], [], []>} : vector<512x256xbf16>, vector<256x512xbf16>, vector<512x512xf32> -> vector<512x512xf32>
    %c0_15 = arith.constant 0 : index
    %c0_16 = arith.constant 0 : index
    %20 = vector.load %arg7[%c0_15, %c0_16] : memref<1x512xf32, #tpu.memory_space<vmem>>, vector<1x512xf32>
    %21 = vector.broadcast %20 : vector<1x512xf32> to vector<512x512xf32>
    %22 = arith.addf %19, %21 : vector<512x512xf32>
    %23 = arith.addf %0, %22 : vector<512x512xf32>
    %c0_17 = arith.constant 0 : index
    %c0_18 = arith.constant 0 : index
    %24 = vector.load %arg8[%c0_17, %c0_18] : memref<512x512xf32, #tpu.memory_space<vmem>>, vector<512x512xf32>
    tpu.vector_store %arg8[%c0_17, %c0_18], %23 {strides = array<i32>} : memref<512x512xf32, #tpu.memory_space<vmem>>, vector<512x512xf32>,
    return
  }
  func.func @transform_0(%arg0: i32) -> (i32, i32) {
    %c0_i32 = arith.constant 0 : i32
    %c0_i32_0 = arith.constant 0 : i32
    return %arg0, %c0_i32 : i32, i32
  }
  func.func @transform_1(%arg0: i32) -> (i32, i32) {
    %c0_i32 = arith.constant 0 : i32
    %c0_i32_0 = arith.constant 0 : i32
    %c0_i32_1 = arith.constant 0 : i32
    return %c0_i32, %c0_i32_0 : i32, i32
  }
  func.func @transform_2(%arg0: i32) -> (i32, i32) {
    %c0_i32 = arith.constant 0 : i32
    %c0_i32_0 = arith.constant 0 : i32
    %c0_i32_1 = arith.constant 0 : i32
    return %c0_i32, %c0_i32_0 : i32, i32
  }
  func.func @transform_3(%arg0: i32) -> (i32, i32) {
    %c0_i32 = arith.constant 0 : i32
    %c0_i32_0 = arith.constant 0 : i32
    %c0_i32_1 = arith.constant 0 : i32
    return %c0_i32, %c0_i32_0 : i32, i32
  }
  func.func @transform_4(%arg0: i32) -> (i32, i32) {
    %c0_i32 = arith.constant 0 : i32
    %c0_i32_0 = arith.constant 0 : i32
    %c0_i32_1 = arith.constant 0 : i32
    return %c0_i32, %c0_i32_0 : i32, i32
  }
  func.func @transform_5(%arg0: i32) -> (i32, i32) {
    %c0_i32 = arith.constant 0 : i32
    %c0_i32_0 = arith.constant 0 : i32
    %c0_i32_1 = arith.constant 0 : i32
    return %c0_i32, %c0_i32_0 : i32, i32
  }
  func.func @transform_6(%arg0: i32) -> (i32, i32) {
    %c0_i32 = arith.constant 0 : i32
    %c0_i32_0 = arith.constant 0 : i32
    %c0_i32_1 = arith.constant 0 : i32
    return %c0_i32, %c0_i32_0 : i32, i32
  }
  func.func @transform_7(%arg0: i32) -> (i32, i32) {
    %c0_i32 = arith.constant 0 : i32
    %c0_i32_0 = arith.constant 0 : i32
    return %arg0, %c0_i32 : i32, i32
  }
}

</mosaic_0001>

<bundles_post_ra>
// kernel: tpu_custom_call.1
= control target key start
LH: loop header
LB: loop body
LE: loop exit
PB: predicated region body
PF: predicated region fallthrough
CT: control target
= control target key end

     0   :  { %s7912_s0 = inlined_call_operand.hbm [shape: f32[2048,512], index: 0, kind: input, shape index: {}]   ;;  %s7913_s1 = inlined_call_operand.hbm [shape: bf16[512,256], index: 1, kind: input, shape index: {}]   ;;  %s7914_s2 = inlined_call_operand.hbm [shape: f32[1,256], index: 2, kind: input, shape index: {}]   ;;  %s7915_s3 = inlined_call_operand.hbm [shape: bf16[256,256], index: 3, kind: input, shape index: {}]   ;;  %s7916_s4 = inlined_call_operand.hbm [shape: f32[1,256], index: 4, kind: input, shape index: {}]   ;;  %s7917_s5 = inlined_call_operand.hbm [shape: bf16[256,512], index: 5, kind: input, shape index: {}]   ;;  %s7918_s6 = inlined_call_operand.hbm [shape: f32[1,512], index: 6, kind: input, shape index: {}]   ;;  %s7919_s7 = inlined_call_operand.hbm [shape: f32[2048,512], index: 7, kind: output, shape index: {}]  }
   0x1   :  { %7930 = sst [smem:[#allocation81_spill]] %s7913_s1 }
   0x2   :  { %12 = vsyncpa [#allocation3], 0 }
   0x3   :  { %14 = vsyncpa [#allocation3 + $0x1], 0 }
   0x4   :  { %15 = vsyncpa [#allocation6], 0 }
   0x5   :  { %16 = vsyncpa [#allocation9], 0 }
   0x6   :  { %17 = vsyncpa [#allocation12], 0 }
   0x7   :  { %18 = vsyncpa [#allocation4], 0 }
   0x8   :  { %20 = vsyncpa [#allocation4 + $0x1], 0  ;;  %s5730_s24 = smov 0   ;;  %s5732_s25 = smov 0  }
   0x9   :  { %s5734_s26 = smov 0   ;;  %s5736_s27 = smov 0  }
   0xa LB: > { %s5674_s28 = smov [#allocation5]   ;;  %s5751_s30 = sadd.s32 4294967295, %s5672_s27   ;;  %s5672_s27 = sphi %s5736_s27, %s8076_s27   ;;  %s5668_s26 = sphi %s5734_s26, %s8075_s26   ;;  %s5664_s25 = sphi %s5732_s25, %s8074_s25   ;;  %s5660_s24 = sphi %s5730_s24, %s8073_s24  }
   0xb   : > { %s221_s29 = sshll.u32 %s5674_s28, 4  ;;  %p4578_p0 = scmp.ge.s32.totalorder %s5672_s27, 1  ;;  %s222_s29 = int_to_ptr.vmem [resolvable:$true] %s221_s29 }
   0xc   : > { %p7920_p1 = scmp.eq.s32.totalorder %s5751_s30, 0  ;;  %p209_p2 = scmp.lt.s32.totalorder %s5672_s27, 5 }
   0xd   : > { %s5675_s9 = smov [#allocation8]   ;;  %s5676_s12 = smov [#allocation11]  }
   0xe   : > { %p5756_p3 = pnand %p4578_p0, %p209_p2  ;;  %s245_s10 = sshll.u32 %s5675_s9, 4  ;;  %s5768_s10 = int_to_ptr.vmem [resolvable:$true] %s245_s10 }
   0xf   : > { %s269_s13 = sshll.u32 %s5676_s12, 4  ;;  %s5423_s15 = scalar_lea.vmem %s222_s29, 8192  ;;  %s5770_s13 = int_to_ptr.vmem [resolvable:$true] %s269_s13 }
  0x10   : > { %s7931_s8 = scalar_select %p5756_p3, 1, 0 }
  0x11   : > { %p4829_p4 = pneg %p5756_p3  ;;  %p5424_p7 = scmp.ne.s32.totalorder %s222_s29, %s5423_s15 }
  0x12   : > { %p5431_p10 = scmp.lt.s32.totalorder %s222_s29, %s222_s29  ;;  %p5432_p11 = scmp.lt.s32.totalorder %s5423_s15, %s5423_s15 }
  0x13   : > { %p5764_p5 = pnand %p4829_p4, %p7920_p1 }
  0x14   : > { %p5433_p12 = por %p5432_p11, %p5431_p10 }
  0x15   : > { %p5774_p6 = pneg %p5764_p5 }
  0x17   : > { %p5426_p8 = pnand %p5424_p7, %p5774_p6 }
  0x19   : > { %p5427_p9 = pneg %p5426_p8 }
  0x1b   : > { %p5434_p13 = pnand %p5433_p12, %p5427_p9 }
  0x1d   : > { %5437 = shalt.err (!%p5434_p13)
}
  0x1e   : > { %s5677_s16 = smov 128   ;;  %s5678_s17 = smov 8  }
  0x1f   : > { %s7934_s1 = sld [smem:[#allocation81_spill]]  ;;  %s5449_s20 = scalar_lea.vmem %s5768_s10, 4096 }
  0x20   : > { %p5450_p0 = scmp.ne.s32.totalorder %s5768_s10, %s5449_s20  ;;  %p5457_p7 = scmp.lt.s32.totalorder %s5768_s10, %s5768_s10 }
  0x21   : > { %p5458_p8 = scmp.lt.s32.totalorder %s5449_s20, %s5449_s20 }
  0x22   : > { %p5452_p2 = pnand %p5450_p0, %p5774_p6 }
  0x23   : > { %p5459_p9 = por %p5458_p8, %p5457_p7 }
  0x24   : > { %p5453_p4 = pneg %p5452_p2 }
  0x25   : > { %4832 = dma.hbm_to_vmem [thread:$0]  (!%p5764_p5), %s7934_s1, 8192, %s222_s29, [#allocation6], %s5677_s16, %s5677_s16, %s5678_s17  }
  0x26   : > { %p5460_p10 = pnand %p5459_p9, %p5453_p4 }
  0x28   : > { %5463 = shalt.err (!%p5460_p10)
}
  0x29   : > { %4838 = dma.hbm_to_vmem [thread:$0]  (!%p5764_p5), %s7915_s3, 4096, %s5768_s10, [#allocation9], %s5677_s16, %s5677_s16, %s5678_s17  }
  0x2a   : > { %s5475_s23 = scalar_lea.vmem %s5770_s13, 8192  ;;  %p5483_p0 = scmp.lt.s32.totalorder %s5770_s13, %s5770_s13 }
  0x2b   : > { %p5476_p11 = scmp.ne.s32.totalorder %s5770_s13, %s5475_s23  ;;  %p5484_p2 = scmp.lt.s32.totalorder %s5475_s23, %s5475_s23 }
  0x2d   : > { %p5478_p12 = pnand %p5476_p11, %p5774_p6  ;;  %p5485_p4 = por %p5484_p2, %p5483_p0 }
  0x2f   : > { %p5479_p13 = pneg %p5478_p12 }
  0x31   : > { %p5486_p7 = pnand %p5485_p4, %p5479_p13 }
  0x33   : > { %5489 = shalt.err (!%p5486_p7)
}
  0x34   : > { %s5679_s28 = smov 256   ;;  %s5680_s29 = smov 16  }
  0x35   : > { %4844 = dma.hbm_to_vmem [thread:$0]  (!%p5764_p5), %s7917_s5, 8192, %s5770_s13, [#allocation12], %s5679_s28, %s5679_s28, %s5680_s29  }
  0x36   : > { %s5681_s10 = smov [#allocation7]   ;;  %s5682_s16 = smov [#allocation10]  }
  0x37   : > { %s235_s15 = sshll.u32 %s5681_s10, 4  ;;  %s259_s17 = sshll.u32 %s5682_s16, 4  ;;  %s236_s15 = int_to_ptr.vmem [resolvable:$true] %s235_s15  ;;  %s260_s17 = int_to_ptr.vmem [resolvable:$true] %s259_s17 }
  0x38   : > { %s5501_s18 = scalar_lea.vmem %s236_s15, 32  ;;  %p5509_p11 = scmp.lt.s32.totalorder %s236_s15, %s236_s15 }
  0x39   : > { %p5502_p8 = scmp.ne.s32.totalorder %s236_s15, %s5501_s18  ;;  %p5510_p12 = scmp.lt.s32.totalorder %s5501_s18, %s5501_s18 }
  0x3b   : > { %p5504_p9 = pnand %p5502_p8, %p5774_p6  ;;  %p5511_p13 = por %p5510_p12, %p5509_p11 }
  0x3d   : > { %p5505_p10 = pneg %p5504_p9 }
  0x3f   : > { %p5512_p0 = pnand %p5511_p13, %p5505_p10 }
  0x41   : > { %5515 = shalt.err (!%p5512_p0)
}
  0x42   : > { %4835 = dma.hbm_to_vmem [thread:$0]  (!%p5764_p5), %s7914_s2, 32, %s236_s15, [#allocation6]  }
  0x43   : > { %s5527_s13 = scalar_lea.vmem %s260_s17, 32  ;;  %p5535_p8 = scmp.lt.s32.totalorder %s260_s17, %s260_s17 }
  0x44   : > { %p5528_p2 = scmp.ne.s32.totalorder %s260_s17, %s5527_s13  ;;  %p5536_p9 = scmp.lt.s32.totalorder %s5527_s13, %s5527_s13 }
  0x46   : > { %p5530_p4 = pnand %p5528_p2, %p5774_p6  ;;  %p5537_p1 = por %p5536_p9, %p5535_p8 }
  0x48   : > { %p5531_p7 = pneg %p5530_p4 }
  0x4a   : > { %p5538_p3 = pnand %p5537_p1, %p5531_p7 }
  0x4c   : > { %5541 = shalt.err (!%p5538_p3)
}
  0x4d   : > { %4841 = dma.hbm_to_vmem [thread:$0]  (!%p5764_p5), %s7916_s4, 32, %s260_s17, [#allocation9]  }
  0x4e   : > { %s5683_s23 = smov [#allocation13]  }
  0x4f   : > { %s283_s28 = sshll.u32 %s5683_s23, 4  ;;  %s284_s28 = int_to_ptr.vmem [resolvable:$true] %s283_s28 }
  0x50   : > { %s5553_s29 = scalar_lea.vmem %s284_s28, 64  ;;  %p5561_p13 = scmp.lt.s32.totalorder %s284_s28, %s284_s28 }
  0x51   : > { %p5554_p10 = scmp.ne.s32.totalorder %s284_s28, %s5553_s29  ;;  %p5562_p0 = scmp.lt.s32.totalorder %s5553_s29, %s5553_s29 }
  0x53   : > { %p5556_p11 = pnand %p5554_p10, %p5774_p6  ;;  %p5563_p2 = por %p5562_p0, %p5561_p13 }
  0x55   : > { %p5557_p12 = pneg %p5556_p11 }
  0x57   : > { %p5564_p1 = pnand %p5563_p2, %p5557_p12 }
  0x59   : > { %5567 = shalt.err (!%p5564_p1)
}
  0x5a   : > { %4847 = dma.hbm_to_vmem [thread:$0]  (!%p5764_p5), %s7918_s6, 64, %s284_s28, [#allocation12]  }
  0x5b   : > { %s4577_s14 = sadd.s32 4294967294, %s5672_s27   ;;  %s5832_s11 = sadd.s32 1, %s5672_s27  }
  0x5c   : > { %s30_s10 = ssub.s32 %s5672_s27, %s5832_s11  ;;  %s33_s15 = sadd.s32 1, %s5668_s26 }
  0x5d   : > { %p31_p3 = scmp.eq.s32.totalorder %s30_s10, 0  ;;  %p40_p6 = scmp.ne.s32.totalorder %s5668_s26, %s5664_s25 }
  0x5e   : > { %p41_p4 = scmp.eq.s32.totalorder %s5672_s27, 0  ;;  %p46_p7 = scmp.ne.s32.totalorder %s5664_s25, %s5660_s24 }
  0x5f   : > { %s5843_s16 = scalar_select %p31_p3, %s5668_s26, %s33_s15  }
  0x60   : > { %p5845_p8 = por %p41_p4, %p40_p6  ;;  %p7936_p9 = scmp.eq.s32.totalorder %s5751_s30, 0 }
  0x61   : > { %p196_p10 = scmp.eq.s32.totalorder %s5751_s30, 3  ;;  %p202_p11 = scmp.eq.s32.totalorder %s4577_s14, 3 }
  0x62   : > { %p5851_p5 = por %p7936_p9, %p46_p7  ;;  %p4862_p12 = scmp.lt.s32.totalorder %s5672_s27, 4 }
  0x63   : > { %s294_s19 = sand.u32 1, %s5668_s26   ;;  %p5858_p13 = por %p196_p10, %p40_p6 }
  0x64   : > { %s7937_s18 = scalar_select %p5851_p5, 1, 0 }
  0x65   : > { %s7938_s20 = scalar_select %p5858_p13, 1, 0 }
  0x66   : > { %p5862_p0 = por %p202_p11, %p46_p7  ;;  %s4586_s21 = sshll.u32 %s294_s19, 11 }
  0x67   : > { %s4766_s22 = sshll.u32 %s5672_s27, 15  ;;  %s298_s9 = scalar_lea.vmem [#allocation2], %s4586_s21 }
  0x68   : > { %s7939_s13 = scalar_select %p5862_p0, 1, 0 }
  0x69   : > { %s5870_s29 = scalar_lea.hbm %s7912_s0, %s4766_s22  ;;  %s306_s12 = sshll.u32 %s298_s9, 4  ;;  %s5872_s12 = int_to_ptr.vmem [resolvable:$true] %s306_s12 }
  0x6a   : > { %p5876_p2 = pnand %p4862_p12, %p5845_p8  ;;  %s5880_s10 = scalar_lea.sflag [#allocation3], %s294_s19 }
  0x6b   : > { %s5568_s15 = scalar_lea.hbm %s5870_s29, 32768  ;;  %s5573_s21 = scalar_lea.hbm %s7912_s0, 131072 }
  0x6c   : > { %p5569_p1 = scmp.ne.s32.totalorder %s5870_s29, %s5568_s15  ;;  %p5570_p3 = pneg %p5876_p2 }
  0x6d   : > { %p5574_p7 = scmp.lt.s32.totalorder %s5870_s29, %s7912_s0  ;;  %p5575_p8 = scmp.lt.s32.totalorder %s5573_s21, %s5568_s15 }
  0x6e   : > { %p5571_p6 = pnand %p5570_p3, %p5569_p1 }
  0x6f   : > { %p5576_p9 = por %p5575_p8, %p5574_p7 }
  0x70   : > { %p5572_p4 = pneg %p5571_p6 }
  0x72   : > { %p5577_p10 = pnand %p5576_p9, %p5572_p4 }
  0x74   : > { %5580 = shalt.err (!%p5577_p10)
}
  0x75   : > { %s5581_s17 = scalar_lea.vmem %s5872_s12, 32768  ;;  %s5684_s19 = smov [#allocation2]  }
  0x76   : > { %p5582_p11 = scmp.ne.s32.totalorder %s5872_s12, %s5581_s17  ;;  %s5586_s1 = sshll.u32 %s5684_s19, 4  ;;  %s5587_s1 = int_to_ptr.vmem [resolvable:$false] %s5586_s1 }
  0x77   : > { %s5588_s22 = scalar_lea.vmem %s5587_s1, 65536  ;;  %p5589_p6 = scmp.lt.s32.totalorder %s5872_s12, %s5587_s1 }
  0x78   : > { %p5584_p12 = pnand %p5582_p11, %p5570_p3  ;;  %p5590_p0 = scmp.lt.s32.totalorder %s5588_s22, %s5581_s17 }
  0x7a   : > { %p5585_p1 = pneg %p5584_p12  ;;  %p5591_p13 = por %p5590_p0, %p5589_p6 }
  0x7c   : > { %p5592_p5 = pnand %p5591_p13, %p5585_p1 }
  0x7e   : > { %5595 = shalt.err (!%p5592_p5)
}
  0x7f   : > { %s5685_s15 = smov 512   ;;  %s5686_s23 = smov 32  }
  0x80   : > { %4851 = dma.hbm_to_vmem [thread:$0]  (!%p5876_p2), %s5870_s29, 32768, %s5872_s12, %s5880_s10, %s5685_s15, %s5685_s15, %s5686_s23  }
  0x81   : > { %p7941_p3 = scmp.ne.s32.totalorder %s7931_s8, 0 }
  0x83   : > { %318 = sbr.rel (%p7941_p3) target bundleno = 1270 (0x4f6), region = 48 }
  0x88   : > { %s5904_s21 = sand.u32 1, %s5664_s25   ;;  %p7942_p5 = scmp.ne.s32.totalorder %s7937_s18, 0 }
  0x89   : > { %s4591_s1 = sshll.u32 %s5904_s21, 11  ;;  %s321_s28 = scalar_lea.sflag [#allocation3], %s5904_s21 }
  0x8a   : > { %s5910_s9 = scalar_lea.vmem [#allocation2], %s4591_s1 }
  0x8b   : > { %5639 = dma.done.wait (%p7942_p5), %s321_s28, 32768  }
  0x8c   : > { %5641 = vsyncadd (%p7942_p5), %s321_s28, 4294934528  ;;  %p7943_p13 = scmp.eq.s32.totalorder %s5751_s30, 0 }
  0x8e   : > { %5643 = dma.done.wait (%p7943_p13), [#allocation6], 8224   ;;  %p7944_p0 = pmov %p7943_p13 }
  0x90   : > { %5645 = vsyncadd (%p7944_p0), [#allocation6], 4294959072  ;;  %p7945_p2 = pmov %p7944_p0 }
  0x91   : > { %p7946_p4 = pmov %p7944_p0 }
  0x92   : > { %5647 = dma.done.wait (%p7945_p2), [#allocation9], 4128  }
  0x93   : > { %5649 = vsyncadd (%p7946_p4), [#allocation9], 4294963168  ;;  %p7947_p7 = pmov %p7944_p0 }
  0x94   : > { %p7948_p8 = pmov %p7944_p0 }
  0x95   : > { %5651 = dma.done.wait (%p7947_p7), [#allocation12], 8256  }
  0x96   : > { %5653 = vsyncadd (%p7948_p8), [#allocation12], 4294959040  ;;  %v4916_v0 = vld [vmem:[#allocation5 + $0x74] ss:$8 sps:$4 sm:$0xff]   ;;  %v4918_v1 = vld [vmem:[#allocation5 + $0x70] ss:$8 sps:$4 sm:$0xff]  }
  0x97   : > { %4769 = vmatprep.subr.bf16.mxu1 %v4916_v0  ;;  %v4919_v2 = vld [vmem:[#allocation5 + $0x64] ss:$8 sps:$4 sm:$0xff]   ;;  %1161 = vmatprep.subr.bf16.mxu0 %v4916_v0  ;;  %v4921_v3 = vld [vmem:[#allocation5 + $0x60] ss:$8 sps:$4 sm:$0xff]   ;;  %v4922_v4 = vld [vmem:[#allocation5 + $0x54] ss:$8 sps:$4 sm:$0xff]  }
  0x98   : > { %4785 = vmatpush1.bf16.msra.mxu1 %v4918_v1  ;;  %1162 = vmatpush1.bf16.msra.mxu0 %v4918_v1  ;;  %v4924_v5 = vld [vmem:[#allocation5 + $0x50] ss:$8 sps:$4 sm:$0xff]   ;;  %v4925_v6 = vld [vmem:[#allocation5 + $0x44] ss:$8 sps:$4 sm:$0xff]   ;;  %v4927_v7 = vld [vmem:[#allocation5 + $0x40] ss:$8 sps:$4 sm:$0xff]  }
  0x99   : > { %4770 = vmatprep.subr.bf16.mxu1 %v4919_v2  ;;  %1163 = vmatprep.subr.bf16.mxu0 %v4919_v2  ;;  %v4928_v8 = vld [vmem:[#allocation5 + $0x34] ss:$8 sps:$4 sm:$0xff]   ;;  %v4930_v9 = vld [vmem:[#allocation5 + $0x30] ss:$8 sps:$4 sm:$0xff]   ;;  %v4931_v10 = vld [vmem:[#allocation5 + $0x24] ss:$8 sps:$4 sm:$0xff]  }
  0x9a   : > { %v4933_v11 = vld [vmem:[#allocation5 + $0x20] ss:$8 sps:$4 sm:$0xff]   ;;  %v4934_v12 = vld [vmem:[#allocation5 + $0x14] ss:$8 sps:$4 sm:$0xff]   ;;  %v4936_v16 = vld [vmem:[#allocation5 + $0x10] ss:$8 sps:$4 sm:$0xff]  }
  0x9b   : > { %v510_v13 = vld [vmem:[%s5910_s9 + $0x408] sm:$0xff]  ;;  %v4940_v19 = vld [vmem:[#allocation5 + $0xf4] ss:$8 sps:$4 sm:$0xff]   ;;  %v4942_v20 = vld [vmem:[#allocation5 + $0xf0] ss:$8 sps:$4 sm:$0xff]   ;;  %s6999_s8 = scalar_lea.vmem [#allocation14], %s4591_s1 }
  0x9c   : > { %4786 = vmatpush1.bf16.msra.mxu1 %v4921_v3  ;;  %1164 = vmatpush1.bf16.msra.mxu0 %v4921_v3  ;;  %v514_v14 = vld [vmem:[%s5910_s9 + $0x428] sm:$0xff]  ;;  %v4946_v23 = vld [vmem:[#allocation5 + $0xd4] ss:$8 sps:$4 sm:$0xff]   ;;  %v4948_v24 = vld [vmem:[#allocation5 + $0xd0] ss:$8 sps:$4 sm:$0xff]   ;;  %s4768_s18 = sshll.u32 %s5751_s30, 15 }
  0x9d   : > { %4771 = vmatprep.subr.bf16.mxu1 %v4922_v4  ;;  %1165 = vmatprep.subr.bf16.mxu0 %v4922_v4  ;;  %v702_v15 = vpack.c.bf16 %v514_v14, %v510_v13  ;;  %v4937_v17 = vld [vmem:[#allocation5 + $0x4] ss:$8 sps:$4 sm:$0xff]   ;;  %v4939_v18 = vld [vmem:[#allocation5] ss:$8 sps:$4 sm:$0xff]   ;;  %v4952_v27 = vld [vmem:[#allocation5 + $0xb4] ss:$8 sps:$4 sm:$0xff]   ;;  %s7865_s10 = scalar_lea.hbm %s7919_s7, %s4768_s18 }
  0x9e   : > { %v4943_v21 = vld [vmem:[#allocation5 + $0xe4] ss:$8 sps:$4 sm:$0xff]   ;;  %v4945_v22 = vld [vmem:[#allocation5 + $0xe0] ss:$8 sps:$4 sm:$0xff]   ;;  %v4954_v28 = vld [vmem:[#allocation5 + $0xb0] ss:$8 sps:$4 sm:$0xff]  }
  0x9f   : > { %1353 = vmatprep.mubr.bf16.mxu1 %v702_v15  ;;  %v4949_v25 = vld [vmem:[#allocation5 + $0xc4] ss:$8 sps:$4 sm:$0xff]   ;;  %v4951_v26 = vld [vmem:[#allocation5 + $0xc0] ss:$8 sps:$4 sm:$0xff]   ;;  %v4958_v31 = vld [vmem:[#allocation5 + $0x94] ss:$8 sps:$4 sm:$0xff]  }
  0xa0   : > { %4787 = vmatpush1.bf16.msra.mxu1 %v4924_v5  ;;  %1166 = vmatpush1.bf16.msra.mxu0 %v4924_v5  ;;  %v4955_v29 = vld [vmem:[#allocation5 + $0xa4] ss:$8 sps:$4 sm:$0xff]   ;;  %v4957_v30 = vld [vmem:[#allocation5 + $0xa0] ss:$8 sps:$4 sm:$0xff]   ;;  %v4960_v32 = vld [vmem:[#allocation5 + $0x90] ss:$8 sps:$4 sm:$0xff]  }
  0xa1   : > { %4772 = vmatprep.subr.bf16.mxu1 %v4925_v6  ;;  %1167 = vmatprep.subr.bf16.mxu0 %v4925_v6  ;;  %v4961_v33 = vld [vmem:[#allocation5 + $0x84] ss:$8 sps:$4 sm:$0xff]   ;;  %v4963_v34 = vld [vmem:[#allocation5 + $0x80] ss:$8 sps:$4 sm:$0xff]   ;;  %v4966_v37 = vld [vmem:[#allocation5 + $0x174] ss:$8 sps:$4 sm:$0xff]  }
  0xa2   : > { %v509_v35 = vld [vmem:[%s5910_s9 + $0x400] sm:$0xff]  ;;  %v518_v38 = vld [vmem:[%s5910_s9 + $0x448] sm:$0xff]  ;;  %v4964_v43 = vld [vmem:[#allocation5 + $0x170] ss:$8 sps:$4 sm:$0xff]   ;;  %s4447_s29 = sshll.u32 %s6999_s8, 4  ;;  %s4433_s30 = scalar_lea.sflag [#allocation4], %s5904_s21  ;;  %s7867_s29 = int_to_ptr.vmem [resolvable:$true] %s4447_s29 }
  0xa3   : > { %v513_v36 = vld [vmem:[%s5910_s9 + $0x420] sm:$0xff]  ;;  %v522_v39 = vld [vmem:[%s5910_s9 + $0x468] sm:$0xff]  ;;  %v4972_v58 = vld [vmem:[#allocation5 + $0x154] ss:$8 sps:$4 sm:$0xff]   ;;  %s5596_s17 = scalar_lea.vmem %s7867_s29, 32768  ;;  %p8071_p10 = scmp.ne.s32.totalorder %s7938_s20, 0 }
  0xa4   : > { %4788 = vmatpush1.bf16.msra.mxu1 %v4927_v7  ;;  %1168 = vmatpush1.bf16.msra.mxu0 %v4927_v7  ;;  %v701_v40 = vpack.c.bf16 %v513_v36, %v509_v35  ;;  %v382_v41 = vld [vmem:[%s5910_s9 + $0x8] sm:$0xff]  ;;  %v706_v44 = vpack.c.bf16 %v522_v39, %v518_v38  ;;  %v381_v47 = vld [vmem:[%s5910_s9] sm:$0xff]  ;;  %v4970_v1 = vld [vmem:[#allocation5 + $0x150] ss:$8 sps:$4 sm:$0xff]   ;;  %p5597_p9 = scmp.ne.s32.totalorder %s7867_s29, %s5596_s17  ;;  %s5687_s19 = smov [#allocation14]  }
  0xa5   : > { %4773 = vmatprep.subr.bf16.mxu1 %v4928_v8  ;;  %1169 = vmatprep.subr.bf16.mxu0 %v4928_v8  ;;  %v386_v42 = vld [vmem:[%s5910_s9 + $0x28] sm:$0xff]  ;;  %v385_v48 = vld [vmem:[%s5910_s9 + $0x20] sm:$0xff]  ;;  %s5600_s22 = sshll.u32 %s5687_s19, 4  ;;  %s5601_s22 = int_to_ptr.vmem [resolvable:$false] %s5600_s22 }
  0xa6   : > { %v638_v45 = vpack.c.bf16 %v386_v42, %v382_v41  ;;  %v4969_v46 = vld [vmem:[#allocation5 + $0x164] ss:$8 sps:$4 sm:$0xff]   ;;  %v637_v50 = vpack.c.bf16 %v385_v48, %v381_v47  ;;  %v4967_v54 = vld [vmem:[#allocation5 + $0x160] ss:$8 sps:$4 sm:$0xff]   ;;  %v4990_v42 = vld [vmem:[#allocation5 + $0x1f4] ss:$8 sps:$4 sm:$0xff]   ;;  %p5598_p11 = pnand %p5597_p9, %p8071_p10  ;;  %p5603_p1 = scmp.lt.s32.totalorder %s7867_s29, %s5601_s22 }
  0xa7   : > { %v517_v49 = vld [vmem:[%s5910_s9 + $0x440] sm:$0xff]  ;;  %v390_v51 = vld [vmem:[%s5910_s9 + $0x48] sm:$0xff]  ;;  %s5602_s15 = scalar_lea.vmem %s5601_s22, 65536 }
  0xa8   : > { %4789 = vmatpush1.bf16.msra.mxu1 %v4930_v9  ;;  %1170 = vmatpush1.bf16.msra.mxu0 %v4930_v9  ;;  %v394_v52 = vld [vmem:[%s5910_s9 + $0x68] sm:$0xff]  ;;  %v521_v53 = vld [vmem:[%s5910_s9 + $0x460] sm:$0xff]  ;;  %p5599_p12 = pneg %p5598_p11  ;;  %p5604_p6 = scmp.lt.s32.totalorder %s5602_s15, %s5596_s17 }
  0xa9   : > { %4774 = vmatprep.subr.bf16.mxu1 %v4931_v10  ;;  %1171 = vmatprep.subr.bf16.mxu0 %v4931_v10  ;;  %v526_v55 = vld [vmem:[%s5910_s9 + $0x488] sm:$0xff]  ;;  %v642_v56 = vpack.c.bf16 %v394_v52, %v390_v51  ;;  %v389_v59 = vld [vmem:[%s5910_s9 + $0x40] sm:$0xff]  ;;  %v705_v63 = vpack.c.bf16 %v521_v53, %v517_v49  ;;  %v4978_v10 = vld [vmem:[#allocation5 + $0x134] ss:$8 sps:$4 sm:$0xff]  }
  0xaa   : > { %1193 = vmatprep.mubr.bf16.mxu0 %v638_v45  ;;  %v530_v57 = vld [vmem:[%s5910_s9 + $0x4a8] sm:$0xff]  ;;  %v393_v60 = vld [vmem:[%s5910_s9 + $0x60] sm:$0xff]  ;;  %v4988_v49 = vld [vmem:[#allocation5 + $0x1f0] ss:$8 sps:$4 sm:$0xff]   ;;  %p5605_p3 = por %p5604_p6, %p5603_p1 }
  0xab   : > { %v398_v61 = vld [vmem:[%s5910_s9 + $0x88] sm:$0xff]  ;;  %v710_v0 = vpack.c.bf16 %v530_v57, %v526_v55  ;;  %v641_v3 = vpack.c.bf16 %v393_v60, %v389_v59  ;;  %v525_v4 = vld [vmem:[%s5910_s9 + $0x480] sm:$0xff] }
  0xac   : > { %4790 = vmatpush1.bf16.msra.mxu1 %v4933_v11  ;;  %1172 = vmatpush1.bf16.msra.mxu0 %v4933_v11  ;;  %v402_v62 = vld [vmem:[%s5910_s9 + $0xa8] sm:$0xff]  ;;  %v529_v5 = vld [vmem:[%s5910_s9 + $0x4a0] sm:$0xff]  ;;  %p5606_p5 = pnand %p5605_p3, %p5599_p12 }
  0xad   : > { %4775 = vmatprep.subr.bf16.mxu1 %v4934_v12  ;;  %1173 = vmatprep.subr.bf16.mxu0 %v4934_v12  ;;  %v4975_v2 = vld [vmem:[#allocation5 + $0x144] ss:$8 sps:$4 sm:$0xff]   ;;  %v646_v6 = vpack.c.bf16 %v402_v62, %v398_v61  ;;  %v4973_v9 = vld [vmem:[#allocation5 + $0x140] ss:$8 sps:$4 sm:$0xff]   ;;  %v709_v15 = vpack.c.bf16 %v529_v5, %v525_v4 }
  0xae   : > { %v534_v7 = vld [vmem:[%s5910_s9 + $0x4c8] sm:$0xff]  ;;  %v397_v11 = vld [vmem:[%s5910_s9 + $0x80] sm:$0xff] }
  0xaf   : > { %v538_v8 = vld [vmem:[%s5910_s9 + $0x4e8] sm:$0xff]  ;;  %v401_v12 = vld [vmem:[%s5910_s9 + $0xa0] sm:$0xff] }
  0xb0   : > { %4791 = vmatpush1.bf16.msra.mxu1 %v4936_v16  ;;  %1174 = vmatpush1.bf16.msra.mxu0 %v4936_v16  ;;  %v406_v13 = vld [vmem:[%s5910_s9 + $0xc8] sm:$0xff]  ;;  %v714_v16 = vpack.c.bf16 %v538_v8, %v534_v7  ;;  %v541_v36 = vld [vmem:[%s5910_s9 + $0x500] sm:$0xff] }
  0xb1   : > { %4776 = vmatprep.subr.bf16.mxu1 %v4937_v17  ;;  %1175 = vmatprep.subr.bf16.mxu0 %v4937_v17  ;;  %v410_v14 = vld [vmem:[%s5910_s9 + $0xe8] sm:$0xff]  ;;  %v4976_v17 = vld [vmem:[#allocation5 + $0x130] ss:$8 sps:$4 sm:$0xff]   ;;  %v549_v52 = vld [vmem:[%s5910_s9 + $0x540] sm:$0xff] }
  0xb2   : > { %v550_v39 = vld [vmem:[%s5910_s9 + $0x548] sm:$0xff]  ;;  %v553_v53 = vld [vmem:[%s5910_s9 + $0x560] sm:$0xff] }
  0xb3   : > { %v4985_v41 = vld [vmem:[#allocation5 + $0x100] ss:$8 sps:$4 sm:$0xff]  }
  0xb4   : > { %4792 = vmatpush1.bf16.msra.mxu1 %v4939_v18  ;;  %1176 = vmatpush1.bf16.msra.mxu0 %v4939_v18  ;;  %v4981_v18 = vld [vmem:[#allocation5 + $0x124] ss:$8 sps:$4 sm:$0xff]   ;;  %v4991_v57 = vld [vmem:[#allocation5 + $0x1e0] ss:$8 sps:$4 sm:$0xff]  }
  0xb5   : > { %4777 = vmatprep.subr.bf16.mxu1 %v4940_v19  ;;  %1177 = vmatprep.subr.bf16.mxu0 %v4940_v19  ;;  %v645_v19 = vpack.c.bf16 %v401_v12, %v397_v11  ;;  %v422_v45 = vld [vmem:[%s5910_s9 + $0x148] sm:$0xff]  ;;  %v421_v59 = vld [vmem:[%s5910_s9 + $0x140] sm:$0xff] }
  0xb6   : > { %v558_v55 = vld [vmem:[%s5910_s9 + $0x588] sm:$0xff]  ;;  %v425_v60 = vld [vmem:[%s5910_s9 + $0x160] sm:$0xff] }
  0xb7   : > { %v430_v61 = vld [vmem:[%s5910_s9 + $0x188] sm:$0xff]  ;;  %v557_v4 = vld [vmem:[%s5910_s9 + $0x580] sm:$0xff] }
  0xb8   : > { %4793 = vmatpush2.bf16.msra.mxu1 %v4942_v20  ;;  %1178 = vmatpush2.bf16.msra.mxu0 %v4942_v20  ;;  %v533_v20 = vld [vmem:[%s5910_s9 + $0x4c0] sm:$0xff]  ;;  %v434_v62 = vld [vmem:[%s5910_s9 + $0x1a8] sm:$0xff] }
  0xb9   : > { %4778 = vmatprep.subr.bf16.mxu1 %v4943_v21  ;;  %1179 = vmatprep.subr.bf16.mxu0 %v4943_v21  ;;  %v537_v21 = vld [vmem:[%s5910_s9 + $0x4e0] sm:$0xff]  ;;  %v566_v7 = vld [vmem:[%s5910_s9 + $0x5c8] sm:$0xff] }
  0xba   : > { %v561_v5 = vld [vmem:[%s5910_s9 + $0x5a0] sm:$0xff]  ;;  %v570_v8 = vld [vmem:[%s5910_s9 + $0x5e8] sm:$0xff] }
  0xbb   : > { %v429_v11 = vld [vmem:[%s5910_s9 + $0x180] sm:$0xff] }
  0xbc   : > { %4794 = vmatpush2.bf16.msra.mxu1 %v4945_v22  ;;  %1180 = vmatpush2.bf16.msra.mxu0 %v4945_v22  ;;  %v650_v22 = vpack.c.bf16 %v410_v14, %v406_v13  ;;  %v433_v12 = vld [vmem:[%s5910_s9 + $0x1a0] sm:$0xff]  ;;  %v438_v13 = vld [vmem:[%s5910_s9 + $0x1c8] sm:$0xff] }
  0xbd   : > { %4779 = vmatprep.subr.bf16.mxu1 %v4946_v23  ;;  %1181 = vmatprep.subr.bf16.mxu0 %v4946_v23  ;;  %v542_v23 = vld [vmem:[%s5910_s9 + $0x508] sm:$0xff] }
  0xbe   : > { %v442_v14 = vld [vmem:[%s5910_s9 + $0x1e8] sm:$0xff] }
  0xc0   : > { %4795 = vmatpush2.bf16.msra.mxu1 %v4948_v24  ;;  %1182 = vmatpush2.bf16.msra.mxu0 %v4948_v24  ;;  %v546_v24 = vld [vmem:[%s5910_s9 + $0x528] sm:$0xff] }
  0xc1   : > { %4780 = vmatprep.subr.bf16.mxu1 %v4949_v25  ;;  %1183 = vmatprep.subr.bf16.mxu0 %v4949_v25  ;;  %v4979_v25 = vld [vmem:[#allocation5 + $0x120] ss:$8 sps:$4 sm:$0xff]  }
  0xc4   : > { %4796 = vmatpush2.bf16.msra.mxu1 %v4951_v26  ;;  %1184 = vmatpush2.bf16.msra.mxu0 %v4951_v26  ;;  %v4984_v26 = vld [vmem:[#allocation5 + $0x114] ss:$8 sps:$4 sm:$0xff]  }
  0xc5   : > { %4781 = vmatprep.subr.bf16.mxu1 %v4952_v27  ;;  %1185 = vmatprep.subr.bf16.mxu0 %v4952_v27  ;;  %v405_v27 = vld [vmem:[%s5910_s9 + $0xc0] sm:$0xff] }
  0xc8   : > { %4797 = vmatpush2.bf16.msra.mxu1 %v4954_v28  ;;  %1186 = vmatpush2.bf16.msra.mxu0 %v4954_v28  ;;  %v409_v28 = vld [vmem:[%s5910_s9 + $0xe0] sm:$0xff] }
  0xc9   : > { %4782 = vmatprep.subr.bf16.mxu1 %v4955_v29  ;;  %1187 = vmatprep.subr.bf16.mxu0 %v4955_v29  ;;  %v414_v29 = vld [vmem:[%s5910_s9 + $0x108] sm:$0xff]  ;;  %v649_v35 = vpack.c.bf16 %v409_v28, %v405_v27  ;;  %v437_v27 = vld [vmem:[%s5910_s9 + $0x1c0] sm:$0xff] }
  0xca   : > { %v441_v28 = vld [vmem:[%s5910_s9 + $0x1e0] sm:$0xff] }
  0xcc   : > { %4798 = vmatpush2.bf16.msra.mxu1 %v4957_v30  ;;  %1188 = vmatpush2.bf16.msra.mxu0 %v4957_v30  ;;  %v418_v30 = vld [vmem:[%s5910_s9 + $0x128] sm:$0xff] }
  0xcd   : > { %4783 = vmatprep.subr.bf16.mxu1 %v4958_v31  ;;  %1189 = vmatprep.subr.bf16.mxu0 %v4958_v31  ;;  %v713_v31 = vpack.c.bf16 %v537_v21, %v533_v20  ;;  %v654_v38 = vpack.c.bf16 %v418_v30, %v414_v29  ;;  %v565_v20 = vld [vmem:[%s5910_s9 + $0x5c0] sm:$0xff]  ;;  %v446_v30 = vld [vmem:[%s5910_s9 + $0x208] sm:$0xff] }
  0xce   : > { %v569_v21 = vld [vmem:[%s5910_s9 + $0x5e0] sm:$0xff] }
  0xcf   : > { %v729_v29 = vpack.c.bf16 %v569_v21, %v565_v20  ;;  %v482_v21 = vld [vmem:[%s5910_s9 + $0x328] sm:$0xff] }
  0xd0   : > { %4799 = vmatpush2.bf16.msra.mxu1 %v4960_v32  ;;  %1190 = vmatpush2.bf16.msra.mxu0 %v4960_v32  ;;  %v718_v32 = vpack.c.bf16 %v546_v24, %v542_v23  ;;  %v574_v23 = vld [vmem:[%s5910_s9 + $0x608] sm:$0xff] }
  0xd1   : > { %4784 = vmatprep.subr.bf16.mxu1 %v4961_v33  ;;  %1191 = vmatprep.subr.bf16.mxu0 %v4961_v33  ;;  %v4982_v33 = vld [vmem:[#allocation5 + $0x110] ss:$8 sps:$4 sm:$0xff]   ;;  %v578_v24 = vld [vmem:[%s5910_s9 + $0x628] sm:$0xff] }
  0xd4   : > { %4800 = vmatpush2.bf16.msra.mxu1 %v4963_v34  ;;  %1192 = vmatpush2.bf16.msra.mxu0 %v4963_v34  ;;  %v4987_v34 = vld [vmem:[#allocation5 + $0x104] ss:$8 sps:$4 sm:$0xff]  }
  0xd5   : > { %1514 = vmatprep.subr.bf16.mxu1 %v4966_v37  ;;  %v545_v37 = vld [vmem:[%s5910_s9 + $0x520] sm:$0xff] }
  0xd6   : > { %v717_v47 = vpack.c.bf16 %v545_v37, %v541_v36  ;;  %v573_v37 = vld [vmem:[%s5910_s9 + $0x600] sm:$0xff] }
  0xd7   : > { %1354 = vmatmul.mubr.bf16.vlgmr.msra.gmra.mxu1 %v701_v40  ;;  %1194 = vmatmul.mubr.bf16.vlgmr.msra.gmra.mxu0 %v637_v50  ;;  %v554_v40 = vld [vmem:[%s5910_s9 + $0x568] sm:$0xff] }
  0xd8   : > { %1515 = vmatpush1.bf16.msra.mxu1 %v4964_v43  ;;  %1363 = vmatprep.mubr.bf16.mxu1 %v706_v44  ;;  %v413_v43 = vld [vmem:[%s5910_s9 + $0x100] sm:$0xff]  ;;  %v722_v48 = vpack.c.bf16 %v554_v40, %v550_v39  ;;  %v582_v40 = vld [vmem:[%s5910_s9 + $0x648] sm:$0xff] }
  0xd9   : > { %1516 = vmatprep.subr.bf16.mxu1 %v4969_v46  ;;  %1203 = vmatprep.mubr.bf16.mxu0 %v642_v56  ;;  %v417_v44 = vld [vmem:[%s5910_s9 + $0x120] sm:$0xff]  ;;  %v426_v46 = vld [vmem:[%s5910_s9 + $0x168] sm:$0xff] }
  0xda   : > { %v4993_v50 = vld [vmem:[#allocation5 + $0x1e4] ss:$8 sps:$4 sm:$0xff]   ;;  %v653_v51 = vpack.c.bf16 %v417_v44, %v413_v43  ;;  %v5009_v39 = vld [vmem:[#allocation5 + $0x180] ss:$8 sps:$4 sm:$0xff]  }
  0xdb   : > { %v562_v56 = vld [vmem:[%s5910_s9 + $0x5a8] sm:$0xff]  ;;  %v449_v43 = vld [vmem:[%s5910_s9 + $0x220] sm:$0xff] }
  0xdc   : > { %1517 = vmatpush1.bf16.msra.mxu1 %v4967_v54  ;;  %v658_v54 = vpack.c.bf16 %v426_v46, %v422_v45  ;;  %v454_v45 = vld [vmem:[%s5910_s9 + $0x248] sm:$0xff] }
  0xdd   : > { %1518 = vmatprep.subr.bf16.mxu1 %v4972_v58  ;;  %v4996_v58 = vld [vmem:[#allocation5 + $0x1d4] ss:$8 sps:$4 sm:$0xff]   ;;  %v458_v46 = vld [vmem:[%s5910_s9 + $0x268] sm:$0xff] }
  0xdf   : > { %1364 = vmatmul.mubr.bf16.gmra.mxu1 %v705_v63  ;;  %1204 = vmatmul.mubr.bf16.gmra.mxu0 %v641_v3  ;;  %v721_v63 = vpack.c.bf16 %v553_v53, %v549_v52  ;;  %v657_v3 = vpack.c.bf16 %v425_v60, %v421_v59  ;;  %v590_v52 = vld [vmem:[%s5910_s9 + $0x688] sm:$0xff] }
  0xe0   : > { %1373 = vmatprep.mubr.bf16.mxu1 %v710_v0  ;;  %1519 = vmatpush1.bf16.msra.mxu1 %v4970_v1  ;;  %v726_v0 = vpack.c.bf16 %v562_v56, %v558_v55  ;;  %v4994_v1 = vld [vmem:[#allocation5 + $0x1d0] ss:$8 sps:$4 sm:$0xff]   ;;  %v594_v53 = vld [vmem:[%s5910_s9 + $0x6a8] sm:$0xff]  ;;  %v457_v55 = vld [vmem:[%s5910_s9 + $0x260] sm:$0xff] }
  0xe1   : > { %1520 = vmatprep.subr.bf16.mxu1 %v4975_v2  ;;  %1213 = vmatprep.mubr.bf16.mxu0 %v646_v6  ;;  %v4999_v2 = vld [vmem:[#allocation5 + $0x1c4] ss:$8 sps:$4 sm:$0xff]   ;;  %v662_v6 = vpack.c.bf16 %v434_v62, %v430_v61 }
  0xe2   : > { %v466_v59 = vld [vmem:[%s5910_s9 + $0x2a8] sm:$0xff]  ;;  %v589_v62 = vld [vmem:[%s5910_s9 + $0x680] sm:$0xff] }
  0xe4   : > { %1521 = vmatpush1.bf16.msra.mxu1 %v4973_v9  ;;  %v4997_v9 = vld [vmem:[#allocation5 + $0x1c0] ss:$8 sps:$4 sm:$0xff]  }
  0xe5   : > { %1522 = vmatprep.subr.bf16.mxu1 %v4978_v10  ;;  %v5002_v10 = vld [vmem:[#allocation5 + $0x1b4] ss:$8 sps:$4 sm:$0xff]  }
  0xe7   : > { %1374 = vmatmul.mubr.bf16.gmra.mxu1 %v709_v15  ;;  %1214 = vmatmul.mubr.bf16.gmra.mxu0 %v645_v19  ;;  %v725_v15 = vpack.c.bf16 %v561_v5, %v557_v4  ;;  %v661_v19 = vpack.c.bf16 %v433_v12, %v429_v11  ;;  %v470_v5 = vld [vmem:[%s5910_s9 + $0x2c8] sm:$0xff]  ;;  %v597_v12 = vld [vmem:[%s5910_s9 + $0x6c0] sm:$0xff] }
  0xe8   : > { %1383 = vmatprep.mubr.bf16.mxu1 %v714_v16  ;;  %1523 = vmatpush1.bf16.msra.mxu1 %v4976_v17  ;;  %v730_v16 = vpack.c.bf16 %v570_v8, %v566_v7  ;;  %v5000_v17 = vld [vmem:[#allocation5 + $0x1b0] ss:$8 sps:$4 sm:$0xff]   ;;  %v474_v7 = vld [vmem:[%s5910_s9 + $0x2e8] sm:$0xff] }
  0xe9   : > { %1524 = vmatprep.subr.bf16.mxu1 %v4981_v18  ;;  %1223 = vmatprep.mubr.bf16.mxu0 %v650_v22  ;;  %v5005_v18 = vld [vmem:[#allocation5 + $0x1a4] ss:$8 sps:$4 sm:$0xff]   ;;  %v666_v22 = vpack.c.bf16 %v442_v14, %v438_v13  ;;  %v682_v11 = vpack.c.bf16 %v474_v7, %v470_v5  ;;  %v388_v7 = vld [vmem:[%s5910_s9 + $0x38] sm:$0xff] }
  0xea   : > { %v601_v13 = vld [vmem:[%s5910_s9 + $0x6e0] sm:$0xff]  ;;  %v606_v14 = vld [vmem:[%s5910_s9 + $0x708] sm:$0xff] }
  0xeb   : > { %v633_v5 = vld [vmem:[%s5910_s9 + $0x7e0] sm:$0xff] }
  0xec   : > { %1525 = vmatpush1.bf16.msra.mxu1 %v4979_v25  ;;  %v5003_v25 = vld [vmem:[#allocation5 + $0x1a0] ss:$8 sps:$4 sm:$0xff]  }
  0xed   : > { %1526 = vmatprep.subr.bf16.mxu1 %v4984_v26  ;;  %v5008_v26 = vld [vmem:[#allocation5 + $0x194] ss:$8 sps:$4 sm:$0xff]  }
  0xef   : > { %1384 = vmatmul.mubr.bf16.gmra.mxu1 %v713_v31  ;;  %1224 = vmatmul.mubr.bf16.gmra.mxu0 %v649_v35  ;;  %v450_v31 = vld [vmem:[%s5910_s9 + $0x228] sm:$0xff]  ;;  %v665_v35 = vpack.c.bf16 %v441_v28, %v437_v27  ;;  %v609_v27 = vld [vmem:[%s5910_s9 + $0x720] sm:$0xff] }
  0xf0   : > { %1393 = vmatprep.mubr.bf16.mxu1 %v718_v32  ;;  %1527 = vmatpush1.bf16.msra.mxu1 %v4982_v33  ;;  %v734_v32 = vpack.c.bf16 %v578_v24, %v574_v23  ;;  %v5006_v33 = vld [vmem:[#allocation5 + $0x190] ss:$8 sps:$4 sm:$0xff]   ;;  %v670_v36 = vpack.c.bf16 %v450_v31, %v446_v30  ;;  %v5015_v23 = vld [vmem:[#allocation8 + $0x60] ss:$8 sps:$4 sm:$0xff]  }
  0xf1   : > { %1528 = vmatprep.subr.bf16.mxu1 %v4987_v34  ;;  %1233 = vmatprep.mubr.bf16.mxu0 %v654_v38  ;;  %v5011_v34 = vld [vmem:[#allocation5 + $0x184] ss:$8 sps:$4 sm:$0xff]  }
  0xf2   : > { %v577_v38 = vld [vmem:[%s5910_s9 + $0x620] sm:$0xff]  ;;  %v614_v28 = vld [vmem:[%s5910_s9 + $0x748] sm:$0xff] }
  0xf3   : > { %v733_v44 = vpack.c.bf16 %v577_v38, %v573_v37  ;;  %v5017_v24 = vld [vmem:[#allocation8 + $0x64] ss:$8 sps:$4 sm:$0xff]   ;;  %v5018_v37 = vld [vmem:[#allocation8 + $0x50] ss:$8 sps:$4 sm:$0xff]   ;;  %v5020_v38 = vld [vmem:[#allocation8 + $0x54] ss:$8 sps:$4 sm:$0xff]  }
  0xf4   : > { %1529 = vmatpush1.bf16.msra.mxu1 %v4985_v41  ;;  %v586_v41 = vld [vmem:[%s5910_s9 + $0x668] sm:$0xff]  ;;  %v477_v30 = vld [vmem:[%s5910_s9 + $0x300] sm:$0xff] }
  0xf5   : > { %1530 = vmatprep.subr.bf16.mxu1 %v4990_v42  ;;  %v445_v42 = vld [vmem:[%s5910_s9 + $0x200] sm:$0xff] }
  0xf6   : > { %v481_v31 = vld [vmem:[%s5910_s9 + $0x320] sm:$0xff] }
  0xf7   : > { %1394 = vmatmul.mubr.bf16.gmra.mxu1 %v717_v47  ;;  %1234 = vmatmul.mubr.bf16.gmra.mxu0 %v653_v51  ;;  %v738_v47 = vpack.c.bf16 %v586_v41, %v582_v40  ;;  %v585_v51 = vld [vmem:[%s5910_s9 + $0x660] sm:$0xff] }
  0xf8   : > { %1403 = vmatprep.mubr.bf16.mxu1 %v722_v48  ;;  %1531 = vmatpush2.bf16.msra.mxu1 %v4988_v49  ;;  %v669_v48 = vpack.c.bf16 %v449_v43, %v445_v42  ;;  %v674_v49 = vpack.c.bf16 %v458_v46, %v454_v45  ;;  %v613_v40 = vld [vmem:[%s5910_s9 + $0x740] sm:$0xff]  ;;  %v622_v42 = vld [vmem:[%s5910_s9 + $0x788] sm:$0xff] }
  0xf9   : > { %1532 = vmatprep.subr.bf16.mxu1 %v4993_v50  ;;  %1243 = vmatprep.mubr.bf16.mxu0 %v658_v54  ;;  %v581_v50 = vld [vmem:[%s5910_s9 + $0x640] sm:$0xff]  ;;  %v626_v43 = vld [vmem:[%s5910_s9 + $0x7a8] sm:$0xff] }
  0xfa   : > { %v453_v54 = vld [vmem:[%s5910_s9 + $0x240] sm:$0xff]  ;;  %v737_v56 = vpack.c.bf16 %v585_v51, %v581_v50 }
  0xfb   : > { %v673_v60 = vpack.c.bf16 %v457_v55, %v453_v54  ;;  %v617_v41 = vld [vmem:[%s5910_s9 + $0x760] sm:$0xff] }
  0xfc   : > { %1533 = vmatpush2.bf16.msra.mxu1 %v4991_v57  ;;  %v462_v57 = vld [vmem:[%s5910_s9 + $0x288] sm:$0xff]  ;;  %v489_v45 = vld [vmem:[%s5910_s9 + $0x360] sm:$0xff]  ;;  %v753_v46 = vpack.c.bf16 %v617_v41, %v613_v40  ;;  %v411_v40 = vld [vmem:[%s5910_s9 + $0xf0] sm:$0xff] }
  0xfd   : > { %1534 = vmatprep.subr.bf16.mxu1 %v4996_v58  ;;  %v742_v58 = vpack.c.bf16 %v594_v53, %v590_v52  ;;  %v678_v61 = vpack.c.bf16 %v466_v59, %v462_v57  ;;  %v5021_v51 = vld [vmem:[#allocation8 + $0x40] ss:$8 sps:$4 sm:$0xff]   ;;  %v5023_v52 = vld [vmem:[#allocation8 + $0x44] ss:$8 sps:$4 sm:$0xff]   ;;  %v416_v41 = vld [vmem:[%s5910_s9 + $0x118] sm:$0xff] }
  0xfe   : > { %v621_v54 = vld [vmem:[%s5910_s9 + $0x780] sm:$0xff]  ;;  %v634_v57 = vld [vmem:[%s5910_s9 + $0x7e8] sm:$0xff] }
  0xff   : > { %1404 = vmatmul.mubr.bf16.gmra.mxu1 %v721_v63  ;;  %1244 = vmatmul.mubr.bf16.gmra.mxu0 %v657_v3  ;;  %v593_v63 = vld [vmem:[%s5910_s9 + $0x6a0] sm:$0xff] }
 0x100   : > { %1413 = vmatprep.mubr.bf16.mxu1 %v726_v0  ;;  %1535 = vmatpush2.bf16.msra.mxu1 %v4994_v1  ;;  %v598_v0 = vld [vmem:[%s5910_s9 + $0x6c8] sm:$0xff]  ;;  %v465_v3 = vld [vmem:[%s5910_s9 + $0x2a0] sm:$0xff]  ;;  %v741_v4 = vpack.c.bf16 %v593_v63, %v589_v62 }
 0x101   : > { %1536 = vmatprep.subr.bf16.mxu1 %v4999_v2  ;;  %1253 = vmatprep.mubr.bf16.mxu0 %v662_v6  ;;  %v602_v1 = vld [vmem:[%s5910_s9 + $0x6e8] sm:$0xff]  ;;  %v461_v2 = vld [vmem:[%s5910_s9 + $0x280] sm:$0xff] }
 0x102   : > { %v746_v6 = vpack.c.bf16 %v602_v1, %v598_v0  ;;  %v677_v8 = vpack.c.bf16 %v465_v3, %v461_v2  ;;  %v625_v55 = vld [vmem:[%s5910_s9 + $0x7a0] sm:$0xff]  ;;  %v506_v63 = vld [vmem:[%s5910_s9 + $0x3e8] sm:$0xff]  ;;  %v5024_v1 = vld [vmem:[#allocation8 + $0x30] ss:$8 sps:$4 sm:$0xff]  }
 0x103   : > { %v497_v59 = vld [vmem:[%s5910_s9 + $0x3a0] sm:$0xff] }
 0x104   : > { %1537 = vmatpush2.bf16.msra.mxu1 %v4997_v9  ;;  %v5012_v9 = vld [vmem:[#allocation8 + $0x70] ss:$8 sps:$4 sm:$0xff]   ;;  %v5026_v2 = vld [vmem:[#allocation8 + $0x34] ss:$8 sps:$4 sm:$0xff]  }
 0x105   : > { %1538 = vmatprep.subr.bf16.mxu1 %v5002_v10  ;;  %v5014_v10 = vld [vmem:[#allocation8 + $0x74] ss:$8 sps:$4 sm:$0xff]  }
 0x106   : > { %2263 = vmatprep.subr.bf16.mxu0 %v5014_v10 }
 0x107   : > { %1414 = vmatmul.mubr.bf16.gmra.mxu1 %v725_v15  ;;  %1254 = vmatmul.mubr.bf16.gmra.mxu0 %v661_v19  ;;  %v610_v15 = vld [vmem:[%s5910_s9 + $0x728] sm:$0xff] }
 0x108   : > { %1423 = vmatprep.mubr.bf16.mxu1 %v730_v16  ;;  %1539 = vmatpush2.bf16.msra.mxu1 %v5000_v17  ;;  %v469_v16 = vld [vmem:[%s5910_s9 + $0x2c0] sm:$0xff]  ;;  %v478_v19 = vld [vmem:[%s5910_s9 + $0x308] sm:$0xff]  ;;  %v750_v20 = vpack.c.bf16 %v610_v15, %v606_v14  ;;  %v383_v15 = vld [vmem:[%s5910_s9 + $0x10] sm:$0xff] }
 0x109   : > { %1540 = vmatprep.subr.bf16.mxu1 %v5005_v18  ;;  %1263 = vmatprep.mubr.bf16.mxu0 %v666_v22  ;;  %v473_v17 = vld [vmem:[%s5910_s9 + $0x2e0] sm:$0xff]  ;;  %v745_v18 = vpack.c.bf16 %v601_v13, %v597_v12 }
 0x10a   : > { %2264 = vmatpush1.bf16.msra.mxu0 %v5012_v9  ;;  %v681_v22 = vpack.c.bf16 %v473_v17, %v469_v16  ;;  %v505_v9 = vld [vmem:[%s5910_s9 + $0x3e0] sm:$0xff]  ;;  %v387_v16 = vld [vmem:[%s5910_s9 + $0x30] sm:$0xff]  ;;  %v392_v17 = vld [vmem:[%s5910_s9 + $0x58] sm:$0xff] }
 0x10b   : > { %2265 = vmatprep.subr.bf16.mxu0 %v5017_v24  ;;  %v5027_v13 = vld [vmem:[#allocation8 + $0x20] ss:$8 sps:$4 sm:$0xff]   ;;  %v5029_v14 = vld [vmem:[#allocation8 + $0x24] ss:$8 sps:$4 sm:$0xff]  }
 0x10c   : > { %1541 = vmatpush2.bf16.msra.mxu1 %v5003_v25  ;;  %v686_v25 = vpack.c.bf16 %v482_v21, %v478_v19  ;;  %v639_v19 = vpack.c.bf16 %v387_v16, %v383_v15  ;;  %v5030_v21 = vld [vmem:[#allocation8 + $0x10] ss:$8 sps:$4 sm:$0xff]  }
 0x10d   : > { %1542 = vmatprep.subr.bf16.mxu1 %v5008_v26  ;;  %v605_v26 = vld [vmem:[%s5910_s9 + $0x700] sm:$0xff]  ;;  %v395_v24 = vld [vmem:[%s5910_s9 + $0x70] sm:$0xff] }
 0x10e   : > { %2266 = vmatpush1.bf16.msra.mxu0 %v5015_v23  ;;  %v391_v23 = vld [vmem:[%s5910_s9 + $0x50] sm:$0xff] }
 0x10f   : > { %1424 = vmatmul.mubr.bf16.gmra.mxu1 %v729_v29  ;;  %1264 = vmatmul.mubr.bf16.gmra.mxu0 %v665_v35  ;;  %v618_v29 = vld [vmem:[%s5910_s9 + $0x768] sm:$0xff]  ;;  %v447_v15 = vld [vmem:[%s5910_s9 + $0x210] sm:$0xff] }
 0x110   : > { %1433 = vmatprep.mubr.bf16.mxu1 %v734_v32  ;;  %1543 = vmatpush2.bf16.msra.mxu1 %v5006_v33  ;;  %v749_v32 = vpack.c.bf16 %v609_v27, %v605_v26  ;;  %v486_v33 = vld [vmem:[%s5910_s9 + $0x348] sm:$0xff]  ;;  %v404_v26 = vld [vmem:[%s5910_s9 + $0xb8] sm:$0xff]  ;;  %v643_v27 = vpack.c.bf16 %v395_v24, %v391_v23  ;;  %v451_v16 = vld [vmem:[%s5910_s9 + $0x230] sm:$0xff] }
 0x111   : > { %1544 = vmatprep.subr.bf16.mxu1 %v5011_v34  ;;  %1273 = vmatprep.mubr.bf16.mxu0 %v670_v36  ;;  %v754_v34 = vpack.c.bf16 %v618_v29, %v614_v28  ;;  %v490_v35 = vld [vmem:[%s5910_s9 + $0x368] sm:$0xff]  ;;  %v685_v36 = vpack.c.bf16 %v481_v31, %v477_v30  ;;  %v399_v31 = vld [vmem:[%s5910_s9 + $0x90] sm:$0xff] }
 0x112   : > { %2267 = vmatprep.subr.bf16.mxu0 %v5020_v38  ;;  %v5033_v29 = vld [vmem:[#allocation8] ss:$8 sps:$4 sm:$0xff]   ;;  %v5035_v30 = vld [vmem:[#allocation8 + $0x4] ss:$8 sps:$4 sm:$0xff]   ;;  %v5038_v38 = vld [vmem:[#allocation8 + $0xf4] ss:$8 sps:$4 sm:$0xff]  }
 0x113   : > { %2268 = vmatpush1.bf16.msra.mxu0 %v5018_v37  ;;  %v5036_v37 = vld [vmem:[#allocation8 + $0xf0] ss:$8 sps:$4 sm:$0xff]  }
 0x114   : > { %1545 = vmatpush2.bf16.msra.mxu1 %v5009_v39  ;;  %v690_v39 = vpack.c.bf16 %v490_v35, %v486_v33  ;;  %2269 = vmatprep.subr.bf16.mxu0 %v5023_v52  ;;  %v408_v33 = vld [vmem:[%s5910_s9 + $0xd8] sm:$0xff]  ;;  %v455_v24 = vld [vmem:[%s5910_s9 + $0x250] sm:$0xff] }
 0x117   : > { %1434 = vmatmul.mubr.bf16.gmra.mxu1 %v733_v44  ;;  %1274 = vmatmul.mubr.bf16.gmra.mxu0 %v669_v48  ;;  %v485_v44 = vld [vmem:[%s5910_s9 + $0x340] sm:$0xff]  ;;  %v758_v48 = vpack.c.bf16 %v626_v43, %v622_v42  ;;  %v420_v42 = vld [vmem:[%s5910_s9 + $0x138] sm:$0xff] }
 0x118   : > { %1443 = vmatprep.mubr.bf16.mxu1 %v738_v47  ;;  %1283 = vmatprep.mubr.bf16.mxu0 %v674_v49  ;;  %v494_v47 = vld [vmem:[%s5910_s9 + $0x388] sm:$0xff]  ;;  %v689_v50 = vpack.c.bf16 %v489_v45, %v485_v44  ;;  %v656_v44 = vpack.c.bf16 %v420_v42, %v416_v41  ;;  %v472_v42 = vld [vmem:[%s5910_s9 + $0x2d8] sm:$0xff] }
 0x119   : > { %v498_v49 = vld [vmem:[%s5910_s9 + $0x3a8] sm:$0xff]  ;;  %2270 = vmatpush1.bf16.msra.mxu0 %v5021_v51 }
 0x11a   : > { %v694_v53 = vpack.c.bf16 %v498_v49, %v494_v47  ;;  %2271 = vmatprep.subr.bf16.mxu0 %v5026_v2  ;;  %v5039_v45 = vld [vmem:[#allocation8 + $0xe0] ss:$8 sps:$4 sm:$0xff]   ;;  %v415_v47 = vld [vmem:[%s5910_s9 + $0x110] sm:$0xff]  ;;  %v424_v49 = vld [vmem:[%s5910_s9 + $0x158] sm:$0xff] }
 0x11b   : > { %v444_v2 = vld [vmem:[%s5910_s9 + $0x1f8] sm:$0xff] }
 0x11d   : > { %2272 = vmatpush1.bf16.msra.mxu0 %v5024_v1  ;;  %v440_v1 = vld [vmem:[%s5910_s9 + $0x1d8] sm:$0xff] }
 0x11e   : > { %2273 = vmatprep.subr.bf16.mxu0 %v5029_v14  ;;  %v5053_v14 = vld [vmem:[#allocation8 + $0xa4] ss:$8 sps:$4 sm:$0xff]  }
 0x11f   : > { %1444 = vmatmul.mubr.bf16.gmra.mxu1 %v737_v56  ;;  %1284 = vmatmul.mubr.bf16.gmra.mxu0 %v673_v60  ;;  %v630_v56 = vld [vmem:[%s5910_s9 + $0x7c8] sm:$0xff]  ;;  %v757_v60 = vpack.c.bf16 %v625_v55, %v621_v54  ;;  %v5044_v54 = vld [vmem:[#allocation8 + $0xd4] ss:$8 sps:$4 sm:$0xff]  }
 0x120   : > { %1453 = vmatprep.mubr.bf16.mxu1 %v742_v58  ;;  %1293 = vmatprep.mubr.bf16.mxu0 %v678_v61  ;;  %v493_v58 = vld [vmem:[%s5910_s9 + $0x380] sm:$0xff]  ;;  %v502_v61 = vld [vmem:[%s5910_s9 + $0x3c8] sm:$0xff]  ;;  %v762_v62 = vpack.c.bf16 %v634_v57, %v630_v56  ;;  %v423_v55 = vld [vmem:[%s5910_s9 + $0x150] sm:$0xff] }
 0x121   : > { %v693_v0 = vpack.c.bf16 %v497_v59, %v493_v58  ;;  %v698_v3 = vpack.c.bf16 %v506_v63, %v502_v61  ;;  %2274 = vmatpush1.bf16.msra.mxu0 %v5027_v13  ;;  %v427_v56 = vld [vmem:[%s5910_s9 + $0x170] sm:$0xff]  ;;  %v432_v57 = vld [vmem:[%s5910_s9 + $0x198] sm:$0xff]  ;;  %v5045_v61 = vld [vmem:[#allocation8 + $0xc0] ss:$8 sps:$4 sm:$0xff]  }
 0x122   : > { %v436_v58 = vld [vmem:[%s5910_s9 + $0x1b8] sm:$0xff]  ;;  %v659_v59 = vpack.c.bf16 %v427_v56, %v423_v55  ;;  %v431_v63 = vld [vmem:[%s5910_s9 + $0x190] sm:$0xff]  ;;  %v5051_v13 = vld [vmem:[#allocation8 + $0xa0] ss:$8 sps:$4 sm:$0xff]  }
 0x123   : > { %v480_v56 = vld [vmem:[%s5910_s9 + $0x318] sm:$0xff] }
 0x127   : > { %1454 = vmatmul.mubr.bf16.gmra.mxu1 %v741_v4  ;;  %1294 = vmatmul.mubr.bf16.gmra.mxu0 %v677_v8  ;;  %v629_v4 = vld [vmem:[%s5910_s9 + $0x7c0] sm:$0xff] }
 0x128   : > { %1463 = vmatprep.mubr.bf16.mxu1 %v746_v6  ;;  %1303 = vmatprep.mubr.bf16.mxu0 %v682_v11  ;;  %v384_v6 = vld [vmem:[%s5910_s9 + $0x18] sm:$0xff]  ;;  %v501_v8 = vld [vmem:[%s5910_s9 + $0x3c0] sm:$0xff]  ;;  %v761_v10 = vpack.c.bf16 %v633_v5, %v629_v4  ;;  %v668_v4 = vpack.c.bf16 %v444_v2, %v440_v1  ;;  %v479_v2 = vld [vmem:[%s5910_s9 + $0x310] sm:$0xff] }
 0x129   : > { %v640_v11 = vpack.c.bf16 %v388_v7, %v384_v6  ;;  %v697_v12 = vpack.c.bf16 %v505_v9, %v501_v8  ;;  %v5048_v5 = vld [vmem:[#allocation8 + $0xb0] ss:$8 sps:$4 sm:$0xff]   ;;  %v5050_v6 = vld [vmem:[#allocation8 + $0xb4] ss:$8 sps:$4 sm:$0xff]  }
 0x12a   : > { %v439_v7 = vld [vmem:[%s5910_s9 + $0x1d0] sm:$0xff]  ;;  %v448_v9 = vld [vmem:[%s5910_s9 + $0x218] sm:$0xff] }
 0x12b   : > { %v443_v8 = vld [vmem:[%s5910_s9 + $0x1f0] sm:$0xff] }
 0x12f   : > { %1464 = vmatmul.mubr.bf16.gmra.mxu1 %v745_v18  ;;  %1304 = vmatmul.mubr.bf16.gmra.mxu0 %v681_v22  ;;  %v396_v18 = vld [vmem:[%s5910_s9 + $0x78] sm:$0xff] }
 0x130   : > { %1473 = vmatprep.mubr.bf16.mxu1 %v750_v20  ;;  %1313 = vmatprep.mubr.bf16.mxu0 %v686_v25  ;;  %v644_v20 = vpack.c.bf16 %v396_v18, %v392_v17  ;;  %v5032_v22 = vld [vmem:[#allocation8 + $0x14] ss:$8 sps:$4 sm:$0xff]  }
 0x131   : > { %2275 = vmatprep.subr.bf16.mxu0 %v5032_v22  ;;  %v400_v25 = vld [vmem:[%s5910_s9 + $0x98] sm:$0xff] }
 0x132   : > { %2276 = vmatpush1.bf16.msra.mxu0 %v5030_v21  ;;  %v648_v28 = vpack.c.bf16 %v404_v26, %v400_v25  ;;  %v456_v17 = vld [vmem:[%s5910_s9 + $0x258] sm:$0xff]  ;;  %v459_v25 = vld [vmem:[%s5910_s9 + $0x270] sm:$0xff] }
 0x133   : > { %2277 = vmatprep.subr.bf16.mxu0 %v5035_v30  ;;  %v460_v18 = vld [vmem:[%s5910_s9 + $0x278] sm:$0xff] }
 0x134   : > { %v5054_v21 = vld [vmem:[#allocation8 + $0x90] ss:$8 sps:$4 sm:$0xff]   ;;  %v5056_v22 = vld [vmem:[#allocation8 + $0x94] ss:$8 sps:$4 sm:$0xff]  }
 0x136   : > { %2278 = vmatpush1.bf16.msra.mxu0 %v5033_v29 }
 0x137   : > { %1474 = vmatmul.mubr.bf16.gmra.mxu1 %v749_v32  ;;  %1314 = vmatmul.mubr.bf16.gmra.mxu0 %v685_v36  ;;  %v403_v32 = vld [vmem:[%s5910_s9 + $0xb0] sm:$0xff] }
 0x138   : > { %1483 = vmatprep.mubr.bf16.mxu1 %v754_v34  ;;  %1323 = vmatprep.mubr.bf16.mxu0 %v690_v39  ;;  %v412_v34 = vld [vmem:[%s5910_s9 + $0xf8] sm:$0xff]  ;;  %v647_v35 = vpack.c.bf16 %v403_v32, %v399_v31  ;;  %v407_v39 = vld [vmem:[%s5910_s9 + $0xd0] sm:$0xff]  ;;  %v675_v31 = vpack.c.bf16 %v459_v25, %v455_v24 }
 0x139   : > { %v652_v36 = vpack.c.bf16 %v412_v34, %v408_v33  ;;  %2279 = vmatprep.subr.bf16.mxu0 %v5038_v38  ;;  %v651_v43 = vpack.c.bf16 %v411_v40, %v407_v39  ;;  %v463_v38 = vld [vmem:[%s5910_s9 + $0x290] sm:$0xff]  ;;  %v5057_v40 = vld [vmem:[#allocation8 + $0x80] ss:$8 sps:$4 sm:$0xff]  }
 0x13a   : > { %2280 = vmatpush2.bf16.msra.mxu0 %v5036_v37  ;;  %v5059_v37 = vld [vmem:[#allocation8 + $0x84] ss:$8 sps:$4 sm:$0xff]  }
 0x13b   : > { %v467_v39 = vld [vmem:[%s5910_s9 + $0x2b0] sm:$0xff] }
 0x13f   : > { %1484 = vmatmul.mubr.bf16.gmra.mxu1 %v753_v46  ;;  %1324 = vmatmul.mubr.bf16.gmra.mxu0 %v689_v50  ;;  %v5041_v46 = vld [vmem:[#allocation8 + $0xe4] ss:$8 sps:$4 sm:$0xff]   ;;  %v428_v50 = vld [vmem:[%s5910_s9 + $0x178] sm:$0xff] }
 0x140   : > { %1493 = vmatprep.mubr.bf16.mxu1 %v758_v48  ;;  %1333 = vmatprep.mubr.bf16.mxu0 %v694_v53  ;;  %v419_v48 = vld [vmem:[%s5910_s9 + $0x130] sm:$0xff]  ;;  %v660_v52 = vpack.c.bf16 %v428_v50, %v424_v49 }
 0x141   : > { %2281 = vmatprep.subr.bf16.mxu0 %v5041_v46  ;;  %v655_v51 = vpack.c.bf16 %v419_v48, %v415_v47  ;;  %v5042_v53 = vld [vmem:[#allocation8 + $0xd0] ss:$8 sps:$4 sm:$0xff]   ;;  %v679_v46 = vpack.c.bf16 %v467_v39, %v463_v38 }
 0x142   : > { %2282 = vmatpush2.bf16.msra.mxu0 %v5039_v45  ;;  %v504_v39 = vld [vmem:[%s5910_s9 + $0x3d8] sm:$0xff] }
 0x143   : > { %2283 = vmatprep.subr.bf16.mxu0 %v5044_v54  ;;  %v5062_v54 = vld [vmem:[#allocation11 + $0xe4] ss:$16 sps:$4 sm:$0xff]  }
 0x144   : > { %3214 = vmatprep.subr.bf16.mxu1 %v5062_v54  ;;  %v503_v54 = vld [vmem:[%s5910_s9 + $0x3d0] sm:$0xff] }
 0x146   : > { %2284 = vmatpush2.bf16.msra.mxu0 %v5042_v53  ;;  %v5060_v53 = vld [vmem:[#allocation11 + $0xe0] ss:$16 sps:$4 sm:$0xff]  }
 0x147   : > { %1494 = vmatmul.mubr.bf16.gmra.mxu1 %v757_v60  ;;  %1334 = vmatmul.mubr.bf16.gmra.mxu0 %v693_v0  ;;  %v664_v60 = vpack.c.bf16 %v436_v58, %v432_v57  ;;  %v435_v0 = vld [vmem:[%s5910_s9 + $0x1b0] sm:$0xff]  ;;  %v484_v57 = vld [vmem:[%s5910_s9 + $0x338] sm:$0xff] }
 0x148   : > { %1503 = vmatprep.mubr.bf16.mxu1 %v762_v62  ;;  %1343 = vmatprep.mubr.bf16.mxu0 %v698_v3  ;;  %v5047_v62 = vld [vmem:[#allocation8 + $0xc4] ss:$8 sps:$4 sm:$0xff]   ;;  %v663_v3 = vpack.c.bf16 %v435_v0, %v431_v63 }
 0x149   : > { %2285 = vmatprep.subr.bf16.mxu0 %v5047_v62  ;;  %v688_v62 = vpack.c.bf16 %v484_v57, %v480_v56  ;;  %v507_v56 = vld [vmem:[%s5910_s9 + $0x3f0] sm:$0xff] }
 0x14a   : > { %2286 = vmatpush2.bf16.msra.mxu0 %v5045_v61  ;;  %v5072_v57 = vld [vmem:[#allocation11 + $0xa0] ss:$16 sps:$4 sm:$0xff]  }
 0x14b   : > { %2287 = vmatprep.subr.bf16.mxu0 %v5050_v6  ;;  %v492_v6 = vld [vmem:[%s5910_s9 + $0x378] sm:$0xff] }
 0x14e   : > { %2288 = vmatpush2.bf16.msra.mxu0 %v5048_v5  ;;  %v488_v5 = vld [vmem:[%s5910_s9 + $0x358] sm:$0xff] }
 0x14f   : > { %1504 = vmatmul.mubr.bf16.gmra.mxu1 %v761_v10  ;;  %1344 = vmatmul.mubr.bf16.gmra.mxu0 %v697_v12  ;;  %v452_v10 = vld [vmem:[%s5910_s9 + $0x238] sm:$0xff] }
 0x150   : > { %1546 = vmatprep.mubr.bf16.mxu1 %v640_v11  ;;  %v667_v11 = vpack.c.bf16 %v443_v8, %v439_v7  ;;  %v672_v12 = vpack.c.bf16 %v452_v10, %v448_v9  ;;  %2289 = vmatprep.subr.bf16.mxu0 %v5053_v14  ;;  %v692_v10 = vpack.c.bf16 %v492_v6, %v488_v5  ;;  %v487_v14 = vld [vmem:[%s5910_s9 + $0x350] sm:$0xff] }
 0x151   : > { %v699_v6 = vpack.c.bf16 %v507_v56, %v503_v54  ;;  %v519_v54 = vld [vmem:[%s5910_s9 + $0x450] sm:$0xff] }
 0x152   : > { %2290 = vmatpush2.bf16.msra.mxu0 %v5051_v13  ;;  %v523_v56 = vld [vmem:[%s5910_s9 + $0x470] sm:$0xff] }
 0x153   : > { %2291 = vmatprep.subr.bf16.mxu0 %v5056_v22 }
 0x156   : > { %2292 = vmatpush2.bf16.msra.mxu0 %v5054_v21 }
 0x157   : > { %1547 = vmatmul.mubr.bf16.vlgmr.msra.gmra.mxu1 %v639_v19  ;;  %v671_v19 = vpack.c.bf16 %v451_v16, %v447_v15  ;;  %2293 = vmatprep.subr.bf16.mxu0 %v5059_v37  ;;  %v491_v15 = vld [vmem:[%s5910_s9 + $0x370] sm:$0xff] }
 0x158   : > { %1556 = vmatprep.mubr.bf16.mxu1 %v644_v20  ;;  %v676_v20 = vpack.c.bf16 %v460_v18, %v456_v17  ;;  %3215 = vmatpush1.bf16.msra.mxu1 %v5060_v53  ;;  %v5066_v16 = vld [vmem:[#allocation11 + $0xc0] ss:$16 sps:$4 sm:$0xff]   ;;  %v5068_v17 = vld [vmem:[#allocation11 + $0xc4] ss:$16 sps:$4 sm:$0xff]   ;;  %v691_v24 = vpack.c.bf16 %v491_v15, %v487_v14 }
 0x159   : > { %3216 = vmatprep.subr.bf16.mxu1 %v5068_v17  ;;  %v499_v37 = vld [vmem:[%s5910_s9 + $0x3b0] sm:$0xff] }
 0x15a   : > { %2294 = vmatpush2.bf16.msra.mxu0 %v5057_v40  ;;  %v508_v40 = vld [vmem:[%s5910_s9 + $0x3f8] sm:$0xff]  ;;  %v515_v17 = vld [vmem:[%s5910_s9 + $0x430] sm:$0xff] }
 0x15c   : > { %3217 = vmatpush1.bf16.msra.mxu1 %v5066_v16  ;;  %v511_v16 = vld [vmem:[%s5910_s9 + $0x410] sm:$0xff] }
 0x15f   : > { %1557 = vmatmul.mubr.bf16.gmra.mxu1 %v643_v27  ;;  %v464_v27 = vld [vmem:[%s5910_s9 + $0x298] sm:$0xff] }
 0x160   : > { %1566 = vmatprep.mubr.bf16.mxu1 %v648_v28  ;;  %v468_v28 = vld [vmem:[%s5910_s9 + $0x2b8] sm:$0xff] }
 0x161   : > { %v680_v33 = vpack.c.bf16 %v468_v28, %v464_v27 }
 0x167   : > { %1567 = vmatmul.mubr.bf16.gmra.mxu1 %v647_v35 }
 0x168   : > { %1576 = vmatprep.mubr.bf16.mxu1 %v652_v36 }
 0x16f   : > { %1577 = vmatmul.mubr.bf16.gmra.mxu1 %v651_v43  ;;  %v476_v43 = vld [vmem:[%s5910_s9 + $0x2f8] sm:$0xff] }
 0x170   : > { %1586 = vmatprep.mubr.bf16.mxu1 %v656_v44  ;;  %v684_v47 = vpack.c.bf16 %v476_v43, %v472_v42 }
 0x177   : > { %1587 = vmatmul.mubr.bf16.gmra.mxu1 %v655_v51  ;;  %v471_v51 = vld [vmem:[%s5910_s9 + $0x2d0] sm:$0xff] }
 0x178   : > { %1596 = vmatprep.mubr.bf16.mxu1 %v660_v52  ;;  %v475_v52 = vld [vmem:[%s5910_s9 + $0x2f0] sm:$0xff] }
 0x179   : > { %v683_v61 = vpack.c.bf16 %v475_v52, %v471_v51 }
 0x17f   : > { %1597 = vmatmul.mubr.bf16.gmra.mxu1 %v659_v59  ;;  %v5065_v59 = vld [vmem:[#allocation11 + $0xec] ss:$16 sps:$4 sm:$0xff]  }
 0x180   : > { %1606 = vmatprep.mubr.bf16.mxu1 %v664_v60  ;;  %3567 = vmatprep.subr.bf16.mxu0 %v5065_v59  ;;  %v5074_v59 = vld [vmem:[#allocation11 + $0xa4] ss:$16 sps:$4 sm:$0xff]  }
 0x181   : > { %3218 = vmatprep.subr.bf16.mxu1 %v5074_v59  ;;  %v5080_v59 = vld [vmem:[#allocation11 + $0x84] ss:$16 sps:$4 sm:$0xff]  }
 0x182   : > { %3219 = vmatpush1.bf16.msra.mxu1 %v5072_v57  ;;  %v5078_v57 = vld [vmem:[#allocation11 + $0x80] ss:$16 sps:$4 sm:$0xff]  }
 0x183   : > { %3220 = vmatprep.subr.bf16.mxu1 %v5080_v59  ;;  %v536_v59 = vld [vmem:[%s5910_s9 + $0x4d8] sm:$0xff] }
 0x186   : > { %3221 = vmatpush1.bf16.msra.mxu1 %v5078_v57 }
 0x187   : > { %1607 = vmatmul.mubr.bf16.gmra.mxu1 %v663_v3  ;;  %v483_v3 = vld [vmem:[%s5910_s9 + $0x330] sm:$0xff] }
 0x188   : > { %1616 = vmatprep.mubr.bf16.mxu1 %v668_v4  ;;  %v687_v9 = vpack.c.bf16 %v483_v3, %v479_v2  ;;  %v516_v2 = vld [vmem:[%s5910_s9 + $0x438] sm:$0xff] }
 0x18f   : > { %1617 = vmatmul.mubr.bf16.gmra.mxu1 %v667_v11 }
 0x190   : > { %1626 = vmatprep.mubr.bf16.mxu1 %v672_v12 }
 0x197   : > { %v6094_v23 = vpop.f32.mrf.mxu1  ;;  %1627 = vmatmul.mubr.bf16.gmra.mxu1 %v671_v19  ;;  %v6102_v29 = vpop.f32.mrf.mxu0  ;;  %v496_v19 = vld [vmem:[%s5910_s9 + $0x398] sm:$0xff] }
 0x198   : > { %1636 = vmatprep.mubr.bf16.mxu1 %v676_v20  ;;  %v500_v20 = vld [vmem:[%s5910_s9 + $0x3b8] sm:$0xff] }
 0x199   : > { %v6098_v26 = vpop.f32.mrf.mxu1  ;;  %v6106_v32 = vpop.f32.mrf.mxu0  ;;  %v696_v25 = vpack.c.bf16 %v500_v20, %v496_v19  ;;  %v520_v20 = vld [vmem:[%s5910_s9 + $0x458] sm:$0xff] }
 0x19b   : > { %v6104_v30 = vpop.f32.mrf.mxu1  ;;  %v6110_v35 = vpop.f32.mrf.mxu0 }
 0x19d   : > { %v6108_v34 = vpop.f32.mrf.mxu1  ;;  %v6120_v44 = vpop.f32.mrf.mxu0 }
 0x19f   : > { %v6112_v36 = vpop.f32.mrf.mxu1  ;;  %1637 = vmatmul.mubr.bf16.gmra.mxu1 %v675_v31  ;;  %v6126_v49 = vpop.f32.mrf.mxu0 }
 0x1a0   : > { %1646 = vmatprep.mubr.bf16.mxu1 %v680_v33  ;;  %v495_v33 = vld [vmem:[%s5910_s9 + $0x390] sm:$0xff] }
 0x1a1   : > { %v6116_v41 = vpop.f32.mrf.mxu1  ;;  %v6136_v58 = vpop.f32.mrf.mxu0 }
 0x1a3   : > { %v6122_v45 = vpop.f32.mrf.mxu1  ;;  %v6142_v0 = vpop.f32.mrf.mxu0 }
 0x1a4   : > { %7949 = vst [vmem:[#allocation20_spill] sm:$0xff] %v6122_v45 }
 0x1a5   : > { %v6124_v48 = vpop.f32.mrf.mxu1  ;;  %v6152_v7 = vpop.f32.mrf.mxu0 }
 0x1a6   : > { %7950 = vst [vmem:[#allocation21_spill] sm:$0xff] %v6124_v48 }
 0x1a7   : > { %v6128_v50 = vpop.f32.mrf.mxu1  ;;  %1647 = vmatmul.mubr.bf16.gmra.mxu1 %v679_v46  ;;  %v6158_v12 = vpop.f32.mrf.mxu0  ;;  %v695_v46 = vpack.c.bf16 %v499_v37, %v495_v33  ;;  %v703_v37 = vpack.c.bf16 %v515_v17, %v511_v16  ;;  %v707_v17 = vpack.c.bf16 %v523_v56, %v519_v54 }
 0x1a8   : > { %7951 = vst [vmem:[#allocation22_spill] sm:$0xff] %v6128_v50  ;;  %1656 = vmatprep.mubr.bf16.mxu1 %v684_v47  ;;  %v700_v47 = vpack.c.bf16 %v508_v40, %v504_v39  ;;  %v595_v50 = vld [vmem:[%s5910_s9 + $0x6b0] sm:$0xff] }
 0x1a9   : > { %v6132_v55 = vpop.f32.mrf.mxu1  ;;  %v6168_v21 = vpop.f32.mrf.mxu0 }
 0x1aa   : > { %7952 = vst [vmem:[#allocation23_spill] sm:$0xff] %v6132_v55 }
 0x1ab   : > { %v6138_v60 = vpop.f32.mrf.mxu1  ;;  %v6174_v28 = vpop.f32.mrf.mxu0 }
 0x1ac   : > { %7953 = vst [vmem:[#allocation24_spill] sm:$0xff] %v6138_v60 }
 0x1ad   : > { %v6140_v63 = vpop.f32.mrf.mxu1  ;;  %v6184_v42 = vpop.f32.mrf.mxu0 }
 0x1ae   : > { %7954 = vst [vmem:[#allocation25_spill] sm:$0xff] %v6140_v63 }
 0x1af   : > { %v6144_v1 = vpop.f32.mrf.mxu1  ;;  %1657 = vmatmul.mubr.bf16.gmra.mxu1 %v683_v61  ;;  %v6190_v52 = vpop.f32.mrf.mxu0 }
 0x1b0   : > { %7955 = vst [vmem:[#allocation26_spill] sm:$0xff] %v6144_v1  ;;  %1666 = vmatprep.mubr.bf16.mxu1 %v688_v62  ;;  %v512_v62 = vld [vmem:[%s5910_s9 + $0x418] sm:$0xff] }
 0x1b1   : > { %v6148_v4 = vpop.f32.mrf.mxu1  ;;  %v6200_v3 = vpop.f32.mrf.mxu0 }
 0x1b2   : > { %7956 = vst [vmem:[#allocation27_spill] sm:$0xff] %v6148_v4 }
 0x1b3   : > { %v6154_v8 = vpop.f32.mrf.mxu1  ;;  %v6206_v14 = vpop.f32.mrf.mxu0 }
 0x1b4   : > { %7957 = vst [vmem:[#allocation28_spill] sm:$0xff] %v6154_v8 }
 0x1b5   : > { %v6156_v11 = vpop.f32.mrf.mxu1 }
 0x1b6   : > { %7958 = vst [vmem:[#allocation29_spill] sm:$0xff] %v6156_v11  ;;  %v596_v11 = vld [vmem:[%s5910_s9 + $0x6b8] sm:$0xff] }
 0x1b7   : > { %v6160_v13 = vpop.f32.mrf.mxu1  ;;  %1667 = vmatmul.mubr.bf16.gmra.mxu1 %v687_v9  ;;  %v704_v9 = vpack.c.bf16 %v516_v2, %v512_v62  ;;  %v528_v2 = vld [vmem:[%s5910_s9 + $0x498] sm:$0xff] }
 0x1b8   : > { %7959 = vst [vmem:[#allocation30_spill] sm:$0xff] %v6160_v13  ;;  %1676 = vmatprep.mubr.bf16.mxu1 %v692_v10  ;;  %v583_v13 = vld [vmem:[%s5910_s9 + $0x650] sm:$0xff] }
 0x1b9   : > { %v6164_v18 = vpop.f32.mrf.mxu1 }
 0x1ba   : > { %7960 = vst [vmem:[#allocation31_spill] sm:$0xff] %v6164_v18  ;;  %v584_v18 = vld [vmem:[%s5910_s9 + $0x658] sm:$0xff] }
 0x1bb   : > { %v6170_v22 = vpop.f32.mrf.mxu1 }
 0x1bc   : > { %7961 = vst [vmem:[#allocation32_spill] sm:$0xff] %v6170_v22  ;;  %v579_v22 = vld [vmem:[%s5910_s9 + $0x630] sm:$0xff] }
 0x1bd   : > { %v6172_v27 = vpop.f32.mrf.mxu1 }
 0x1be   : > { %7962 = vst [vmem:[#allocation33_spill] sm:$0xff] %v6172_v27  ;;  %v575_v27 = vld [vmem:[%s5910_s9 + $0x610] sm:$0xff] }
 0x1bf   : > { %v6176_v31 = vpop.f32.mrf.mxu1  ;;  %1677 = vmatmul.mubr.bf16.gmra.mxu1 %v691_v24  ;;  %v524_v24 = vld [vmem:[%s5910_s9 + $0x478] sm:$0xff] }
 0x1c0   : > { %7963 = vst [vmem:[#allocation34_spill] sm:$0xff] %v6176_v31  ;;  %1686 = vmatprep.mubr.bf16.mxu1 %v696_v25  ;;  %v6216_v25 = vpop.f32.mrf.mxu0  ;;  %v708_v39 = vpack.c.bf16 %v524_v24, %v520_v20  ;;  %v576_v31 = vld [vmem:[%s5910_s9 + $0x618] sm:$0xff] }
 0x1c1   : > { %v6180_v38 = vpop.f32.mrf.mxu1 }
 0x1c2   : > { %7964 = vst [vmem:[#allocation35_spill] sm:$0xff] %v6180_v38 }
 0x1c3   : > { %v6186_v43 = vpop.f32.mrf.mxu1 }
 0x1c4   : > { %7965 = vst [vmem:[#allocation36_spill] sm:$0xff] %v6186_v43  ;;  %v5098_v43 = vld [vmem:[#allocation11 + $0x24] ss:$16 sps:$4 sm:$0xff]  }
 0x1c5   : > { %v6188_v51 = vpop.f32.mrf.mxu1 }
 0x1c6   : > { %7966 = vst [vmem:[#allocation37_spill] sm:$0xff] %v6188_v51 }
 0x1c7   : > { %v6192_v53 = vpop.f32.mrf.mxu1  ;;  %1687 = vmatmul.mubr.bf16.gmra.mxu1 %v695_v46  ;;  %v6222_v46 = vpop.f32.mrf.mxu0 }
 0x1c8   : > { %7967 = vst [vmem:[#allocation38_spill] sm:$0xff] %v6192_v53  ;;  %1696 = vmatprep.mubr.bf16.mxu1 %v700_v47  ;;  %v560_v53 = vld [vmem:[%s5910_s9 + $0x598] sm:$0xff] }
 0x1c9   : > { %v6196_v61 = vpop.f32.mrf.mxu1 }
 0x1ca   : > { %7968 = vst [vmem:[#allocation39_spill] sm:$0xff] %v6196_v61 }
 0x1cb   : > { %v6202_v5 = vpop.f32.mrf.mxu1 }
 0x1cc   : > { %7969 = vst [vmem:[#allocation40_spill] sm:$0xff] %v6202_v5  ;;  %v5092_v5 = vld [vmem:[#allocation11 + $0x44] ss:$16 sps:$4 sm:$0xff]  }
 0x1cd   : > { %v6204_v10 = vpop.f32.mrf.mxu1 }
 0x1ce   : > { %7970 = vst [vmem:[#allocation41_spill] sm:$0xff] %v6204_v10 }
 0x1cf   : > { %v6208_v15 = vpop.f32.mrf.mxu1  ;;  %1697 = vmatmul.mubr.bf16.gmra.mxu1 %v699_v6  ;;  %v532_v6 = vld [vmem:[%s5910_s9 + $0x4b8] sm:$0xff] }
 0x1d0   : > { %7971 = vst [vmem:[#allocation42_spill] sm:$0xff] %v6208_v15  ;;  %1706 = vmatprep.mubr.bf16.mxu1 %v704_v9  ;;  %v6232_v9 = vpop.f32.mrf.mxu0  ;;  %v712_v20 = vpack.c.bf16 %v532_v6, %v528_v2  ;;  %v544_v15 = vld [vmem:[%s5910_s9 + $0x518] sm:$0xff] }
 0x1d1   : > { %v6212_v19 = vpop.f32.mrf.mxu1 }
 0x1d2   : > { %7972 = vst [vmem:[#allocation43_spill] sm:$0xff] %v6212_v19 }
 0x1d3   : > { %v6218_v33 = vpop.f32.mrf.mxu1 }
 0x1d4   : > { %7973 = vst [vmem:[#allocation44_spill] sm:$0xff] %v6218_v33  ;;  %v5086_v33 = vld [vmem:[#allocation11 + $0x64] ss:$16 sps:$4 sm:$0xff]  }
 0x1d5   : > { %v6220_v40 = vpop.f32.mrf.mxu1  ;;  %3222 = vmatprep.subr.bf16.mxu1 %v5086_v33  ;;  %v552_v33 = vld [vmem:[%s5910_s9 + $0x558] sm:$0xff] }
 0x1d6   : > { %7974 = vst [vmem:[#allocation45_spill] sm:$0xff] %v6220_v40 }
 0x1d7   : > { %v6224_v47 = vpop.f32.mrf.mxu1  ;;  %1707 = vmatmul.mubr.bf16.gmra.mxu1 %v703_v37  ;;  %v6238_v37 = vpop.f32.mrf.mxu0 }
 0x1d8   : > { %7975 = vst [vmem:[#allocation46_spill] sm:$0xff] %v6224_v47  ;;  %1716 = vmatprep.mubr.bf16.mxu1 %v708_v39  ;;  %v531_v47 = vld [vmem:[%s5910_s9 + $0x4b0] sm:$0xff] }
 0x1d9   : > { %v6228_v62 = vpop.f32.mrf.mxu1  ;;  %v6248_v54 = vpop.f32.mrf.mxu0 }
 0x1da   : > { %7976 = vst [vmem:[#allocation47_spill] sm:$0xff] %v6228_v62  ;;  %v527_v62 = vld [vmem:[%s5910_s9 + $0x490] sm:$0xff] }
 0x1db   : > { %v6234_v16 = vpop.f32.mrf.mxu1  ;;  %v711_v57 = vpack.c.bf16 %v531_v47, %v527_v62  ;;  %v548_v47 = vld [vmem:[%s5910_s9 + $0x538] sm:$0xff] }
 0x1dc   : > { %7977 = vst [vmem:[#allocation48_spill] sm:$0xff] %v6234_v16  ;;  %v540_v16 = vld [vmem:[%s5910_s9 + $0x4f8] sm:$0xff] }
 0x1dd   : > { %v6236_v24 = vpop.f32.mrf.mxu1  ;;  %v716_v2 = vpack.c.bf16 %v540_v16, %v536_v59 }
 0x1de   : > { %7978 = vst [vmem:[#allocation49_spill] sm:$0xff] %v6236_v24  ;;  %v5084_v24 = vld [vmem:[#allocation11 + $0x60] ss:$16 sps:$4 sm:$0xff]  }
 0x1df   : > { %v6240_v39 = vpop.f32.mrf.mxu1  ;;  %1717 = vmatmul.mubr.bf16.gmra.mxu1 %v707_v17 }
 0x1e0   : > { %7979 = vst [vmem:[#allocation50_spill] sm:$0xff] %v6240_v39  ;;  %1726 = vmatprep.mubr.bf16.mxu1 %v712_v20  ;;  %v6254_v39 = vpop.f32.mrf.mxu0  ;;  %v535_v20 = vld [vmem:[%s5910_s9 + $0x4d0] sm:$0xff]  ;;  %3223 = vmatpush1.bf16.msra.mxu1 %v5084_v24 }
 0x1e1   : > { %v6244_v40 = vpop.f32.mrf.mxu1  ;;  %3224 = vmatprep.subr.bf16.mxu1 %v5092_v5  ;;  %v568_v5 = vld [vmem:[%s5910_s9 + $0x5d8] sm:$0xff] }
 0x1e2   : > { %7980 = vst [vmem:[#allocation51_spill] sm:$0xff] %v6244_v40  ;;  %v539_v40 = vld [vmem:[%s5910_s9 + $0x4f0] sm:$0xff]  ;;  %v6264_v62 = vpop.f32.mrf.mxu0 }
 0x1e3   : > { %v6250_v56 = vpop.f32.mrf.mxu1  ;;  %v715_v59 = vpack.c.bf16 %v539_v40, %v535_v20 }
 0x1e4   : > { %7981 = vst [vmem:[#allocation52_spill] sm:$0xff] %v6250_v56  ;;  %v547_v56 = vld [vmem:[%s5910_s9 + $0x530] sm:$0xff] }
 0x1e5   : > { %v6252_v6 = vpop.f32.mrf.mxu1 }
 0x1e6   : > { %7982 = vst [vmem:[#allocation53_spill] sm:$0xff] %v6252_v6 }
 0x1e7   : > { %v6256_v17 = vpop.f32.mrf.mxu1  ;;  %1727 = vmatmul.mubr.bf16.gmra.mxu1 %v711_v57  ;;  %v720_v57 = vpack.c.bf16 %v548_v47, %v544_v15 }
 0x1e8   : > { %7983 = vst [vmem:[#allocation54_spill] sm:$0xff] %v6256_v17  ;;  %1736 = vmatprep.mubr.bf16.mxu1 %v716_v2  ;;  %v6270_v17 = vpop.f32.mrf.mxu0 }
 0x1e9   : > { %v6260_v19 = vpop.f32.mrf.mxu1 }
 0x1ea   : > { %7984 = vst [vmem:[#allocation55_spill] sm:$0xff] %v6260_v19  ;;  %v543_v19 = vld [vmem:[%s5910_s9 + $0x510] sm:$0xff]  ;;  %v6280_v40 = vpop.f32.mrf.mxu0 }
 0x1eb   : > { %v6266_v16 = vpop.f32.mrf.mxu1  ;;  %v719_v24 = vpack.c.bf16 %v547_v56, %v543_v19  ;;  %v564_v19 = vld [vmem:[%s5910_s9 + $0x5b8] sm:$0xff] }
 0x1ec   : > { %7985 = vst [vmem:[#allocation56_spill] sm:$0xff] %v6266_v16  ;;  %v556_v16 = vld [vmem:[%s5910_s9 + $0x578] sm:$0xff] }
 0x1ed   : > { %v6268_v2 = vpop.f32.mrf.mxu1  ;;  %v724_v20 = vpack.c.bf16 %v556_v16, %v552_v33 }
 0x1ee   : > { %7986 = vst [vmem:[#allocation57_spill] sm:$0xff] %v6268_v2  ;;  %v5090_v2 = vld [vmem:[#allocation11 + $0x40] ss:$16 sps:$4 sm:$0xff]  }
 0x1ef   : > { %v6272_v6 = vpop.f32.mrf.mxu1  ;;  %1737 = vmatmul.mubr.bf16.gmra.mxu1 %v715_v59 }
 0x1f0   : > { %7987 = vst [vmem:[#allocation58_spill] sm:$0xff] %v6272_v6  ;;  %1746 = vmatprep.mubr.bf16.mxu1 %v720_v57  ;;  %v6286_v6 = vpop.f32.mrf.mxu0  ;;  %v551_v57 = vld [vmem:[%s5910_s9 + $0x550] sm:$0xff]  ;;  %3225 = vmatpush1.bf16.msra.mxu1 %v5090_v2 }
 0x1f1   : > { %v6276_v10 = vpop.f32.mrf.mxu1  ;;  %3226 = vmatprep.subr.bf16.mxu1 %v5098_v43 }
 0x1f2   : > { %7988 = vst [vmem:[#allocation59_spill] sm:$0xff] %v6276_v10  ;;  %v555_v10 = vld [vmem:[%s5910_s9 + $0x570] sm:$0xff]  ;;  %v6296_v56 = vpop.f32.mrf.mxu0 }
 0x1f3   : > { %v6282_v15 = vpop.f32.mrf.mxu1  ;;  %v723_v33 = vpack.c.bf16 %v555_v10, %v551_v57 }
 0x1f4   : > { %7989 = vst [vmem:[#allocation60_spill] sm:$0xff] %v6282_v15  ;;  %v563_v15 = vld [vmem:[%s5910_s9 + $0x5b0] sm:$0xff] }
 0x1f5   : > { %v6284_v47 = vpop.f32.mrf.mxu1 }
 0x1f6   : > { %7990 = vst [vmem:[#allocation61_spill] sm:$0xff] %v6284_v47 }
 0x1f7   : > { %v6288_v59 = vpop.f32.mrf.mxu1  ;;  %1747 = vmatmul.mubr.bf16.gmra.mxu1 %v719_v24  ;;  %v728_v24 = vpack.c.bf16 %v564_v19, %v560_v53 }
 0x1f8   : > { %7991 = vst [vmem:[#allocation62_spill] sm:$0xff] %v6288_v59  ;;  %1756 = vmatprep.mubr.bf16.mxu1 %v724_v20  ;;  %v6302_v59 = vpop.f32.mrf.mxu0 }
 0x1f9   : > { %v6292_v61 = vpop.f32.mrf.mxu1 }
 0x1fa   : > { %7992 = vst [vmem:[#allocation63_spill] sm:$0xff] %v6292_v61  ;;  %v559_v61 = vld [vmem:[%s5910_s9 + $0x590] sm:$0xff]  ;;  %v6312_v10 = vpop.f32.mrf.mxu0 }
 0x1fb   : > { %v6298_v16 = vpop.f32.mrf.mxu1  ;;  %v727_v2 = vpack.c.bf16 %v563_v15, %v559_v61  ;;  %v831_v15 = vlaneseq }
 0x1fc   : > { %7993 = vst [vmem:[#allocation64_spill] sm:$0xff] %v6298_v16  ;;  %v572_v16 = vld [vmem:[%s5910_s9 + $0x5f8] sm:$0xff] }
 0x1fd   : > { %v6300_v20 = vpop.f32.mrf.mxu1  ;;  %v732_v57 = vpack.c.bf16 %v572_v16, %v568_v5 }
 0x1fe   : > { %7994 = vst [vmem:[#allocation65_spill] sm:$0xff] %v6300_v20  ;;  %v5096_v20 = vld [vmem:[#allocation11 + $0x20] ss:$16 sps:$4 sm:$0xff]  }
 0x1ff   : > { %v6304_v47 = vpop.f32.mrf.mxu1  ;;  %1757 = vmatmul.mubr.bf16.gmra.mxu1 %v723_v33 }
 0x200   : > { %7995 = vst [vmem:[#allocation66_spill] sm:$0xff] %v6304_v47  ;;  %1766 = vmatprep.mubr.bf16.mxu1 %v728_v24  ;;  %v6318_v47 = vpop.f32.mrf.mxu0  ;;  %v567_v24 = vld [vmem:[%s5910_s9 + $0x5d0] sm:$0xff]  ;;  %3227 = vmatpush1.bf16.msra.mxu1 %v5096_v20 }
 0x201   : > { %v6308_v51 = vpop.f32.mrf.mxu1 }
 0x202   : > { %7996 = vst [vmem:[#allocation67_spill] sm:$0xff] %v6308_v51  ;;  %v571_v51 = vld [vmem:[%s5910_s9 + $0x5f0] sm:$0xff]  ;;  %v6328_v61 = vpop.f32.mrf.mxu0 }
 0x203   : > { %v6314_v53 = vpop.f32.mrf.mxu1  ;;  %v731_v5 = vpack.c.bf16 %v571_v51, %v567_v24  ;;  %v829_v24 = vld [vmem:[#allocation7] sm:$0x3] }
 0x204   : > { %7997 = vst [vmem:[#allocation68_spill] sm:$0xff] %v6314_v53  ;;  %v580_v53 = vld [vmem:[%s5910_s9 + $0x638] sm:$0xff] }
 0x205   : > { %v6316_v19 = vpop.f32.mrf.mxu1 }
 0x206   : > { %7998 = vst [vmem:[#allocation69_spill] sm:$0xff] %v6316_v19 }
 0x207   : > { %v6320_v33 = vpop.f32.mrf.mxu1  ;;  %1767 = vmatmul.mubr.bf16.gmra.mxu1 %v727_v2  ;;  %v736_v2 = vpack.c.bf16 %v580_v53, %v576_v31  ;;  %v735_v53 = vpack.c.bf16 %v579_v22, %v575_v27  ;;  %v587_v22 = vld [vmem:[%s5910_s9 + $0x670] sm:$0xff] }
 0x208   : > { %7999 = vst [vmem:[#allocation70_spill] sm:$0xff] %v6320_v33  ;;  %1776 = vmatprep.mubr.bf16.mxu1 %v732_v57  ;;  %v6334_v33 = vpop.f32.mrf.mxu0  ;;  %v5102_v27 = vld [vmem:[#allocation11] ss:$16 sps:$4 sm:$0xff]  }
 0x209   : > { %v6324_v38 = vpop.f32.mrf.mxu1 }
 0x20a   : > { %8000 = vst [vmem:[#allocation71_spill] sm:$0xff] %v6324_v38  ;;  %v6336_v38 = vshrl.u32 %v831_v15, 7  ;;  %v6346_v51 = vpop.f32.mrf.mxu0 }
 0x20b   : > { %v6330_v16 = vpop.f32.mrf.mxu1 }
 0x20c   : > { %8001 = vst [vmem:[#allocation72_spill] sm:$0xff] %v6330_v16  ;;  %8003 = vst [vmem:[#allocation74_spill] sm:$0xff] %v6336_v38  ;;  %v588_v16 = vld [vmem:[%s5910_s9 + $0x678] sm:$0xff]  ;;  %v6349_v31 = vsub.s32 0, %v6336_v38  ;;  %v6354_v15 = vsub.s32 1, %v6336_v38 }
 0x20d   : > { %v6332_v57 = vpop.f32.mrf.mxu1  ;;  %v5104_v38 = vld [vmem:[#allocation11 + $0x4] ss:$16 sps:$4 sm:$0xff]  }
 0x20e   : > { %8002 = vst [vmem:[#allocation73_spill] sm:$0xff] %v6332_v57  ;;  %8006 = vst [vmem:[#allocation77_spill] sm:$0xff] %v6349_v31  ;;  %3228 = vmatprep.subr.bf16.mxu1 %v5104_v38 }
 0x20f   : > { %v6338_v19 = vpop.f32.mrf.mxu1  ;;  %1777 = vmatmul.mubr.bf16.gmra.mxu1 %v731_v5  ;;  %8008 = vst [vmem:[#allocation79_spill] sm:$0xff] %v6354_v15  ;;  %v740_v5 = vpack.c.bf16 %v588_v16, %v584_v18 }
 0x210   : > { %8004 = vst [vmem:[#allocation75_spill] sm:$0xff] %v6338_v19  ;;  %1786 = vmatprep.mubr.bf16.mxu1 %v736_v2  ;;  %v6361_v19 = vrot.slane %v829_v24, %v6349_v31  ;;  %3229 = vmatpush1.bf16.msra.mxu1 %v5102_v27  ;;  %v591_v27 = vld [vmem:[%s5910_s9 + $0x690] sm:$0xff] }
 0x211   : > { %v6342_v43 = vpop.f32.mrf.mxu1 }
 0x212   : > { %8005 = vst [vmem:[#allocation76_spill] sm:$0xff] %v6342_v43  ;;  %v6358_v43 = vpop.f32.mrf.mxu0  ;;  %v1196_v18 = vadd.f32 %v6102_v29, %v6361_v19 }
 0x213   : > { %v6351_v20 = vpop.f32.mrf.mxu1 }
 0x214   : > { %8007 = vst [vmem:[#allocation78_spill] sm:$0xff] %v6351_v20  ;;  %v6365_v20 = vrot.slane %v829_v24, %v6354_v15  ;;  %v6372_v8 = vpop.f32.mrf.mxu0 }
 0x215   : > { %v6356_v2 = vpop.f32.mrf.mxu1 }
 0x216   : > { %8009 = vst [vmem:[#allocation80_spill] sm:$0xff] %v6356_v2  ;;  %v592_v2 = vld [vmem:[%s5910_s9 + $0x698] sm:$0xff]  ;;  %v1198_v31 = vadd.f32 %v6106_v32, %v6365_v20  ;;  %v1202_v29 = vadd.f32 %v6120_v44, %v6365_v20  ;;  %v6380_v32 = vpop.f32.mrf.mxu0  ;;  %v1206_v44 = vadd.f32 %v6126_v49, %v6361_v19  ;;  %v1212_v49 = vadd.f32 %v6152_v7, %v6365_v20  ;;  %v603_v7 = vld [vmem:[%s5910_s9 + $0x6f0] sm:$0xff] }
 0x217   : > { %v1548_v57 = vpop.f32.mrf.mxu1  ;;  %1787 = vmatmul.mubr.bf16.gmra.mxu1 %v735_v53  ;;  %v1200_v53 = vadd.f32 %v6110_v35, %v6361_v19  ;;  %v744_v1 = vpack.c.bf16 %v596_v11, %v592_v2 }
 0x218   : > { %1796 = vmatprep.mubr.bf16.mxu1 %v740_v5  ;;  %v739_v5 = vpack.c.bf16 %v587_v22, %v583_v13  ;;  %v1549_v63 = vadd.f32 %v1548_v57, %v1196_v18  ;;  %v604_v57 = vld [vmem:[%s5910_s9 + $0x6f8] sm:$0xff]  ;;  %v6388_v2 = vpop.f32.mrf.mxu0 }
 0x219   : > { %v1550_v16 = vpop.f32.mrf.mxu1 }
 0x21a   : > { %v1551_v15 = vadd.f32 %v1550_v16, %v1198_v31  ;;  %v1867_v48 = vmax.f32 %v1549_v63, 0.0  ;;  %v600_v31 = vld [vmem:[%s5910_s9 + $0x6d8] sm:$0xff]  ;;  %v743_v16 = vpack.c.bf16 %v595_v50, %v591_v27  ;;  %v5071_v63 = vld [vmem:[#allocation11 + $0xcc] ss:$16 sps:$4 sm:$0xff]   ;;  %v6396_v45 = vpop.f32.mrf.mxu0 }
 0x21b   : > { %v1552_v24 = vpop.f32.mrf.mxu1 }
 0x21c   : > { %v1553_v4 = vadd.f32 %v1552_v24, %v1200_v53  ;;  %v1868_v13 = vmax.f32 %v1551_v15, 0.0 }
 0x21d   : > { %v1554_v60 = vpop.f32.mrf.mxu1 }
 0x21e   : > { %v1555_v55 = vadd.f32 %v1554_v60, %v1202_v29  ;;  %v1869_v35 = vmax.f32 %v1553_v4, 0.0  ;;  %v1208_v60 = vadd.f32 %v6136_v58, %v6365_v20  ;;  %v1210_v4 = vadd.f32 %v6142_v0, %v6361_v19 }
 0x21f   : > { %v1558_v38 = vpop.f32.mrf.mxu1  ;;  %1797 = vmatmul.mubr.bf16.gmra.mxu1 %v739_v5  ;;  %v748_v5 = vpack.c.bf16 %v604_v57, %v600_v31  ;;  %v1216_v57 = vadd.f32 %v6158_v12, %v6361_v19  ;;  %v5083_v12 = vld [vmem:[#allocation11 + $0x8c] ss:$16 sps:$4 sm:$0xff]  }
 0x220   : > { %v1870_v22 = vmax.f32 %v1555_v55, 0.0  ;;  %1806 = vmatprep.mubr.bf16.mxu1 %v744_v1  ;;  %v5063_v55 = vld [vmem:[#allocation11 + $0xe8] ss:$16 sps:$4 sm:$0xff]   ;;  %v1995_v1 = vpack.c.bf16 %v1869_v35, %v1867_v48  ;;  %v1559_v29 = vadd.f32 %v1558_v38, %v1206_v44  ;;  %v5108_v38 = vld [vmem:[#allocation11 + $0x1e0] ss:$16 sps:$4 sm:$0xff]  }
 0x221   : > { %v1560_v11 = vpop.f32.mrf.mxu1  ;;  %v5069_v48 = vld [vmem:[#allocation11 + $0xc8] ss:$16 sps:$4 sm:$0xff]   ;;  %v5110_v44 = vld [vmem:[#allocation11 + $0x1e4] ss:$16 sps:$4 sm:$0xff]  }
 0x222   : > { %v1996_v15 = vpack.c.bf16 %v1870_v22, %v1868_v13  ;;  %v1561_v53 = vadd.f32 %v1560_v11, %v1208_v60  ;;  %v599_v13 = vld [vmem:[%s5910_s9 + $0x6d0] sm:$0xff]  ;;  %v1871_v31 = vmax.f32 %v1559_v29, 0.0  ;;  %3230 = vmatprep.subr.bf16.mxu1 %v5110_v44 }
 0x223   : > { %v1562_v18 = vpop.f32.mrf.mxu1  ;;  %v5077_v22 = vld [vmem:[#allocation11 + $0xac] ss:$16 sps:$4 sm:$0xff]   ;;  %3231 = vmatpush2.bf16.msra.mxu1 %v5108_v38 }
 0x224   : > { %v1563_v24 = vadd.f32 %v1562_v18, %v1210_v4  ;;  %2295 = vmatprep.mubr.bf16.mxu0 %v1996_v15  ;;  %v1872_v27 = vmax.f32 %v1561_v53, 0.0  ;;  %v608_v4 = vld [vmem:[%s5910_s9 + $0x718] sm:$0xff]  ;;  %v1220_v18 = vadd.f32 %v6174_v28, %v6361_v19  ;;  %v607_v38 = vld [vmem:[%s5910_s9 + $0x710] sm:$0xff] }
 0x225   : > { %v1564_v58 = vpop.f32.mrf.mxu1  ;;  %2296 = vmatmul.mubr.bf16.vlgmr.msra.gmra.mxu0 %v1995_v1  ;;  %v612_v15 = vld [vmem:[%s5910_s9 + $0x738] sm:$0xff]  ;;  %v1218_v1 = vadd.f32 %v6168_v21, %v6365_v20 }
 0x226   : > { %v1565_v0 = vadd.f32 %v1564_v58, %v1212_v49  ;;  %3568 = vmatpush1.bf16.msra.mxu0 %v5063_v55  ;;  %v1873_v50 = vmax.f32 %v1563_v24, 0.0  ;;  %v6404_v55 = vpop.f32.mrf.mxu0  ;;  %v747_v24 = vpack.c.bf16 %v603_v7, %v599_v13  ;;  %v752_v21 = vpack.c.bf16 %v612_v15, %v608_v4  ;;  %v5081_v13 = vld [vmem:[#allocation11 + $0x88] ss:$16 sps:$4 sm:$0xff]  }
 0x227   : > { %v1568_v35 = vpop.f32.mrf.mxu1  ;;  %1807 = vmatmul.mubr.bf16.gmra.mxu1 %v743_v16  ;;  %3569 = vmatprep.subr.bf16.mxu0 %v5071_v63  ;;  %v5075_v63 = vld [vmem:[#allocation11 + $0xa8] ss:$16 sps:$4 sm:$0xff]  }
 0x228   : > { %v1874_v11 = vmax.f32 %v1565_v0, 0.0  ;;  %1816 = vmatprep.mubr.bf16.mxu1 %v748_v5  ;;  %v1997_v49 = vpack.c.bf16 %v1873_v50, %v1871_v31  ;;  %v1222_v5 = vadd.f32 %v6184_v42, %v6365_v20  ;;  %v1569_v0 = vadd.f32 %v1568_v35, %v1216_v57  ;;  %v5089_v42 = vld [vmem:[#allocation11 + $0x6c] ss:$16 sps:$4 sm:$0xff]   ;;  %v620_v4 = vld [vmem:[%s5910_s9 + $0x778] sm:$0xff] }
 0x229   : > { %v1570_v60 = vpop.f32.mrf.mxu1  ;;  %v611_v35 = vld [vmem:[%s5910_s9 + $0x730] sm:$0xff]  ;;  %v1226_v31 = vadd.f32 %v6190_v52, %v6361_v19  ;;  %v1232_v52 = vadd.f32 %v6216_v25, %v6365_v20 }
 0x22a   : > { %v1998_v16 = vpack.c.bf16 %v1874_v11, %v1872_v27  ;;  %3570 = vmatpush1.bf16.msra.mxu0 %v5069_v48  ;;  %v1571_v29 = vadd.f32 %v1570_v60, %v1218_v1  ;;  %v6412_v48 = vpop.f32.mrf.mxu0  ;;  %v1875_v44 = vmax.f32 %v1569_v0, 0.0  ;;  %v616_v60 = vld [vmem:[%s5910_s9 + $0x758] sm:$0xff]  ;;  %v1228_v1 = vadd.f32 %v6200_v3, %v6365_v20  ;;  %v619_v25 = vld [vmem:[%s5910_s9 + $0x770] sm:$0xff] }
 0x22b   : > { %v1572_v53 = vpop.f32.mrf.mxu1  ;;  %3571 = vmatprep.subr.bf16.mxu0 %v5077_v22  ;;  %v756_v3 = vpack.c.bf16 %v620_v4, %v616_v60  ;;  %v628_v60 = vld [vmem:[%s5910_s9 + $0x7b8] sm:$0xff] }
 0x22c   : > { %v1573_v58 = vadd.f32 %v1572_v53, %v1220_v18  ;;  %2305 = vmatprep.mubr.bf16.mxu0 %v1998_v16  ;;  %v1876_v27 = vmax.f32 %v1571_v29, 0.0  ;;  %v6420_v15 = vpop.f32.mrf.mxu0  ;;  %v1230_v18 = vadd.f32 %v6206_v14, %v6361_v19 }
 0x22d   : > { %v1574_v28 = vpop.f32.mrf.mxu1  ;;  %2306 = vmatmul.mubr.bf16.gmra.mxu0 %v1997_v49 }
 0x22e   : > { %v1575_v50 = vadd.f32 %v1574_v28, %v1222_v5  ;;  %3572 = vmatpush1.bf16.msra.mxu0 %v5075_v63  ;;  %v1877_v7 = vmax.f32 %v1573_v58, 0.0  ;;  %v5087_v63 = vld [vmem:[#allocation11 + $0x68] ss:$16 sps:$4 sm:$0xff]   ;;  %v6428_v14 = vpop.f32.mrf.mxu0 }
 0x22f   : > { %v1578_v22 = vpop.f32.mrf.mxu1  ;;  %1817 = vmatmul.mubr.bf16.gmra.mxu1 %v747_v24  ;;  %3573 = vmatprep.subr.bf16.mxu0 %v5083_v12  ;;  %v751_v24 = vpack.c.bf16 %v611_v35, %v607_v38  ;;  %v5095_v12 = vld [vmem:[#allocation11 + $0x4c] ss:$16 sps:$4 sm:$0xff]   ;;  %v5093_v28 = vld [vmem:[#allocation11 + $0x48] ss:$16 sps:$4 sm:$0xff]   ;;  %v5116_v38 = vld [vmem:[#allocation11 + $0x1c4] ss:$16 sps:$4 sm:$0xff]  }
 0x230   : > { %v1878_v11 = vmax.f32 %v1575_v50, 0.0  ;;  %1826 = vmatprep.mubr.bf16.mxu1 %v752_v21  ;;  %v1999_v49 = vpack.c.bf16 %v1877_v7, %v1875_v44  ;;  %v1579_v58 = vadd.f32 %v1578_v22, %v1226_v31  ;;  %v615_v7 = vld [vmem:[%s5910_s9 + $0x750] sm:$0xff]  ;;  %v1236_v44 = vadd.f32 %v6222_v46, %v6361_v19  ;;  %v6436_v4 = vpop.f32.mrf.mxu0  ;;  %3232 = vmatprep.subr.bf16.mxu1 %v5116_v38  ;;  %v636_v38 = vld [vmem:[%s5910_s9 + $0x7f8] sm:$0xff] }
 0x231   : > { %v1580_v57 = vpop.f32.mrf.mxu1  ;;  %v5114_v22 = vld [vmem:[#allocation11 + $0x1c0] ss:$16 sps:$4 sm:$0xff]   ;;  %v5107_v46 = vld [vmem:[#allocation11 + $0xc] ss:$16 sps:$4 sm:$0xff]  }
 0x232   : > { %v2000_v16 = vpack.c.bf16 %v1878_v11, %v1876_v27  ;;  %3574 = vmatpush1.bf16.msra.mxu0 %v5081_v13  ;;  %v1581_v5 = vadd.f32 %v1580_v57, %v1228_v1  ;;  %v1879_v35 = vmax.f32 %v1579_v58, 0.0  ;;  %v624_v57 = vld [vmem:[%s5910_s9 + $0x798] sm:$0xff]  ;;  %v1238_v1 = vadd.f32 %v6232_v9, %v6365_v20  ;;  %3233 = vmatpush2.bf16.msra.mxu1 %v5114_v22 }
 0x233   : > { %v1582_v53 = vpop.f32.mrf.mxu1  ;;  %3575 = vmatprep.subr.bf16.mxu0 %v5089_v42  ;;  %v5101_v42 = vld [vmem:[#allocation11 + $0x2c] ss:$16 sps:$4 sm:$0xff]   ;;  %v760_v9 = vpack.c.bf16 %v628_v60, %v624_v57  ;;  %v632_v22 = vld [vmem:[%s5910_s9 + $0x7d8] sm:$0xff] }
 0x234   : > { %v1583_v29 = vadd.f32 %v1582_v53, %v1230_v18  ;;  %2315 = vmatprep.mubr.bf16.mxu0 %v2000_v16  ;;  %v1880_v27 = vmax.f32 %v1581_v5, 0.0  ;;  %v1240_v18 = vadd.f32 %v6238_v37, %v6361_v19  ;;  %v5111_v60 = vld [vmem:[#allocation11 + $0x1e8] ss:$16 sps:$4 sm:$0xff]  }
 0x235   : > { %v1584_v21 = vpop.f32.mrf.mxu1  ;;  %2316 = vmatmul.mubr.bf16.gmra.mxu0 %v1999_v49 }
 0x236   : > { %v1585_v0 = vadd.f32 %v1584_v21, %v1232_v52  ;;  %3576 = vmatpush1.bf16.msra.mxu0 %v5087_v63  ;;  %v1881_v50 = vmax.f32 %v1583_v29, 0.0  ;;  %v5099_v63 = vld [vmem:[#allocation11 + $0x28] ss:$16 sps:$4 sm:$0xff]  }
 0x237   : > { %v1588_v13 = vpop.f32.mrf.mxu1  ;;  %1827 = vmatmul.mubr.bf16.gmra.mxu1 %v751_v24  ;;  %3577 = vmatprep.subr.bf16.mxu0 %v5095_v12  ;;  %v755_v24 = vpack.c.bf16 %v619_v25, %v615_v7  ;;  %v1242_v12 = vadd.f32 %v6248_v54, %v6365_v20  ;;  %v5105_v21 = vld [vmem:[#allocation11 + $0x8] ss:$16 sps:$4 sm:$0xff]   ;;  %v5113_v54 = vld [vmem:[#allocation11 + $0x1ec] ss:$16 sps:$4 sm:$0xff]  }
 0x238   : > { %v1882_v11 = vmax.f32 %v1585_v0, 0.0  ;;  %1836 = vmatprep.mubr.bf16.mxu1 %v756_v3  ;;  %v2001_v49 = vpack.c.bf16 %v1881_v50, %v1879_v35  ;;  %v1589_v29 = vadd.f32 %v1588_v13, %v1236_v44  ;;  %v6444_v3 = vpop.f32.mrf.mxu0  ;;  %v623_v25 = vld [vmem:[%s5910_s9 + $0x790] sm:$0xff]  ;;  %v1248_v44 = vadd.f32 %v6264_v62, %v6365_v20 }
 0x239   : > { %v1590_v31 = vpop.f32.mrf.mxu1  ;;  %v627_v13 = vld [vmem:[%s5910_s9 + $0x7b0] sm:$0xff]  ;;  %v764_v62 = vpack.c.bf16 %v636_v38, %v632_v22 }
 0x23a   : > { %v2002_v16 = vpack.c.bf16 %v1882_v11, %v1880_v27  ;;  %3578 = vmatpush1.bf16.msra.mxu0 %v5093_v28  ;;  %v1591_v52 = vadd.f32 %v1590_v31, %v1238_v1  ;;  %v1246_v27 = vadd.f32 %v6254_v39, %v6361_v19  ;;  %v6452_v35 = vpop.f32.mrf.mxu0  ;;  %v1250_v31 = vadd.f32 %v6270_v17, %v6361_v19 }
 0x23b   : > { %v1592_v53 = vpop.f32.mrf.mxu1  ;;  %3579 = vmatprep.subr.bf16.mxu0 %v5101_v42  ;;  %v1883_v42 = vmax.f32 %v1589_v29, 0.0  ;;  %v1252_v39 = vadd.f32 %v6280_v40, %v6365_v20  ;;  %v631_v29 = vld [vmem:[%s5910_s9 + $0x7d0] sm:$0xff] }
 0x23c   : > { %v1593_v5 = vadd.f32 %v1592_v53, %v1240_v18  ;;  %2325 = vmatprep.mubr.bf16.mxu0 %v2002_v16  ;;  %v1884_v50 = vmax.f32 %v1591_v52, 0.0  ;;  %v759_v16 = vpack.c.bf16 %v627_v13, %v623_v25  ;;  %v6460_v17 = vpop.f32.mrf.mxu0  ;;  %v5117_v52 = vld [vmem:[#allocation11 + $0x1c8] ss:$16 sps:$4 sm:$0xff]   ;;  %v5125_v25 = vld [vmem:[#allocation11 + $0x1ac] ss:$16 sps:$4 sm:$0xff]   ;;  %v1258_v13 = vadd.f32 %v6296_v56, %v6365_v20 }
 0x23d   : > { %v1594_v37 = vpop.f32.mrf.mxu1  ;;  %2326 = vmatmul.mubr.bf16.gmra.mxu0 %v2001_v49 }
 0x23e   : > { %v1595_v58 = vadd.f32 %v1594_v37, %v1242_v12  ;;  %3580 = vmatpush1.bf16.msra.mxu0 %v5099_v63  ;;  %v1885_v0 = vmax.f32 %v1593_v5, 0.0  ;;  %v5119_v63 = vld [vmem:[#allocation11 + $0x1cc] ss:$16 sps:$4 sm:$0xff]  }
 0x23f   : > { %v1598_v28 = vpop.f32.mrf.mxu1  ;;  %1837 = vmatmul.mubr.bf16.gmra.mxu1 %v755_v24  ;;  %3581 = vmatprep.subr.bf16.mxu0 %v5107_v46  ;;  %v635_v37 = vld [vmem:[%s5910_s9 + $0x7f0] sm:$0xff] }
 0x240   : > { %v1886_v7 = vmax.f32 %v1595_v58, 0.0  ;;  %1846 = vmatprep.mubr.bf16.mxu1 %v760_v9  ;;  %v2003_v1 = vpack.c.bf16 %v1885_v0, %v1883_v42  ;;  %v1599_v24 = vadd.f32 %v1598_v28, %v1246_v27  ;;  %v5122_v0 = vld [vmem:[#allocation11 + $0x1a4] ss:$16 sps:$4 sm:$0xff]   ;;  %v1256_v28 = vadd.f32 %v6286_v6, %v6361_v19 }
 0x241   : > { %v1600_v11 = vpop.f32.mrf.mxu1  ;;  %v1260_v42 = vadd.f32 %v6302_v59, %v6361_v19  ;;  %3234 = vmatprep.subr.bf16.mxu1 %v5122_v0  ;;  %v1262_v6 = vadd.f32 %v6312_v10, %v6365_v20 }
 0x242   : > { %v2004_v57 = vpack.c.bf16 %v1886_v7, %v1884_v50  ;;  %3582 = vmatpush1.bf16.msra.mxu0 %v5105_v21  ;;  %v1601_v49 = vadd.f32 %v1600_v11, %v1248_v44  ;;  %v5120_v21 = vld [vmem:[#allocation11 + $0x1a0] ss:$16 sps:$4 sm:$0xff]   ;;  %v6466_v7 = vpop.f32.mrf.mxu0  ;;  %v5123_v11 = vld [vmem:[#allocation11 + $0x1a8] ss:$16 sps:$4 sm:$0xff]   ;;  %v763_v44 = vpack.c.bf16 %v635_v37, %v631_v29 }
 0x243   : > { %v1602_v18 = vpop.f32.mrf.mxu1  ;;  %3583 = vmatprep.subr.bf16.mxu0 %v5113_v54  ;;  %v1887_v54 = vmax.f32 %v1599_v24, 0.0  ;;  %3235 = vmatpush2.bf16.msra.mxu1 %v5120_v21  ;;  %v1268_v24 = vadd.f32 %v6328_v61, %v6365_v20 }
 0x244   : > { %v1603_v53 = vadd.f32 %v1602_v18, %v1250_v31  ;;  %2335 = vmatprep.mubr.bf16.mxu0 %v2004_v57  ;;  %v1888_v40 = vmax.f32 %v1601_v49, 0.0 }
 0x245   : > { %v1604_v46 = vpop.f32.mrf.mxu1  ;;  %2336 = vmatmul.mubr.bf16.gmra.mxu0 %v2003_v1  ;;  %v6474_v1 = vpop.f32.mrf.mxu0 }
 0x246   : > { %v1605_v12 = vadd.f32 %v1604_v46, %v1252_v39  ;;  %3584 = vmatpush2.bf16.msra.mxu0 %v5111_v60  ;;  %v1889_v5 = vmax.f32 %v1603_v53, 0.0  ;;  %v1266_v53 = vadd.f32 %v6318_v47, %v6361_v19  ;;  %v1270_v46 = vadd.f32 %v6334_v33, %v6361_v19  ;;  %v5126_v33 = vld [vmem:[#allocation11 + $0x180] ss:$16 sps:$4 sm:$0xff]  }
 0x247   : > { %v1608_v9 = vpop.f32.mrf.mxu1  ;;  %1847 = vmatmul.mubr.bf16.gmra.mxu1 %v759_v16  ;;  %3585 = vmatprep.subr.bf16.mxu0 %v5119_v63 }
 0x248   : > { %v1890_v58 = vmax.f32 %v1605_v12, 0.0  ;;  %1856 = vmatprep.mubr.bf16.mxu1 %v764_v62  ;;  %v2005_v22 = vpack.c.bf16 %v1889_v5, %v1887_v54  ;;  %v1609_v60 = vadd.f32 %v1608_v9, %v1256_v28  ;;  %v6478_v62 = vpop.f32.mrf.mxu0  ;;  %v1272_v9 = vadd.f32 %v6346_v51, %v6365_v20 }
 0x249   : > { %v1610_v50 = vpop.f32.mrf.mxu1 }
 0x24a   : > { %v2006_v27 = vpack.c.bf16 %v1890_v58, %v1888_v40  ;;  %3586 = vmatpush2.bf16.msra.mxu0 %v5117_v52  ;;  %v1611_v31 = vadd.f32 %v1610_v50, %v1258_v13  ;;  %v1891_v49 = vmax.f32 %v1609_v60, 0.0  ;;  %v6486_v58 = vpop.f32.mrf.mxu0  ;;  %v5128_v50 = vld [vmem:[#allocation11 + $0x184] ss:$16 sps:$4 sm:$0xff]   ;;  %v1276_v13 = vadd.f32 %v6358_v43, %v6361_v19 }
 0x24b   : > { %v1612_v38 = vpop.f32.mrf.mxu1  ;;  %3587 = vmatprep.subr.bf16.mxu0 %v5125_v25  ;;  %3236 = vmatprep.subr.bf16.mxu1 %v5128_v50  ;;  %v1282_v43 = vadd.f32 %v6388_v2, %v6365_v20 }
 0x24c   : > { %v1613_v57 = vadd.f32 %v1612_v38, %v1260_v42  ;;  %2345 = vmatprep.mubr.bf16.mxu0 %v2006_v27  ;;  %v1892_v63 = vmax.f32 %v1611_v31, 0.0  ;;  %v6490_v42 = vpop.f32.mrf.mxu0  ;;  %v5129_v27 = vld [vmem:[#allocation11 + $0x188] ss:$16 sps:$4 sm:$0xff]   ;;  %v1280_v38 = vadd.f32 %v6380_v32, %v6361_v19  ;;  %3237 = vmatpush2.bf16.msra.mxu1 %v5126_v33 }
 0x24d   : > { %v1614_v56 = vpop.f32.mrf.mxu1  ;;  %2346 = vmatmul.mubr.bf16.gmra.mxu0 %v2005_v22  ;;  %v1278_v22 = vadd.f32 %v6372_v8, %v6365_v20 }
 0x24e   : > { %v1615_v59 = vadd.f32 %v1614_v56, %v1262_v6  ;;  %3588 = vmatpush2.bf16.msra.mxu0 %v5123_v11  ;;  %v1893_v18 = vmax.f32 %v1613_v57, 0.0  ;;  %v5131_v11 = vld [vmem:[#allocation11 + $0x18c] ss:$16 sps:$4 sm:$0xff]   ;;  %v6498_v8 = vpop.f32.mrf.mxu0 }
 0x24f   : > { %v1618_v16 = vpop.f32.mrf.mxu1  ;;  %1857 = vmatmul.mubr.bf16.gmra.mxu1 %v763_v44  ;;  %3589 = vmatprep.subr.bf16.mxu0 %v5131_v11 }
 0x250   : > { %v1894_v39 = vmax.f32 %v1615_v59, 0.0  ;;  %v2007_v52 = vpack.c.bf16 %v1893_v18, %v1891_v49  ;;  %v1619_v40 = vadd.f32 %v1618_v16, %v1266_v53  ;;  %v1286_v53 = vadd.f32 %v6396_v45, %v6361_v19  ;;  %v6502_v2 = vpop.f32.mrf.mxu0 }
 0x251   : > { %v1620_v10 = vpop.f32.mrf.mxu1 }
 0x252   : > { %v2008_v12 = vpack.c.bf16 %v1894_v39, %v1892_v63  ;;  %v1621_v29 = vadd.f32 %v1620_v10, %v1268_v24  ;;  %v1895_v25 = vmax.f32 %v1619_v40, 0.0  ;;  %3590 = vmatpush2.bf16.msra.mxu0 %v5129_v27  ;;  %v5134_v24 = vld [vmem:[#allocation11 + $0x164] ss:$16 sps:$4 sm:$0xff]  }
 0x253   : > { %v1622_v5 = vpop.f32.mrf.mxu1  ;;  %3238 = vmatprep.subr.bf16.mxu1 %v5134_v24 }
 0x254   : > { %v1623_v37 = vadd.f32 %v1622_v5, %v1270_v46  ;;  %2355 = vmatprep.mubr.bf16.mxu0 %v2008_v12  ;;  %v1896_v54 = vmax.f32 %v1621_v29, 0.0  ;;  %v1288_v46 = vadd.f32 %v6404_v55, %v6365_v20  ;;  %v1290_v12 = vadd.f32 %v6412_v48, %v6361_v19  ;;  %v5132_v5 = vld [vmem:[#allocation11 + $0x160] ss:$16 sps:$4 sm:$0xff]  }
 0x255   : > { %v1624_v47 = vpop.f32.mrf.mxu1  ;;  %2356 = vmatmul.mubr.bf16.gmra.mxu0 %v2007_v52  ;;  %3239 = vmatpush2.bf16.msra.mxu1 %v5132_v5 }
 0x256   : > { %v1625_v21 = vadd.f32 %v1624_v47, %v1272_v9  ;;  %v1897_v0 = vmax.f32 %v1623_v37, 0.0  ;;  %v1292_v37 = vadd.f32 %v6420_v15, %v6365_v20 }
 0x257   : > { %v1628_v61 = vpop.f32.mrf.mxu1 }
 0x258   : > { %v1898_v28 = vmax.f32 %v1625_v21, 0.0  ;;  %v2009_v6 = vpack.c.bf16 %v1897_v0, %v1895_v25  ;;  %v1629_v56 = vadd.f32 %v1628_v61, %v1276_v13  ;;  %v6510_v0 = vpop.f32.mrf.mxu0  ;;  %v5140_v61 = vld [vmem:[#allocation11 + $0x144] ss:$16 sps:$4 sm:$0xff]   ;;  %v5135_v25 = vld [vmem:[#allocation11 + $0x168] ss:$16 sps:$4 sm:$0xff]  }
 0x259   : > { %v1630_v51 = vpop.f32.mrf.mxu1  ;;  %v5137_v13 = vld [vmem:[#allocation11 + $0x16c] ss:$16 sps:$4 sm:$0xff]   ;;  %3240 = vmatprep.subr.bf16.mxu1 %v5140_v61 }
 0x25a   : > { %v2010_v44 = vpack.c.bf16 %v1898_v28, %v1896_v54  ;;  %v1631_v57 = vadd.f32 %v1630_v51, %v1278_v22  ;;  %v1899_v49 = vmax.f32 %v1629_v56, 0.0  ;;  %v5138_v28 = vld [vmem:[#allocation11 + $0x140] ss:$16 sps:$4 sm:$0xff]   ;;  %v1296_v51 = vadd.f32 %v6428_v14, %v6361_v19  ;;  %v6514_v11 = vpop.f32.mrf.mxu0  ;;  %3591 = vmatprep.subr.bf16.mxu0 %v5137_v13 }
 0x25b   : > { %v1632_v31 = vpop.f32.mrf.mxu1  ;;  %3241 = vmatpush2.bf16.msra.mxu1 %v5138_v28  ;;  %v1298_v22 = vadd.f32 %v6436_v4, %v6365_v20  ;;  %3592 = vmatpush2.bf16.msra.mxu0 %v5135_v25  ;;  %v1302_v14 = vadd.f32 %v6452_v35, %v6365_v20  ;;  %v1306_v35 = vadd.f32 %v6460_v17, %v6361_v19  ;;  %v5147_v25 = vld [vmem:[#allocation11 + $0x148] ss:$16 sps:$4 sm:$0xff]  }
 0x25c   : > { %v1633_v60 = vadd.f32 %v1632_v31, %v1280_v38  ;;  %2365 = vmatprep.mubr.bf16.mxu0 %v2010_v44  ;;  %v1900_v63 = vmax.f32 %v1631_v57, 0.0  ;;  %v1300_v38 = vadd.f32 %v6444_v3, %v6361_v19  ;;  %v5141_v57 = vld [vmem:[#allocation11 + $0x120] ss:$16 sps:$4 sm:$0xff]   ;;  %v6522_v4 = vpop.f32.mrf.mxu0  ;;  %v1318_v13 = vadd.f32 %v6490_v42, %v6365_v20 }
 0x25d   : > { %v1634_v59 = vpop.f32.mrf.mxu1  ;;  %2366 = vmatmul.mubr.bf16.gmra.mxu0 %v2009_v6  ;;  %v5143_v6 = vld [vmem:[#allocation11 + $0x124] ss:$16 sps:$4 sm:$0xff]  }
 0x25e   : > { %v1635_v18 = vadd.f32 %v1634_v59, %v1282_v43  ;;  %v1901_v32 = vmax.f32 %v1633_v60, 0.0  ;;  %3242 = vmatprep.subr.bf16.mxu1 %v5143_v6 }
 0x25f   : > { %v1638_v16 = vpop.f32.mrf.mxu1  ;;  %3243 = vmatpush2.bf16.msra.mxu1 %v5141_v57 }
 0x260   : > { %v1902_v39 = vmax.f32 %v1635_v18, 0.0  ;;  %v2011_v9 = vpack.c.bf16 %v1901_v32, %v1899_v49  ;;  %v1639_v47 = vadd.f32 %v1638_v16, %v1286_v53  ;;  %v5146_v32 = vld [vmem:[#allocation11 + $0x104] ss:$16 sps:$4 sm:$0xff]  }
 0x261   : > { %v1640_v10 = vpop.f32.mrf.mxu1  ;;  %3244 = vmatprep.subr.bf16.mxu1 %v5146_v32  ;;  %v1330_v32 = vadd.f32 %v6522_v4, %v6361_v19 }
 0x262   : > { %v2012_v52 = vpack.c.bf16 %v1902_v39, %v1900_v63  ;;  %v1641_v40 = vadd.f32 %v1640_v10, %v1288_v46  ;;  %v1903_v15 = vmax.f32 %v1639_v47, 0.0  ;;  %v5144_v39 = vld [vmem:[#allocation11 + $0x100] ss:$16 sps:$4 sm:$0xff]   ;;  %v1331_v46 = vpop.f32.mrf.mxu0 }
 0x263   : > { %v1642_v29 = vpop.f32.mrf.mxu1  ;;  %3245 = vmatpush2.bf16.msra.mxu1 %v5144_v39 }
 0x264   : > { %v1643_v45 = vadd.f32 %v1642_v29, %v1290_v12  ;;  %2375 = vmatprep.mubr.bf16.mxu0 %v2012_v52  ;;  %v1904_v33 = vmax.f32 %v1641_v40, 0.0  ;;  %v1308_v12 = vadd.f32 %v6466_v7, %v6365_v20  ;;  %v1310_v52 = vadd.f32 %v6474_v1, %v6361_v19 }
 0x265   : > { %v1644_v21 = vpop.f32.mrf.mxu1  ;;  %2376 = vmatmul.mubr.bf16.gmra.mxu0 %v2011_v9  ;;  %v1316_v1 = vadd.f32 %v6486_v58, %v6361_v19 }
 0x266   : > { %v1645_v55 = vadd.f32 %v1644_v21, %v1292_v37  ;;  %v1905_v48 = vmax.f32 %v1643_v45, 0.0  ;;  %v1312_v37 = vadd.f32 %v6478_v62, %v6365_v20  ;;  %v1335_v21 = vpop.f32.mrf.mxu0  ;;  %v5149_v62 = vld [vmem:[#allocation11 + $0x14c] ss:$16 sps:$4 sm:$0xff]  }
 0x267   : > { %v1648_v54 = vpop.f32.mrf.mxu1  ;;  %3593 = vmatprep.subr.bf16.mxu0 %v5149_v62  ;;  %v1336_v4 = vadd.f32 %v1335_v21, %v6361_v19 }
 0x268   : > { %v1906_v50 = vmax.f32 %v1645_v55, 0.0  ;;  %v2013_v31 = vpack.c.bf16 %v1905_v48, %v1903_v15  ;;  %v1649_v59 = vadd.f32 %v1648_v54, %v1296_v51  ;;  %v1320_v15 = vadd.f32 %v6498_v8, %v6361_v19  ;;  %3594 = vmatpush2.bf16.msra.mxu0 %v5147_v25 }
 0x269   : > { %v1650_v27 = vpop.f32.mrf.mxu1 }
 0x26a   : > { %v2014_v44 = vpack.c.bf16 %v1906_v50, %v1904_v33  ;;  %v1651_v60 = vadd.f32 %v1650_v27, %v1298_v22  ;;  %v1907_v10 = vmax.f32 %v1649_v59, 0.0  ;;  %v1337_v50 = vpop.f32.mrf.mxu0  ;;  %v1326_v59 = vadd.f32 %v6510_v0, %v6361_v19 }
 0x26b   : > { %v1652_v43 = vpop.f32.mrf.mxu1 }
 0x26c   : > { %v1653_v56 = vadd.f32 %v1652_v43, %v1300_v38  ;;  %2385 = vmatprep.mubr.bf16.mxu0 %v2014_v44  ;;  %v1908_v49 = vmax.f32 %v1651_v60, 0.0  ;;  %v1322_v38 = vadd.f32 %v6502_v2, %v6365_v20  ;;  %v1339_v43 = vpop.f32.mrf.mxu0  ;;  %v1328_v2 = vadd.f32 %v6514_v11, %v6365_v20 }
 0x26d   : > { %v1654_v18 = vpop.f32.mrf.mxu1  ;;  %2386 = vmatmul.mubr.bf16.gmra.mxu0 %v2013_v31 }
 0x26e   : > { %v1655_v3 = vadd.f32 %v1654_v18, %v1302_v14  ;;  %v1909_v16 = vmax.f32 %v1653_v56, 0.0 }
 0x26f   : > { %v1658_v63 = vpop.f32.mrf.mxu1 }
 0x270   : > { %v1910_v53 = vmax.f32 %v1655_v3, 0.0  ;;  %v2015_v9 = vpack.c.bf16 %v1909_v16, %v1907_v10  ;;  %v1659_v47 = vadd.f32 %v1658_v63, %v1306_v35  ;;  %v1341_v3 = vpop.f32.mrf.mxu0 }
 0x271   : > { %v1660_v24 = vpop.f32.mrf.mxu1 }
 0x272   : > { %v2016_v5 = vpack.c.bf16 %v1910_v53, %v1908_v49  ;;  %v1661_v40 = vadd.f32 %v1660_v24, %v1308_v12  ;;  %v1911_v28 = vmax.f32 %v1659_v47, 0.0  ;;  %v1332_v49 = vadd.f32 %v1331_v46, %v6365_v20  ;;  %v1345_v0 = vpop.f32.mrf.mxu0  ;;  %v5152_v47 = vld [vmem:[#allocation11 + $0x12c] ss:$16 sps:$4 sm:$0xff]  }
 0x273   : > { %v1662_v29 = vpop.f32.mrf.mxu1  ;;  %v1338_v46 = vadd.f32 %v1337_v50, %v6365_v20  ;;  %3595 = vmatprep.subr.bf16.mxu0 %v5152_v47 }
 0x274   : > { %v1663_v45 = vadd.f32 %v1662_v29, %v1310_v52  ;;  %2395 = vmatprep.mubr.bf16.mxu0 %v2016_v5  ;;  %v1912_v7 = vmax.f32 %v1661_v40, 0.0  ;;  %v1347_v40 = vpop.f32.mrf.mxu0 }
 0x275   : > { %v1664_v17 = vpop.f32.mrf.mxu1  ;;  %2396 = vmatmul.mubr.bf16.gmra.mxu0 %v2015_v9 }
 0x276   : > { %v1665_v55 = vadd.f32 %v1664_v17, %v1312_v37  ;;  %v1913_v61 = vmax.f32 %v1663_v45, 0.0  ;;  %v5150_v45 = vld [vmem:[#allocation11 + $0x128] ss:$16 sps:$4 sm:$0xff]   ;;  %v1340_v17 = vadd.f32 %v1339_v43, %v6361_v19  ;;  %v1349_v21 = vpop.f32.mrf.mxu0 }
 0x277   : > { %v1668_v48 = vpop.f32.mrf.mxu1  ;;  %3596 = vmatpush2.bf16.msra.mxu0 %v5150_v45 }
 0x278   : > { %v1914_v54 = vmax.f32 %v1665_v55, 0.0  ;;  %v2017_v27 = vpack.c.bf16 %v1913_v61, %v1911_v28  ;;  %v1669_v58 = vadd.f32 %v1668_v48, %v1316_v1 }
 0x279   : > { %v1670_v33 = vpop.f32.mrf.mxu1 }
 0x27a   : > { %v2018_v51 = vpack.c.bf16 %v1914_v54, %v1912_v7  ;;  %v1671_v44 = vadd.f32 %v1670_v33, %v1318_v13  ;;  %v1915_v56 = vmax.f32 %v1669_v58, 0.0  ;;  %v1342_v7 = vadd.f32 %v1341_v3, %v6365_v20 }
 0x27b   : > { %v1672_v22 = vpop.f32.mrf.mxu1  ;;  %v1356_v3 = vadd.f32 %v6094_v23, %v6361_v19  ;;  %v1362_v23 = vadd.f32 %v6108_v34, %v6365_v20  ;;  %v1368_v34 = vadd.f32 %v6116_v41, %v6365_v20  ;;  %v8012_v41 = vld [vmem:[#allocation22_spill] sm:$0xff] }
 0x27c   : > { %v1673_v6 = vadd.f32 %v1672_v22, %v1320_v15  ;;  %2405 = vmatprep.mubr.bf16.mxu0 %v2018_v51  ;;  %v1916_v60 = vmax.f32 %v1671_v44, 0.0  ;;  %v1351_v22 = vpop.f32.mrf.mxu0  ;;  %v1348_v44 = vadd.f32 %v1347_v40, %v6365_v20 }
 0x27d   : > { %v1674_v31 = vpop.f32.mrf.mxu1  ;;  %2406 = vmatmul.mubr.bf16.gmra.mxu0 %v2017_v27  ;;  %v1346_v27 = vadd.f32 %v1345_v0, %v6361_v19 }
 0x27e   : > { %v1675_v57 = vadd.f32 %v1674_v31, %v1322_v38  ;;  %v1917_v42 = vmax.f32 %v1673_v6, 0.0  ;;  %v1350_v6 = vadd.f32 %v1349_v21, %v6361_v19 }
 0x27f   : > { %v1678_v14 = vpop.f32.mrf.mxu1 }
 0x280   : > { %v1918_v8 = vmax.f32 %v1675_v57, 0.0  ;;  %v2019_v63 = vpack.c.bf16 %v1917_v42, %v1915_v56  ;;  %v1679_v35 = vadd.f32 %v1678_v14, %v1326_v59  ;;  %v1352_v57 = vadd.f32 %v1351_v22, %v6365_v20  ;;  %v8013_v22 = vld [vmem:[#allocation23_spill] sm:$0xff] }
 0x281   : > { %v1680_v18 = vpop.f32.mrf.mxu1 }
 0x282   : > { %v2020_v16 = vpack.c.bf16 %v1918_v8, %v1916_v60  ;;  %v1681_v53 = vadd.f32 %v1680_v18, %v1328_v2  ;;  %v1919_v29 = vmax.f32 %v1679_v35, 0.0 }
 0x283   : > { %v1682_v39 = vpop.f32.mrf.mxu1 }
 0x284   : > { %v1683_v10 = vadd.f32 %v1682_v39, %v1330_v32  ;;  %2415 = vmatprep.mubr.bf16.mxu0 %v2020_v16  ;;  %v1920_v9 = vmax.f32 %v1681_v53, 0.0  ;;  %v5153_v39 = vld [vmem:[#allocation11 + $0x108] ss:$16 sps:$4 sm:$0xff]   ;;  %v1358_v53 = vadd.f32 %v6098_v26, %v6365_v20 }
 0x285   : > { %v1684_v24 = vpop.f32.mrf.mxu1  ;;  %2416 = vmatmul.mubr.bf16.gmra.mxu0 %v2019_v63 }
 0x286   : > { %v1685_v12 = vadd.f32 %v1684_v24, %v1332_v49  ;;  %v1921_v52 = vmax.f32 %v1683_v10, 0.0  ;;  %v5155_v49 = vld [vmem:[#allocation11 + $0x10c] ss:$16 sps:$4 sm:$0xff]   ;;  %v1360_v10 = vadd.f32 %v6104_v30, %v6361_v19  ;;  %v1366_v30 = vadd.f32 %v6112_v36, %v6361_v19 }
 0x287   : > { %v1688_v5 = vpop.f32.mrf.mxu1  ;;  %3597 = vmatprep.subr.bf16.mxu0 %v5155_v49 }
 0x288   : > { %v1922_v11 = vmax.f32 %v1685_v12, 0.0  ;;  %v2021_v61 = vpack.c.bf16 %v1921_v52, %v1919_v29  ;;  %v1689_v1 = vadd.f32 %v1688_v5, %v1336_v4  ;;  %3598 = vmatpush2.bf16.msra.mxu0 %v5153_v39 }
 0x289   : > { %v1690_v37 = vpop.f32.mrf.mxu1 }
 0x28a   : > { %v2022_v55 = vpack.c.bf16 %v1922_v11, %v1920_v9  ;;  %v1691_v54 = vadd.f32 %v1690_v37, %v1338_v46  ;;  %v1923_v51 = vmax.f32 %v1689_v1, 0.0  ;;  %v8010_v46 = vld [vmem:[#allocation20_spill] sm:$0xff] }
 0x28b   : > { %v1692_v48 = vpop.f32.mrf.mxu1 }
 0x28c   : > { %v1693_v28 = vadd.f32 %v1692_v48, %v1340_v17  ;;  %2425 = vmatprep.mubr.bf16.mxu0 %v2022_v55  ;;  %v1924_v50 = vmax.f32 %v1691_v54, 0.0  ;;  %v1370_v17 = vadd.f32 %v8010_v46, %v6361_v19 }
 0x28d   : > { %v1694_v33 = vpop.f32.mrf.mxu1  ;;  %2426 = vmatmul.mubr.bf16.gmra.mxu0 %v2021_v61 }
 0x28e   : > { %v1695_v25 = vadd.f32 %v1694_v33, %v1342_v7  ;;  %v1925_v62 = vmax.f32 %v1693_v28, 0.0  ;;  %v8011_v7 = vld [vmem:[#allocation21_spill] sm:$0xff] }
 0x28f   : > { %v1698_v13 = vpop.f32.mrf.mxu1  ;;  %v1372_v54 = vadd.f32 %v8011_v7, %v6365_v20 }
 0x290   : > { %v1926_v15 = vmax.f32 %v1695_v25, 0.0  ;;  %v2023_v31 = vpack.c.bf16 %v1925_v62, %v1923_v51  ;;  %v1699_v60 = vadd.f32 %v1698_v13, %v1346_v27  ;;  %v1376_v13 = vadd.f32 %v8012_v41, %v6361_v19 }
 0x291   : > { %v1700_v38 = vpop.f32.mrf.mxu1 }
 0x292   : > { %v2024_v58 = vpack.c.bf16 %v1926_v15, %v1924_v50  ;;  %v1701_v42 = vadd.f32 %v1700_v38, %v1348_v44  ;;  %v1927_v16 = vmax.f32 %v1699_v60, 0.0  ;;  %v1378_v38 = vadd.f32 %v8013_v22, %v6365_v20  ;;  %v8014_v44 = vld [vmem:[#allocation24_spill] sm:$0xff] }
 0x293   : > { %v1702_v43 = vpop.f32.mrf.mxu1 }
 0x294   : > { %v1703_v14 = vadd.f32 %v1702_v43, %v1350_v6  ;;  %2435 = vmatprep.mubr.bf16.mxu0 %v2024_v58  ;;  %v1928_v2 = vmax.f32 %v1701_v42, 0.0  ;;  %v1380_v6 = vadd.f32 %v8014_v44, %v6361_v19 }
 0x295   : > { %v1704_v8 = vpop.f32.mrf.mxu1  ;;  %2436 = vmatmul.mubr.bf16.gmra.mxu0 %v2023_v31 }
 0x296   : > { %v1705_v56 = vadd.f32 %v1704_v8, %v1352_v57  ;;  %v1929_v59 = vmax.f32 %v1703_v14, 0.0  ;;  %v8015_v57 = vld [vmem:[#allocation25_spill] sm:$0xff] }
 0x297   : > { %v1708_v18 = vpop.f32.mrf.mxu1  ;;  %v1382_v42 = vadd.f32 %v8015_v57, %v6365_v20 }
 0x298   : > { %v1930_v32 = vmax.f32 %v1705_v56, 0.0  ;;  %v1709_v35 = vadd.f32 %v1708_v18, %v1356_v3  ;;  %v2025_v0 = vpack.c.bf16 %v1929_v59, %v1927_v16 }
 0x299   : > { %v1710_v63 = vpop.f32.mrf.mxu1 }
 0x29a   : > { %v2026_v24 = vpack.c.bf16 %v1930_v32, %v1928_v2  ;;  %v1711_v52 = vadd.f32 %v1710_v63, %v1358_v53  ;;  %v1931_v11 = vmax.f32 %v1709_v35, 0.0  ;;  %v8016_v2 = vld [vmem:[#allocation26_spill] sm:$0xff]  ;;  %v8017_v53 = vld [vmem:[#allocation27_spill] sm:$0xff]  ;;  %v8018_v35 = vld [vmem:[#allocation28_spill] sm:$0xff] }
 0x29b   : > { %v1712_v12 = vpop.f32.mrf.mxu1  ;;  %v1386_v32 = vadd.f32 %v8016_v2, %v6361_v19 }
 0x29c   : > { %v1713_v5 = vadd.f32 %v1712_v12, %v1360_v10  ;;  %2445 = vmatprep.mubr.bf16.mxu0 %v2026_v24  ;;  %v1932_v37 = vmax.f32 %v1711_v52, 0.0  ;;  %v1388_v10 = vadd.f32 %v8017_v53, %v6365_v20  ;;  %v1390_v24 = vadd.f32 %v8018_v35, %v6361_v19  ;;  %v8019_v52 = vld [vmem:[#allocation29_spill] sm:$0xff] }
 0x29d   : > { %v1714_v9 = vpop.f32.mrf.mxu1  ;;  %2446 = vmatmul.mubr.bf16.gmra.mxu0 %v2025_v0 }
 0x29e   : > { %v1933_v29 = vmax.f32 %v1713_v5, 0.0  ;;  %v1715_v26 = vadd.f32 %v1714_v9, %v1362_v23  ;;  %v1392_v5 = vadd.f32 %v8019_v52, %v6365_v20 }
 0x29f   : > { %v1718_v4 = vpop.f32.mrf.mxu1 }
 0x2a0   : > { %v2027_v40 = vpack.c.bf16 %v1933_v29, %v1931_v11  ;;  %v1934_v45 = vmax.f32 %v1715_v26, 0.0  ;;  %v1719_v55 = vadd.f32 %v1718_v4, %v1366_v30 }
 0x2a1   : > { %v1720_v47 = vpop.f32.mrf.mxu1 }
 0x2a2   : > { %v2028_v61 = vpack.c.bf16 %v1934_v45, %v1932_v37  ;;  %v1721_v28 = vadd.f32 %v1720_v47, %v1368_v34  ;;  %v1935_v21 = vmax.f32 %v1719_v55, 0.0  ;;  %v8021_v55 = vld [vmem:[#allocation31_spill] sm:$0xff] }
 0x2a3   : > { %v1722_v48 = vpop.f32.mrf.mxu1 }
 0x2a4   : > { %v1723_v1 = vadd.f32 %v1722_v48, %v1370_v17  ;;  %2455 = vmatprep.mubr.bf16.mxu0 %v2028_v61  ;;  %v1936_v50 = vmax.f32 %v1721_v28, 0.0  ;;  %v1398_v61 = vadd.f32 %v8021_v55, %v6365_v20  ;;  %v8022_v48 = vld [vmem:[#allocation32_spill] sm:$0xff] }
 0x2a5   : > { %v1724_v36 = vpop.f32.mrf.mxu1  ;;  %2456 = vmatmul.mubr.bf16.gmra.mxu0 %v2027_v40  ;;  %v8020_v40 = vld [vmem:[#allocation30_spill] sm:$0xff]  ;;  %v1400_v7 = vadd.f32 %v8022_v48, %v6361_v19 }
 0x2a6   : > { %v1937_v33 = vmax.f32 %v1723_v1, 0.0  ;;  %v1725_v25 = vadd.f32 %v1724_v36, %v1372_v54  ;;  %v1396_v45 = vadd.f32 %v8020_v40, %v6361_v19  ;;  %v8023_v36 = vld [vmem:[#allocation33_spill] sm:$0xff] }
 0x2a7   : > { %v1728_v62 = vpop.f32.mrf.mxu1 }
 0x2a8   : > { %v2029_v15 = vpack.c.bf16 %v1937_v33, %v1935_v21  ;;  %v1938_v51 = vmax.f32 %v1725_v25, 0.0  ;;  %v1729_v58 = vadd.f32 %v1728_v62, %v1376_v13  ;;  %v1402_v21 = vadd.f32 %v8023_v36, %v6365_v20 }
 0x2a9   : > { %v1730_v27 = vpop.f32.mrf.mxu1 }
 0x2aa   : > { %v2030_v31 = vpack.c.bf16 %v1938_v51, %v1936_v50  ;;  %v1731_v14 = vadd.f32 %v1730_v27, %v1378_v38  ;;  %v1939_v56 = vmax.f32 %v1729_v58, 0.0  ;;  %v8024_v51 = vld [vmem:[#allocation34_spill] sm:$0xff]  ;;  %v8025_v58 = vld [vmem:[#allocation35_spill] sm:$0xff] }
 0x2ab   : > { %v1732_v43 = vpop.f32.mrf.mxu1  ;;  %v1406_v27 = vadd.f32 %v8024_v51, %v6361_v19 }
 0x2ac   : > { %v1733_v60 = vadd.f32 %v1732_v43, %v1380_v6  ;;  %2465 = vmatprep.mubr.bf16.mxu0 %v2030_v31  ;;  %v1940_v16 = vmax.f32 %v1731_v14, 0.0  ;;  %v1408_v31 = vadd.f32 %v8025_v58, %v6365_v20  ;;  %v8026_v43 = vld [vmem:[#allocation36_spill] sm:$0xff] }
 0x2ad   : > { %v1734_v8 = vpop.f32.mrf.mxu1  ;;  %2466 = vmatmul.mubr.bf16.gmra.mxu0 %v2029_v15  ;;  %v1410_v57 = vadd.f32 %v8026_v43, %v6361_v19 }
 0x2ae   : > { %v1941_v59 = vmax.f32 %v1733_v60, 0.0  ;;  %v1735_v18 = vadd.f32 %v1734_v8, %v1382_v42  ;;  %v8027_v8 = vld [vmem:[#allocation37_spill] sm:$0xff] }
 0x2af   : > { %v1738_v3 = vpop.f32.mrf.mxu1 }
 0x2b0   : > { %v2031_v63 = vpack.c.bf16 %v1941_v59, %v1939_v56  ;;  %v1942_v39 = vmax.f32 %v1735_v18, 0.0  ;;  %v1739_v0 = vadd.f32 %v1738_v3, %v1386_v32  ;;  %v1412_v56 = vadd.f32 %v8027_v8, %v6365_v20 }
 0x2b1   : > { %v1740_v49 = vpop.f32.mrf.mxu1 }
 0x2b2   : > { %v2032_v12 = vpack.c.bf16 %v1942_v39, %v1940_v16  ;;  %v1741_v9 = vadd.f32 %v1740_v49, %v1388_v10  ;;  %v1943_v26 = vmax.f32 %v1739_v0, 0.0  ;;  %v8028_v39 = vld [vmem:[#allocation38_spill] sm:$0xff]  ;;  %v8029_v0 = vld [vmem:[#allocation39_spill] sm:$0xff] }
 0x2b3   : > { %v1742_v23 = vpop.f32.mrf.mxu1  ;;  %v1416_v49 = vadd.f32 %v8028_v39, %v6361_v19 }
 0x2b4   : > { %v1743_v11 = vadd.f32 %v1742_v23, %v1390_v24  ;;  %2475 = vmatprep.mubr.bf16.mxu0 %v2032_v12  ;;  %v1944_v47 = vmax.f32 %v1741_v9, 0.0  ;;  %v1418_v12 = vadd.f32 %v8029_v0, %v6365_v20  ;;  %v8030_v23 = vld [vmem:[#allocation40_spill] sm:$0xff] }
 0x2b5   : > { %v1744_v29 = vpop.f32.mrf.mxu1  ;;  %2476 = vmatmul.mubr.bf16.gmra.mxu0 %v2031_v63  ;;  %v1420_v52 = vadd.f32 %v8030_v23, %v6361_v19 }
 0x2b6   : > { %v1945_v4 = vmax.f32 %v1743_v11, 0.0  ;;  %v1745_v30 = vadd.f32 %v1744_v29, %v1392_v5  ;;  %v8031_v29 = vld [vmem:[#allocation41_spill] sm:$0xff] }
 0x2b7   : > { %v1748_v37 = vpop.f32.mrf.mxu1 }
 0x2b8   : > { %v2033_v34 = vpack.c.bf16 %v1945_v4, %v1943_v26  ;;  %v1946_v46 = vmax.f32 %v1745_v30, 0.0  ;;  %v1749_v54 = vadd.f32 %v1748_v37, %v1396_v45  ;;  %v1422_v26 = vadd.f32 %v8031_v29, %v6365_v20 }
 0x2b9   : > { %v1750_v17 = vpop.f32.mrf.mxu1 }
 0x2ba   : > { %v2034_v28 = vpack.c.bf16 %v1946_v46, %v1944_v47  ;;  %v1751_v33 = vadd.f32 %v1750_v17, %v1398_v61  ;;  %v1947_v41 = vmax.f32 %v1749_v54, 0.0  ;;  %v8032_v46 = vld [vmem:[#allocation42_spill] sm:$0xff]  ;;  %v8033_v54 = vld [vmem:[#allocation43_spill] sm:$0xff] }
 0x2bb   : > { %v1752_v1 = vpop.f32.mrf.mxu1  ;;  %v1426_v17 = vadd.f32 %v8032_v46, %v6361_v19  ;;  %v2091_v46 = vld [vmem:[#allocation10] sm:$0x3] }
 0x2bc   : > { %v1753_v25 = vadd.f32 %v1752_v1, %v1400_v7  ;;  %2485 = vmatprep.mubr.bf16.mxu0 %v2034_v28  ;;  %v1948_v22 = vmax.f32 %v1751_v33, 0.0  ;;  %v1428_v28 = vadd.f32 %v8033_v54, %v6365_v20  ;;  %v8034_v1 = vld [vmem:[#allocation44_spill] sm:$0xff] }
 0x2bd   : > { %v1754_v62 = vpop.f32.mrf.mxu1  ;;  %2486 = vmatmul.mubr.bf16.gmra.mxu0 %v2033_v34  ;;  %v1430_v36 = vadd.f32 %v8034_v1, %v6361_v19  ;;  %v8045_v1 = vld [vmem:[#allocation79_spill] sm:$0xff] }
 0x2be   : > { %v1949_v13 = vmax.f32 %v1753_v25, 0.0  ;;  %v1755_v50 = vadd.f32 %v1754_v62, %v1402_v21  ;;  %v8035_v62 = vld [vmem:[#allocation45_spill] sm:$0xff] }
 0x2bf   : > { %v1758_v15 = vpop.f32.mrf.mxu1 }
 0x2c0   : > { %v2035_v38 = vpack.c.bf16 %v1949_v13, %v1947_v41  ;;  %v1950_v44 = vmax.f32 %v1755_v50, 0.0  ;;  %v1759_v42 = vadd.f32 %v1758_v15, %v1406_v27  ;;  %v1432_v41 = vadd.f32 %v8035_v62, %v6365_v20 }
 0x2c1   : > { %v1760_v6 = vpop.f32.mrf.mxu1 }
 0x2c2   : > { %v2036_v14 = vpack.c.bf16 %v1950_v44, %v1948_v22  ;;  %v1761_v59 = vadd.f32 %v1760_v6, %v1408_v31  ;;  %v1951_v2 = vmax.f32 %v1759_v42, 0.0  ;;  %v8036_v44 = vld [vmem:[#allocation46_spill] sm:$0xff]  ;;  %v8037_v42 = vld [vmem:[#allocation47_spill] sm:$0xff] }
 0x2c3   : > { %v1762_v60 = vpop.f32.mrf.mxu1  ;;  %v1436_v6 = vadd.f32 %v8036_v44, %v6361_v19 }
 0x2c4   : > { %v1763_v18 = vadd.f32 %v1762_v60, %v1410_v57  ;;  %2495 = vmatprep.mubr.bf16.mxu0 %v2036_v14  ;;  %v1952_v53 = vmax.f32 %v1761_v59, 0.0  ;;  %v1438_v14 = vadd.f32 %v8037_v42, %v6365_v20  ;;  %v8038_v60 = vld [vmem:[#allocation48_spill] sm:$0xff]  ;;  %v8049_v42 = vld [vmem:[#allocation57_spill] sm:$0xff] }
 0x2c5   : > { %v1764_v3 = vpop.f32.mrf.mxu1  ;;  %2496 = vmatmul.mubr.bf16.gmra.mxu0 %v2035_v38  ;;  %v1440_v8 = vadd.f32 %v8038_v60, %v6361_v19 }
 0x2c6   : > { %v1953_v32 = vmax.f32 %v1763_v18, 0.0  ;;  %v1765_v16 = vadd.f32 %v1764_v3, %v1412_v56  ;;  %v8039_v3 = vld [vmem:[#allocation49_spill] sm:$0xff] }
 0x2c7   : > { %v1768_v63 = vpop.f32.mrf.mxu1 }
 0x2c8   : > { %v2037_v10 = vpack.c.bf16 %v1953_v32, %v1951_v2  ;;  %v1954_v35 = vmax.f32 %v1765_v16, 0.0  ;;  %v1769_v5 = vadd.f32 %v1768_v63, %v1416_v49  ;;  %v1442_v2 = vadd.f32 %v8039_v3, %v6365_v20 }
 0x2c9   : > { %v1770_v24 = vpop.f32.mrf.mxu1 }
 0x2ca   : > { %v2038_v9 = vpack.c.bf16 %v1954_v35, %v1952_v53  ;;  %v1771_v4 = vadd.f32 %v1770_v24, %v1418_v12  ;;  %v1955_v40 = vmax.f32 %v1769_v5, 0.0  ;;  %v8040_v35 = vld [vmem:[#allocation50_spill] sm:$0xff]  ;;  %v8041_v5 = vld [vmem:[#allocation51_spill] sm:$0xff] }
 0x2cb   : > { %v1772_v11 = vpop.f32.mrf.mxu1  ;;  %v1446_v24 = vadd.f32 %v8040_v35, %v6361_v19 }
 0x2cc   : > { %v1773_v30 = vadd.f32 %v1772_v11, %v1420_v52  ;;  %2505 = vmatprep.mubr.bf16.mxu0 %v2038_v9  ;;  %v1956_v55 = vmax.f32 %v1771_v4, 0.0  ;;  %v1448_v9 = vadd.f32 %v8041_v5, %v6365_v20  ;;  %v8042_v11 = vld [vmem:[#allocation52_spill] sm:$0xff] }
 0x2cd   : > { %v1774_v37 = vpop.f32.mrf.mxu1  ;;  %2506 = vmatmul.mubr.bf16.gmra.mxu0 %v2037_v10  ;;  %v1450_v29 = vadd.f32 %v8042_v11, %v6361_v19 }
 0x2ce   : > { %v1957_v45 = vmax.f32 %v1773_v30, 0.0  ;;  %v1775_v47 = vadd.f32 %v1774_v37, %v1422_v26  ;;  %v8043_v37 = vld [vmem:[#allocation53_spill] sm:$0xff] }
 0x2cf   : > { %v1778_v34 = vpop.f32.mrf.mxu1 }
 0x2d0   : > { %v2039_v61 = vpack.c.bf16 %v1957_v45, %v1955_v40  ;;  %v1958_v48 = vmax.f32 %v1775_v47, 0.0  ;;  %v1779_v21 = vadd.f32 %v1778_v34, %v1426_v17  ;;  %v1452_v40 = vadd.f32 %v8043_v37, %v6365_v20 }
 0x2d1   : > { %v1780_v7 = vpop.f32.mrf.mxu1 }
 0x2d2   : > { %v2040_v33 = vpack.c.bf16 %v1958_v48, %v1956_v55  ;;  %v1781_v13 = vadd.f32 %v1780_v7, %v1428_v28  ;;  %v1959_v51 = vmax.f32 %v1779_v21, 0.0  ;;  %v8044_v7 = vld [vmem:[#allocation54_spill] sm:$0xff] }
 0x2d3   : > { %v1782_v25 = vpop.f32.mrf.mxu1  ;;  %v1456_v54 = vadd.f32 %v8044_v7, %v6361_v19 }
 0x2d4   : > { %v1783_v50 = vadd.f32 %v1782_v25, %v1430_v36  ;;  %2515 = vmatprep.mubr.bf16.mxu0 %v2040_v33  ;;  %v1960_v58 = vmax.f32 %v1781_v13, 0.0  ;;  %v6638_v36 = vrot.slane %v2091_v46, %v8045_v1 }
 0x2d5   : > { %v1784_v15 = vpop.f32.mrf.mxu1  ;;  %2516 = vmatmul.mubr.bf16.gmra.mxu0 %v2039_v61 }
 0x2d6   : > { %v1961_v27 = vmax.f32 %v1783_v50, 0.0  ;;  %v1785_v22 = vadd.f32 %v1784_v15, %v1432_v41  ;;  %v8046_v41 = vld [vmem:[#allocation77_spill] sm:$0xff] }
 0x2d7   : > { %v1788_v38 = vpop.f32.mrf.mxu1  ;;  %v6641_v13 = vrot.slane %v2091_v46, %v8046_v41 }
 0x2d8   : > { %v2041_v31 = vpack.c.bf16 %v1961_v27, %v1959_v51  ;;  %v1962_v43 = vmax.f32 %v1785_v22, 0.0  ;;  %v1789_v56 = vadd.f32 %v1788_v38, %v1436_v6  ;;  %v8047_v27 = vld [vmem:[#allocation56_spill] sm:$0xff]  ;;  %v8048_v6 = vld [vmem:[#allocation55_spill] sm:$0xff] }
 0x2d9   : > { %v1790_v57 = vpop.f32.mrf.mxu1  ;;  %v1460_v22 = vadd.f32 %v8047_v27, %v6361_v19  ;;  %v8054_v27 = vld [vmem:[#allocation62_spill] sm:$0xff] }
 0x2da   : > { %v2042_v59 = vpack.c.bf16 %v1962_v43, %v1960_v58  ;;  %v1791_v32 = vadd.f32 %v1790_v57, %v1438_v14  ;;  %v1963_v39 = vmax.f32 %v1789_v56, 0.0  ;;  %v1458_v58 = vadd.f32 %v8048_v6, %v6365_v20 }
 0x2db   : > { %v1792_v18 = vpop.f32.mrf.mxu1  ;;  %v1462_v14 = vadd.f32 %v8049_v42, %v6365_v20 }
 0x2dc   : > { %v1793_v16 = vadd.f32 %v1792_v18, %v1440_v8  ;;  %2525 = vmatprep.mubr.bf16.mxu0 %v2042_v59  ;;  %v1964_v0 = vmax.f32 %v1791_v32, 0.0 }
 0x2dd   : > { %v1794_v63 = vpop.f32.mrf.mxu1  ;;  %2526 = vmatmul.mubr.bf16.gmra.mxu0 %v2041_v31 }
 0x2de   : > { %v1965_v49 = vmax.f32 %v1793_v16, 0.0  ;;  %v1795_v53 = vadd.f32 %v1794_v63, %v1442_v2 }
 0x2df   : > { %v1798_v10 = vpop.f32.mrf.mxu1 }
 0x2e0   : > { %v2043_v12 = vpack.c.bf16 %v1965_v49, %v1963_v39  ;;  %v1966_v23 = vmax.f32 %v1795_v53, 0.0  ;;  %v1799_v26 = vadd.f32 %v1798_v10, %v1446_v24  ;;  %v8050_v49 = vld [vmem:[#allocation58_spill] sm:$0xff] }
 0x2e1   : > { %v1800_v52 = vpop.f32.mrf.mxu1  ;;  %v1466_v53 = vadd.f32 %v8050_v49, %v6361_v19 }
 0x2e2   : > { %v2044_v4 = vpack.c.bf16 %v1966_v23, %v1964_v0  ;;  %v1801_v45 = vadd.f32 %v1800_v52, %v1448_v9  ;;  %v1967_v55 = vmax.f32 %v1799_v26, 0.0  ;;  %v8051_v26 = vld [vmem:[#allocation60_spill] sm:$0xff] }
 0x2e3   : > { %v1802_v30 = vpop.f32.mrf.mxu1 }
 0x2e4   : > { %v1803_v47 = vadd.f32 %v1802_v30, %v1450_v29  ;;  %2535 = vmatprep.mubr.bf16.mxu0 %v2044_v4  ;;  %v1968_v33 = vmax.f32 %v1801_v45, 0.0  ;;  %v1470_v4 = vadd.f32 %v8051_v26, %v6361_v19 }
 0x2e5   : > { %v1804_v34 = vpop.f32.mrf.mxu1  ;;  %v2297_v17 = vpop.f32.mrf.mxu0  ;;  %2536 = vmatmul.mubr.bf16.gmra.mxu0 %v2043_v12 }
 0x2e6   : > { %v1969_v61 = vmax.f32 %v1803_v47, 0.0  ;;  %v1805_v48 = vadd.f32 %v1804_v34, %v1452_v40  ;;  %v2298_v60 = vadd.f32 %v2297_v17, %v6641_v13  ;;  %v8052_v40 = vld [vmem:[#allocation59_spill] sm:$0xff] }
 0x2e7   : > { %v1808_v28 = vpop.f32.mrf.mxu1  ;;  %v2299_v21 = vpop.f32.mrf.mxu0  ;;  %v1468_v45 = vadd.f32 %v8052_v40, %v6365_v20 }
 0x2e8   : > { %v2045_v25 = vpack.c.bf16 %v1969_v61, %v1967_v55  ;;  %v1970_v62 = vmax.f32 %v1805_v48, 0.0  ;;  %v1809_v50 = vadd.f32 %v1808_v28, %v1456_v54  ;;  %v2300_v31 = vadd.f32 %v2299_v21, %v6638_v36  ;;  %v8053_v55 = vld [vmem:[#allocation61_spill] sm:$0xff] }
 0x2e9   : > { %v1810_v15 = vpop.f32.mrf.mxu1  ;;  %v2301_v51 = vpop.f32.mrf.mxu0  ;;  %v2616_v0 = vmax.f32 %v2298_v60, 0.0  ;;  %v1472_v61 = vadd.f32 %v8053_v55, %v6365_v20 }
 0x2ea   : > { %v2302_v38 = vadd.f32 %v2301_v51, %v6641_v13  ;;  %v2046_v44 = vpack.c.bf16 %v1970_v62, %v1968_v33  ;;  %v1971_v59 = vmax.f32 %v1809_v50, 0.0  ;;  %v1811_v18 = vadd.f32 %v1810_v15, %v1458_v58 }
 0x2eb   : > { %v1812_v43 = vpop.f32.mrf.mxu1  ;;  %v2303_v57 = vpop.f32.mrf.mxu0  ;;  %v2617_v10 = vmax.f32 %v2300_v31, 0.0 }
 0x2ec   : > { %v1813_v8 = vadd.f32 %v1812_v43, %v1460_v22  ;;  %v2304_v56 = vadd.f32 %v2303_v57, %v6638_v36  ;;  %2545 = vmatprep.mubr.bf16.mxu0 %v2046_v44  ;;  %v2618_v32 = vmax.f32 %v2302_v38, 0.0  ;;  %v1972_v52 = vmax.f32 %v1811_v18, 0.0 }
 0x2ed   : > { %v1814_v3 = vpop.f32.mrf.mxu1  ;;  %v2307_v2 = vpop.f32.mrf.mxu0  ;;  %2546 = vmatmul.mubr.bf16.gmra.mxu0 %v2045_v25  ;;  %v1476_v22 = vadd.f32 %v8054_v27, %v6361_v19 }
 0x2ee   : > { %v1973_v16 = vmax.f32 %v1813_v8, 0.0  ;;  %v2619_v63 = vmax.f32 %v2304_v56, 0.0  ;;  %v1815_v39 = vadd.f32 %v1814_v3, %v1462_v14  ;;  %v6659_v30 = vpack.c.bf16 %v2618_v32, %v2616_v0  ;;  %v8055_v56 = vld [vmem:[#allocation64_spill] sm:$0xff] }
 0x2ef   : > { %v1818_v35 = vpop.f32.mrf.mxu1  ;;  %v2309_v24 = vpop.f32.mrf.mxu0  ;;  %v2308_v48 = vadd.f32 %v2307_v2, %v6641_v13  ;;  %v8056_v2 = vld [vmem:[#allocation63_spill] sm:$0xff] }
 0x2f0   : > { %v2047_v12 = vpack.c.bf16 %v1973_v16, %v1971_v59  ;;  %v1974_v23 = vmax.f32 %v1815_v39, 0.0  ;;  %v1819_v5 = vadd.f32 %v1818_v35, %v1466_v53  ;;  %v6655_v29 = vpack.c.bf16 %v2619_v63, %v2617_v10  ;;  %v8057_v53 = vld [vmem:[#allocation65_spill] sm:$0xff] }
 0x2f1   : > { %v1820_v9 = vpop.f32.mrf.mxu1  ;;  %v2311_v11 = vpop.f32.mrf.mxu0  ;;  %v2310_v47 = vadd.f32 %v2309_v24, %v6638_v36  ;;  %v2620_v58 = vmax.f32 %v2308_v48, 0.0  ;;  %v1480_v59 = vadd.f32 %v8055_v56, %v6361_v19  ;;  %v1478_v32 = vadd.f32 %v8056_v2, %v6365_v20 }
 0x2f2   : > { %v2312_v37 = vadd.f32 %v2311_v11, %v6641_v13  ;;  %3246 = vmatprep.mubr.bf16.mxu1 %v6655_v29  ;;  %v2048_v17 = vpack.c.bf16 %v1974_v23, %v1972_v52  ;;  %v1975_v28 = vmax.f32 %v1819_v5, 0.0  ;;  %v1821_v21 = vadd.f32 %v1820_v9, %v1468_v45 }
 0x2f3   : > { %v1822_v34 = vpop.f32.mrf.mxu1  ;;  %v2313_v46 = vpop.f32.mrf.mxu0  ;;  %3247 = vmatmul.mubr.bf16.vlgmr.msra.gmra.mxu1 %v6659_v30  ;;  %v2621_v38 = vmax.f32 %v2310_v47, 0.0  ;;  %v1482_v10 = vadd.f32 %v8057_v53, %v6365_v20 }
 0x2f4   : > { %v1823_v7 = vadd.f32 %v1822_v34, %v1470_v4  ;;  %v2314_v54 = vadd.f32 %v2313_v46, %v6638_v36  ;;  %2555 = vmatprep.mubr.bf16.mxu0 %v2048_v17  ;;  %v2622_v62 = vmax.f32 %v2312_v37, 0.0  ;;  %v1976_v57 = vmax.f32 %v1821_v21, 0.0  ;;  %v8058_v37 = vld [vmem:[#allocation66_spill] sm:$0xff]  ;;  %v8059_v21 = vld [vmem:[#allocation68_spill] sm:$0xff] }
 0x2f5   : > { %v1824_v33 = vpop.f32.mrf.mxu1  ;;  %v2317_v25 = vpop.f32.mrf.mxu0  ;;  %2556 = vmatmul.mubr.bf16.gmra.mxu0 %v2047_v12  ;;  %v1486_v40 = vadd.f32 %v8058_v37, %v6361_v19 }
 0x2f6   : > { %v1977_v50 = vmax.f32 %v1823_v7, 0.0  ;;  %v2623_v15 = vmax.f32 %v2314_v54, 0.0  ;;  %v1825_v51 = vadd.f32 %v1824_v33, %v1472_v61  ;;  %v6677_v18 = vpack.c.bf16 %v2622_v62, %v2620_v58 }
 0x2f7   : > { %v1828_v44 = vpop.f32.mrf.mxu1  ;;  %v2319_v6 = vpop.f32.mrf.mxu0  ;;  %v2318_v35 = vadd.f32 %v2317_v25, %v6641_v13  ;;  %v1490_v33 = vadd.f32 %v8059_v21, %v6361_v19 }
 0x2f8   : > { %v2049_v31 = vpack.c.bf16 %v1977_v50, %v1975_v28  ;;  %v1978_v43 = vmax.f32 %v1825_v51, 0.0  ;;  %v1829_v42 = vadd.f32 %v1828_v44, %v1476_v22  ;;  %v6673_v8 = vpack.c.bf16 %v2623_v15, %v2621_v38  ;;  %v8060_v50 = vld [vmem:[#allocation67_spill] sm:$0xff]  ;;  %v8061_v44 = vld [vmem:[#allocation69_spill] sm:$0xff] }
 0x2f9   : > { %v1830_v14 = vpop.f32.mrf.mxu1  ;;  %v2321_v60 = vpop.f32.mrf.mxu0  ;;  %v2320_v16 = vadd.f32 %v2319_v6, %v6638_v36  ;;  %v2624_v46 = vmax.f32 %v2318_v35, 0.0  ;;  %v1488_v15 = vadd.f32 %v8060_v50, %v6365_v20  ;;  %v1492_v6 = vadd.f32 %v8061_v44, %v6365_v20 }
 0x2fa   : > { %v2322_v3 = vadd.f32 %v2321_v60, %v6641_v13  ;;  %3256 = vmatprep.mubr.bf16.mxu1 %v6673_v8  ;;  %v2050_v49 = vpack.c.bf16 %v1978_v43, %v1976_v57  ;;  %v1979_v12 = vmax.f32 %v1829_v42, 0.0  ;;  %v1831_v23 = vadd.f32 %v1830_v14, %v1478_v32  ;;  %v8062_v32 = vld [vmem:[#allocation70_spill] sm:$0xff] }
 0x2fb   : > { %v1832_v63 = vpop.f32.mrf.mxu1  ;;  %v2323_v39 = vpop.f32.mrf.mxu0  ;;  %3257 = vmatmul.mubr.bf16.gmra.mxu1 %v6677_v18  ;;  %v2625_v45 = vmax.f32 %v2320_v16, 0.0  ;;  %v1496_v16 = vadd.f32 %v8062_v32, %v6361_v19  ;;  %v8068_v32 = vld [vmem:[#allocation78_spill] sm:$0xff] }
 0x2fc   : > { %v1833_v24 = vadd.f32 %v1832_v63, %v1480_v59  ;;  %v2324_v0 = vadd.f32 %v2323_v39, %v6638_v36  ;;  %2565 = vmatprep.mubr.bf16.mxu0 %v2050_v49  ;;  %v2626_v9 = vmax.f32 %v2322_v3, 0.0  ;;  %v1980_v61 = vmax.f32 %v1831_v23, 0.0 }
 0x2fd   : > { %v1834_v52 = vpop.f32.mrf.mxu1  ;;  %v2327_v5 = vpop.f32.mrf.mxu0  ;;  %2566 = vmatmul.mubr.bf16.gmra.mxu0 %v2049_v31 }
 0x2fe   : > { %v1981_v11 = vmax.f32 %v1833_v24, 0.0  ;;  %v2627_v26 = vmax.f32 %v2324_v0, 0.0  ;;  %v1835_v4 = vadd.f32 %v1834_v52, %v1482_v10  ;;  %v6695_v25 = vpack.c.bf16 %v2626_v9, %v2624_v46  ;;  %v8065_v46 = vld [vmem:[#allocation73_spill] sm:$0xff] }
 0x2ff   : > { %v1838_v47 = vpop.f32.mrf.mxu1  ;;  %v2329_v34 = vpop.f32.mrf.mxu0  ;;  %v2328_v58 = vadd.f32 %v2327_v5, %v6641_v13  ;;  %v8063_v5 = vld [vmem:[#allocation72_spill] sm:$0xff] }
 0x300   : > { %v2051_v17 = vpack.c.bf16 %v1981_v11, %v1979_v12  ;;  %v1982_v55 = vmax.f32 %v1835_v4, 0.0  ;;  %v1839_v48 = vadd.f32 %v1838_v47, %v1486_v40  ;;  %v6691_v28 = vpack.c.bf16 %v2627_v26, %v2625_v45  ;;  %v8064_v4 = vld [vmem:[#allocation71_spill] sm:$0xff] }
 0x301   : > { %v1840_v7 = vpop.f32.mrf.mxu1  ;;  %v2331_v54 = vpop.f32.mrf.mxu0  ;;  %v2330_v51 = vadd.f32 %v2329_v34, %v6638_v36  ;;  %v2628_v53 = vmax.f32 %v2328_v58, 0.0  ;;  %v1500_v9 = vadd.f32 %v8063_v5, %v6361_v19  ;;  %v1498_v37 = vadd.f32 %v8064_v4, %v6365_v20 }
 0x302   : > { %v2332_v62 = vadd.f32 %v2331_v54, %v6641_v13  ;;  %3266 = vmatprep.mubr.bf16.mxu1 %v6691_v28  ;;  %v2052_v38 = vpack.c.bf16 %v1982_v55, %v1980_v61  ;;  %v1983_v57 = vmax.f32 %v1839_v48, 0.0  ;;  %v1841_v42 = vadd.f32 %v1840_v7, %v1488_v15 }
 0x303   : > { %v1842_v27 = vpop.f32.mrf.mxu1  ;;  %v2333_v22 = vpop.f32.mrf.mxu0  ;;  %3267 = vmatmul.mubr.bf16.gmra.mxu1 %v6695_v25  ;;  %v2629_v63 = vmax.f32 %v2330_v51, 0.0 }
 0x304   : > { %v1843_v31 = vadd.f32 %v1842_v27, %v1490_v33  ;;  %v2334_v43 = vadd.f32 %v2333_v22, %v6638_v36  ;;  %2575 = vmatprep.mubr.bf16.mxu0 %v2052_v38  ;;  %v2630_v56 = vmax.f32 %v2332_v62, 0.0  ;;  %v1984_v24 = vmax.f32 %v1841_v42, 0.0  ;;  %v8066_v27 = vld [vmem:[#allocation75_spill] sm:$0xff] }
 0x305   : > { %v1844_v14 = vpop.f32.mrf.mxu1  ;;  %v2337_v60 = vpop.f32.mrf.mxu0  ;;  %2576 = vmatmul.mubr.bf16.gmra.mxu0 %v2051_v17  ;;  %v1502_v17 = vadd.f32 %v8065_v46, %v6365_v20  ;;  %v1506_v22 = vadd.f32 %v8066_v27, %v6361_v19 }
 0x306   : > { %v1985_v59 = vmax.f32 %v1843_v31, 0.0  ;;  %v2631_v3 = vmax.f32 %v2334_v43, 0.0  ;;  %v1845_v2 = vadd.f32 %v1844_v14, %v1492_v6  ;;  %v6713_v11 = vpack.c.bf16 %v2630_v56, %v2628_v53 }
 0x307   : > { %v1848_v39 = vpop.f32.mrf.mxu1  ;;  %v2339_v49 = vpop.f32.mrf.mxu0  ;;  %v2338_v55 = vadd.f32 %v2337_v60, %v6641_v13 }
 0x308   : > { %v2053_v10 = vpack.c.bf16 %v1985_v59, %v1983_v57  ;;  %v1986_v35 = vmax.f32 %v1845_v2, 0.0  ;;  %v1849_v0 = vadd.f32 %v1848_v39, %v1496_v16  ;;  %v6709_v52 = vpack.c.bf16 %v2631_v3, %v2629_v63  ;;  %v8067_v3 = vld [vmem:[#allocation76_spill] sm:$0xff] }
 0x309   : > { %v1850_v12 = vpop.f32.mrf.mxu1  ;;  %v2341_v23 = vpop.f32.mrf.mxu0  ;;  %v2340_v40 = vadd.f32 %v2339_v49, %v6638_v36  ;;  %v2632_v58 = vmax.f32 %v2338_v55, 0.0  ;;  %v1508_v2 = vadd.f32 %v8067_v3, %v6365_v20  ;;  %v1510_v16 = vadd.f32 %v8068_v32, %v6361_v19 }
 0x30a   : > { %v2342_v26 = vadd.f32 %v2341_v23, %v6641_v13  ;;  %3276 = vmatprep.mubr.bf16.mxu1 %v6709_v52  ;;  %v2054_v34 = vpack.c.bf16 %v1986_v35, %v1984_v24  ;;  %v1987_v7 = vmax.f32 %v1849_v0, 0.0  ;;  %v1851_v54 = vadd.f32 %v1850_v12, %v1498_v37  ;;  %v8069_v24 = vld [vmem:[#allocation80_spill] sm:$0xff] }
 0x30b   : > { %v1852_v45 = vpop.f32.mrf.mxu1  ;;  %v2343_v47 = vpop.f32.mrf.mxu0  ;;  %3277 = vmatmul.mubr.bf16.gmra.mxu1 %v6713_v11  ;;  %v2633_v38 = vmax.f32 %v2340_v40, 0.0  ;;  %v1512_v0 = vadd.f32 %v8069_v24, %v6365_v20 }
 0x30c   : > { %v1853_v61 = vadd.f32 %v1852_v45, %v1500_v9  ;;  %v2344_v48 = vadd.f32 %v2343_v47, %v6638_v36  ;;  %2585 = vmatprep.mubr.bf16.mxu0 %v2054_v34  ;;  %v2634_v62 = vmax.f32 %v2342_v26, 0.0  ;;  %v1988_v57 = vmax.f32 %v1851_v54, 0.0 }
 0x30d   : > { %v1854_v21 = vpop.f32.mrf.mxu1  ;;  %v2347_v33 = vpop.f32.mrf.mxu0  ;;  %2586 = vmatmul.mubr.bf16.gmra.mxu0 %v2053_v10 }
 0x30e   : > { %v1989_v50 = vmax.f32 %v1853_v61, 0.0  ;;  %v2635_v15 = vmax.f32 %v2344_v48, 0.0  ;;  %v1855_v51 = vadd.f32 %v1854_v21, %v1502_v17  ;;  %v6734_v63 = vpack.c.bf16 %v2634_v62, %v2632_v58 }
 0x30f   : > { %v1858_v44 = vpop.f32.mrf.mxu1  ;;  %v2349_v6 = vpop.f32.mrf.mxu0  ;;  %v2348_v49 = vadd.f32 %v2347_v33, %v6641_v13 }
 0x310   : > { %v2055_v31 = vpack.c.bf16 %v1989_v50, %v1987_v7  ;;  %v1990_v43 = vmax.f32 %v1855_v51, 0.0  ;;  %v1859_v42 = vadd.f32 %v1858_v44, %v1506_v22  ;;  %v2350_v14 = vadd.f32 %v2349_v6, %v6638_v36 }
 0x311   : > { %v1860_v60 = vpop.f32.mrf.mxu1  ;;  %v2351_v56 = vpop.f32.mrf.mxu0  ;;  %v6728_v59 = vpack.c.bf16 %v2635_v15, %v2633_v38  ;;  %v2636_v34 = vmax.f32 %v2348_v49, 0.0 }
 0x312   : > { %v2352_v39 = vadd.f32 %v2351_v56, %v6641_v13  ;;  %v2056_v35 = vpack.c.bf16 %v1990_v43, %v1988_v57  ;;  %v1861_v12 = vadd.f32 %v1860_v60, %v1508_v2  ;;  %v1991_v19 = vmax.f32 %v1859_v42, 0.0 }
 0x313   : > { %3286 = vmatprep.mubr.bf16.mxu1 %v6728_v59  ;;  %v1862_v53 = vpop.f32.mrf.mxu1  ;;  %v2353_v10 = vpop.f32.mrf.mxu0  ;;  %v2637_v9 = vmax.f32 %v2350_v14, 0.0 }
 0x314   : > { %v1863_v23 = vadd.f32 %v1862_v53, %v1510_v16  ;;  %v2354_v5 = vadd.f32 %v2353_v10, %v6638_v36  ;;  %3287 = vmatmul.mubr.bf16.gmra.mxu1 %v6734_v63  ;;  %2595 = vmatprep.mubr.bf16.mxu0 %v2056_v35  ;;  %v2638_v37 = vmax.f32 %v2352_v39, 0.0  ;;  %v1992_v17 = vmax.f32 %v1861_v12, 0.0 }
 0x315   : > { %v1864_v26 = vpop.f32.mrf.mxu1  ;;  %v2357_v4 = vpop.f32.mrf.mxu0  ;;  %2596 = vmatmul.mubr.bf16.gmra.mxu0 %v2055_v31 }
 0x316   : > { %v1993_v40 = vmax.f32 %v1863_v23, 0.0  ;;  %v2639_v45 = vmax.f32 %v2354_v5, 0.0  ;;  %v1865_v47 = vadd.f32 %v1864_v26, %v1512_v0  ;;  %v6745_v7 = vpack.c.bf16 %v2638_v37, %v2636_v34 }
 0x317   : > { %v2359_v46 = vpop.f32.mrf.mxu0  ;;  %v2358_v50 = vadd.f32 %v2357_v4, %v6641_v13 }
 0x318   : > { %v2057_v20 = vpack.c.bf16 %v1993_v40, %v1991_v19  ;;  %v1994_v55 = vmax.f32 %v1865_v47, 0.0  ;;  %v6743_v61 = vpack.c.bf16 %v2639_v45, %v2637_v9  ;;  %v2360_v54 = vadd.f32 %v2359_v46, %v6638_v36 }
 0x319   : > { %v2361_v48 = vpop.f32.mrf.mxu0  ;;  %v2640_v6 = vmax.f32 %v2358_v50, 0.0 }
 0x31a   : > { %v2362_v21 = vadd.f32 %v2361_v48, %v6641_v13  ;;  %3296 = vmatprep.mubr.bf16.mxu1 %v6743_v61  ;;  %v2058_v33 = vpack.c.bf16 %v1994_v55, %v1992_v17  ;;  %v2641_v27 = vmax.f32 %v2360_v54, 0.0 }
 0x31b   : > { %v2363_v62 = vpop.f32.mrf.mxu0 }
 0x31c   : > { %v2364_v15 = vadd.f32 %v2363_v62, %v6638_v36  ;;  %3297 = vmatmul.mubr.bf16.gmra.mxu1 %v6745_v7  ;;  %2605 = vmatprep.mubr.bf16.mxu0 %v2058_v33  ;;  %v2642_v22 = vmax.f32 %v2362_v21, 0.0 }
 0x31d   : > { %v2367_v51 = vpop.f32.mrf.mxu0  ;;  %2606 = vmatmul.mubr.bf16.gmra.mxu0 %v2057_v20 }
 0x31e   : > { %v2643_v38 = vmax.f32 %v2364_v15, 0.0  ;;  %3599 = vmatprep.mubr.bf16.mxu0 %v6655_v29  ;;  %v6756_v43 = vpack.c.bf16 %v2642_v22, %v2640_v6  ;;  %v2368_v60 = vadd.f32 %v2367_v51, %v6641_v13 }
 0x31f   : > { %v2369_v44 = vpop.f32.mrf.mxu0 }
 0x320   : > { %v6754_v58 = vpack.c.bf16 %v2643_v38, %v2641_v27  ;;  %v2370_v57 = vadd.f32 %v2369_v44, %v6638_v36  ;;  %v2644_v39 = vmax.f32 %v2368_v60, 0.0 }
 0x321   : > { %v2371_v31 = vpop.f32.mrf.mxu0 }
 0x322   : > { %v2372_v42 = vadd.f32 %v2371_v31, %v6641_v13  ;;  %3306 = vmatprep.mubr.bf16.mxu1 %v6754_v58  ;;  %v2645_v3 = vmax.f32 %v2370_v57, 0.0 }
 0x323   : > { %v2373_v14 = vpop.f32.mrf.mxu0 }
 0x324   : > { %v2374_v56 = vadd.f32 %v2373_v14, %v6638_v36  ;;  %3307 = vmatmul.mubr.bf16.gmra.mxu1 %v6756_v43  ;;  %v2646_v2 = vmax.f32 %v2372_v42, 0.0 }
 0x325   : > { %v2377_v29 = vpop.f32.mrf.mxu0  ;;  %3600 = vmatmul.mubr.bf16.vlgmr.msra.gmra.mxu0 %v6659_v30 }
 0x326   : > { %v2647_v32 = vmax.f32 %v2374_v56, 0.0  ;;  %3609 = vmatprep.mubr.bf16.mxu0 %v6673_v8  ;;  %v6768_v10 = vpack.c.bf16 %v2646_v2, %v2644_v39  ;;  %v2378_v12 = vadd.f32 %v2377_v29, %v6641_v13 }
 0x327   : > { %v2379_v16 = vpop.f32.mrf.mxu0 }
 0x328   : > { %v6766_v49 = vpack.c.bf16 %v2647_v32, %v2645_v3  ;;  %v2380_v35 = vadd.f32 %v2379_v16, %v6638_v36  ;;  %v2648_v26 = vmax.f32 %v2378_v12, 0.0 }
 0x329   : > { %v2381_v53 = vpop.f32.mrf.mxu0 }
 0x32a   : > { %v2382_v24 = vadd.f32 %v2381_v53, %v6641_v13  ;;  %3316 = vmatprep.mubr.bf16.mxu1 %v6766_v49  ;;  %v2649_v23 = vmax.f32 %v2380_v35, 0.0 }
 0x32b   : > { %v2383_v0 = vpop.f32.mrf.mxu0 }
 0x32c   : > { %v2384_v30 = vadd.f32 %v2383_v0, %v6638_v36  ;;  %3317 = vmatmul.mubr.bf16.gmra.mxu1 %v6768_v10  ;;  %v2650_v5 = vmax.f32 %v2382_v24, 0.0 }
 0x32d   : > { %v2387_v8 = vpop.f32.mrf.mxu0  ;;  %3610 = vmatmul.mubr.bf16.gmra.mxu0 %v6677_v18 }
 0x32e   : > { %v2651_v19 = vmax.f32 %v2384_v30, 0.0  ;;  %3619 = vmatprep.mubr.bf16.mxu0 %v6691_v28  ;;  %v6780_v40 = vpack.c.bf16 %v2650_v5, %v2648_v26  ;;  %v2388_v46 = vadd.f32 %v2387_v8, %v6641_v13 }
 0x32f   : > { %v2389_v9 = vpop.f32.mrf.mxu0 }
 0x330   : > { %v6778_v4 = vpack.c.bf16 %v2651_v19, %v2649_v23  ;;  %v2390_v45 = vadd.f32 %v2389_v9, %v6638_v36  ;;  %v2652_v54 = vmax.f32 %v2388_v46, 0.0 }
 0x331   : > { %v2391_v37 = vpop.f32.mrf.mxu0 }
 0x332   : > { %v2392_v47 = vadd.f32 %v2391_v37, %v6641_v13  ;;  %3326 = vmatprep.mubr.bf16.mxu1 %v6778_v4  ;;  %v2653_v17 = vmax.f32 %v2390_v45, 0.0 }
 0x333   : > { %v2393_v34 = vpop.f32.mrf.mxu0 }
 0x334   : > { %v2394_v18 = vadd.f32 %v2393_v34, %v6638_v36  ;;  %3327 = vmatmul.mubr.bf16.gmra.mxu1 %v6780_v40  ;;  %v2654_v20 = vmax.f32 %v2392_v47, 0.0 }
 0x335   : > { %v2397_v28 = vpop.f32.mrf.mxu0  ;;  %3620 = vmatmul.mubr.bf16.gmra.mxu0 %v6695_v25 }
 0x336   : > { %v2655_v55 = vmax.f32 %v2394_v18, 0.0  ;;  %3629 = vmatprep.mubr.bf16.mxu0 %v6709_v52  ;;  %v6792_v62 = vpack.c.bf16 %v2654_v20, %v2652_v54  ;;  %v2398_v27 = vadd.f32 %v2397_v28, %v6641_v13 }
 0x337   : > { %v2399_v48 = vpop.f32.mrf.mxu0 }
 0x338   : > { %v6790_v21 = vpack.c.bf16 %v2655_v55, %v2653_v17  ;;  %v2400_v50 = vadd.f32 %v2399_v48, %v6638_v36  ;;  %v2656_v31 = vmax.f32 %v2398_v27, 0.0 }
 0x339   : > { %v2401_v33 = vpop.f32.mrf.mxu0 }
 0x33a   : > { %v2402_v15 = vadd.f32 %v2401_v33, %v6641_v13  ;;  %3336 = vmatprep.mubr.bf16.mxu1 %v6790_v21  ;;  %v2657_v22 = vmax.f32 %v2400_v50, 0.0 }
 0x33b   : > { %v2403_v51 = vpop.f32.mrf.mxu0 }
 0x33c   : > { %v2404_v25 = vadd.f32 %v2403_v51, %v6638_v36  ;;  %3337 = vmatmul.mubr.bf16.gmra.mxu1 %v6792_v62  ;;  %v2658_v38 = vmax.f32 %v2402_v15, 0.0 }
 0x33d   : > { %v2407_v52 = vpop.f32.mrf.mxu0  ;;  %3630 = vmatmul.mubr.bf16.gmra.mxu0 %v6713_v11 }
 0x33e   : > { %v2659_v44 = vmax.f32 %v2404_v25, 0.0  ;;  %3639 = vmatprep.mubr.bf16.mxu0 %v6728_v59  ;;  %v6804_v14 = vpack.c.bf16 %v2658_v38, %v2656_v31  ;;  %v2408_v3 = vadd.f32 %v2407_v52, %v6641_v13 }
 0x33f   : > { %v2409_v6 = vpop.f32.mrf.mxu0 }
 0x340   : > { %v6802_v57 = vpack.c.bf16 %v2659_v44, %v2657_v22  ;;  %v2410_v60 = vadd.f32 %v2409_v6, %v6638_v36  ;;  %v2660_v53 = vmax.f32 %v2408_v3, 0.0 }
 0x341   : > { %v2411_v42 = vpop.f32.mrf.mxu0 }
 0x342   : > { %v2412_v56 = vadd.f32 %v2411_v42, %v6641_v13  ;;  %3346 = vmatprep.mubr.bf16.mxu1 %v6802_v57  ;;  %v2661_v2 = vmax.f32 %v2410_v60, 0.0 }
 0x343   : > { %v2413_v29 = vpop.f32.mrf.mxu0 }
 0x344   : > { %v2414_v11 = vadd.f32 %v2413_v29, %v6638_v36  ;;  %3347 = vmatmul.mubr.bf16.gmra.mxu1 %v6804_v14  ;;  %v2662_v32 = vmax.f32 %v2412_v56, 0.0 }
 0x345   : > { %v2417_v59 = vpop.f32.mrf.mxu0  ;;  %3640 = vmatmul.mubr.bf16.gmra.mxu0 %v6734_v63 }
 0x346   : > { %v2663_v16 = vmax.f32 %v2414_v11, 0.0  ;;  %3649 = vmatprep.mubr.bf16.mxu0 %v6743_v61  ;;  %v6816_v0 = vpack.c.bf16 %v2662_v32, %v2660_v53  ;;  %v2418_v23 = vadd.f32 %v2417_v59, %v6641_v13 }
 0x347   : > { %v2419_v39 = vpop.f32.mrf.mxu0 }
 0x348   : > { %v6814_v35 = vpack.c.bf16 %v2663_v16, %v2661_v2  ;;  %v2420_v12 = vadd.f32 %v2419_v39, %v6638_v36  ;;  %v2664_v37 = vmax.f32 %v2418_v23, 0.0 }
 0x349   : > { %v2421_v24 = vpop.f32.mrf.mxu0 }
 0x34a   : > { %v2422_v30 = vadd.f32 %v2421_v24, %v6641_v13  ;;  %3356 = vmatprep.mubr.bf16.mxu1 %v6814_v35  ;;  %v2665_v5 = vmax.f32 %v2420_v12, 0.0 }
 0x34b   : > { %v2423_v8 = vpop.f32.mrf.mxu0 }
 0x34c   : > { %v2424_v63 = vadd.f32 %v2423_v8, %v6638_v36  ;;  %3357 = vmatmul.mubr.bf16.gmra.mxu1 %v6816_v0  ;;  %v2666_v19 = vmax.f32 %v2422_v30, 0.0 }
 0x34d   : > { %v2427_v61 = vpop.f32.mrf.mxu0  ;;  %3650 = vmatmul.mubr.bf16.gmra.mxu0 %v6745_v7 }
 0x34e   : > { %v2667_v9 = vmax.f32 %v2424_v63, 0.0  ;;  %3659 = vmatprep.mubr.bf16.mxu0 %v6754_v58  ;;  %v6828_v34 = vpack.c.bf16 %v2666_v19, %v2664_v37  ;;  %v2428_v17 = vadd.f32 %v2427_v61, %v6641_v13 }
 0x34f   : > { %v2429_v26 = vpop.f32.mrf.mxu0 }
 0x350   : > { %v6826_v45 = vpack.c.bf16 %v2667_v9, %v2665_v5  ;;  %v2430_v46 = vadd.f32 %v2429_v26, %v6638_v36  ;;  %v2668_v33 = vmax.f32 %v2428_v17, 0.0 }
 0x351   : > { %v2431_v47 = vpop.f32.mrf.mxu0 }
 0x352   : > { %v2432_v18 = vadd.f32 %v2431_v47, %v6641_v13  ;;  %3366 = vmatprep.mubr.bf16.mxu1 %v6826_v45  ;;  %v2669_v20 = vmax.f32 %v2430_v46, 0.0 }
 0x353   : > { %v2433_v28 = vpop.f32.mrf.mxu0 }
 0x354   : > { %v2434_v7 = vadd.f32 %v2433_v28, %v6638_v36  ;;  %3367 = vmatmul.mubr.bf16.gmra.mxu1 %v6828_v34  ;;  %v2670_v55 = vmax.f32 %v2432_v18, 0.0 }
 0x355   : > { %v2437_v58 = vpop.f32.mrf.mxu0  ;;  %3660 = vmatmul.mubr.bf16.gmra.mxu0 %v6756_v43 }
 0x356   : > { %v2671_v48 = vmax.f32 %v2434_v7, 0.0  ;;  %3669 = vmatprep.mubr.bf16.mxu0 %v6766_v49  ;;  %v6840_v51 = vpack.c.bf16 %v2670_v55, %v2668_v33  ;;  %v2438_v22 = vadd.f32 %v2437_v58, %v6641_v13 }
 0x357   : > { %v2439_v54 = vpop.f32.mrf.mxu0 }
 0x358   : > { %v6838_v50 = vpack.c.bf16 %v2671_v48, %v2669_v20  ;;  %v2440_v27 = vadd.f32 %v2439_v54, %v6638_v36  ;;  %v2672_v42 = vmax.f32 %v2438_v22, 0.0 }
 0x359   : > { %v2441_v15 = vpop.f32.mrf.mxu0 }
 0x35a   : > { %v2442_v25 = vadd.f32 %v2441_v15, %v6641_v13  ;;  %3376 = vmatprep.mubr.bf16.mxu1 %v6838_v50  ;;  %v2673_v38 = vmax.f32 %v2440_v27, 0.0 }
 0x35b   : > { %v2443_v52 = vpop.f32.mrf.mxu0 }
 0x35c   : > { %v2444_v43 = vadd.f32 %v2443_v52, %v6638_v36  ;;  %3377 = vmatmul.mubr.bf16.gmra.mxu1 %v6840_v51  ;;  %v2674_v44 = vmax.f32 %v2442_v25, 0.0 }
 0x35d   : > { %v2447_v49 = vpop.f32.mrf.mxu0  ;;  %3670 = vmatmul.mubr.bf16.gmra.mxu0 %v6768_v10 }
 0x35e   : > { %v2675_v6 = vmax.f32 %v2444_v43, 0.0  ;;  %3679 = vmatprep.mubr.bf16.mxu0 %v6778_v4  ;;  %v6852_v29 = vpack.c.bf16 %v2674_v44, %v2672_v42  ;;  %v2448_v2 = vadd.f32 %v2447_v49, %v6641_v13 }
 0x35f   : > { %v2449_v31 = vpop.f32.mrf.mxu0 }
 0x360   : > { %v6850_v60 = vpack.c.bf16 %v2675_v6, %v2673_v38  ;;  %v2450_v3 = vadd.f32 %v2449_v31, %v6638_v36  ;;  %v2676_v24 = vmax.f32 %v2448_v2, 0.0 }
 0x361   : > { %v2451_v56 = vpop.f32.mrf.mxu0 }
 0x362   : > { %v2452_v11 = vadd.f32 %v2451_v56, %v6641_v13  ;;  %3386 = vmatprep.mubr.bf16.mxu1 %v6850_v60  ;;  %v2677_v32 = vmax.f32 %v2450_v3, 0.0 }
 0x363   : > { %v2453_v59 = vpop.f32.mrf.mxu0 }
 0x364   : > { %v2454_v10 = vadd.f32 %v2453_v59, %v6638_v36  ;;  %3387 = vmatmul.mubr.bf16.gmra.mxu1 %v6852_v29  ;;  %v2678_v16 = vmax.f32 %v2452_v11, 0.0 }
 0x365   : > { %v2457_v4 = vpop.f32.mrf.mxu0  ;;  %3680 = vmatmul.mubr.bf16.gmra.mxu0 %v6780_v40 }
 0x366   : > { %v2679_v39 = vmax.f32 %v2454_v10, 0.0  ;;  %3689 = vmatprep.mubr.bf16.mxu0 %v6790_v21  ;;  %v6864_v8 = vpack.c.bf16 %v2678_v16, %v2676_v24  ;;  %v2458_v5 = vadd.f32 %v2457_v4, %v6641_v13 }
 0x367   : > { %v2459_v53 = vpop.f32.mrf.mxu0 }
 0x368   : > { %v6862_v12 = vpack.c.bf16 %v2679_v39, %v2677_v32  ;;  %v2460_v23 = vadd.f32 %v2459_v53, %v6638_v36  ;;  %v2680_v47 = vmax.f32 %v2458_v5, 0.0 }
 0x369   : > { %v2461_v30 = vpop.f32.mrf.mxu0 }
 0x36a   : > { %v2462_v63 = vadd.f32 %v2461_v30, %v6641_v13  ;;  %3396 = vmatprep.mubr.bf16.mxu1 %v6862_v12  ;;  %v2681_v19 = vmax.f32 %v2460_v23, 0.0 }
 0x36b   : > { %v2463_v61 = vpop.f32.mrf.mxu0 }
 0x36c   : > { %v2464_v40 = vadd.f32 %v2463_v61, %v6638_v36  ;;  %3397 = vmatmul.mubr.bf16.gmra.mxu1 %v6864_v8  ;;  %v2682_v9 = vmax.f32 %v2462_v63, 0.0 }
 0x36d   : > { %v2467_v21 = vpop.f32.mrf.mxu0  ;;  %3690 = vmatmul.mubr.bf16.gmra.mxu0 %v6792_v62 }
 0x36e   : > { %v2683_v26 = vmax.f32 %v2464_v40, 0.0  ;;  %3699 = vmatprep.mubr.bf16.mxu0 %v6802_v57  ;;  %v6876_v28 = vpack.c.bf16 %v2682_v9, %v2680_v47  ;;  %v2468_v20 = vadd.f32 %v2467_v21, %v6641_v13 }
 0x36f   : > { %v2469_v37 = vpop.f32.mrf.mxu0 }
 0x370   : > { %v6874_v46 = vpack.c.bf16 %v2683_v26, %v2681_v19  ;;  %v2470_v17 = vadd.f32 %v2469_v37, %v6638_v36  ;;  %v2684_v15 = vmax.f32 %v2468_v20, 0.0 }
 0x371   : > { %v2471_v18 = vpop.f32.mrf.mxu0 }
 0x372   : > { %v2472_v7 = vadd.f32 %v2471_v18, %v6641_v13  ;;  %3406 = vmatprep.mubr.bf16.mxu1 %v6874_v46  ;;  %v2685_v55 = vmax.f32 %v2470_v17, 0.0 }
 0x373   : > { %v2473_v58 = vpop.f32.mrf.mxu0 }
 0x374   : > { %v2474_v62 = vadd.f32 %v2473_v58, %v6638_v36  ;;  %3407 = vmatmul.mubr.bf16.gmra.mxu1 %v6876_v28  ;;  %v2686_v48 = vmax.f32 %v2472_v7, 0.0 }
 0x375   : > { %v2477_v57 = vpop.f32.mrf.mxu0  ;;  %3700 = vmatmul.mubr.bf16.gmra.mxu0 %v6804_v14 }
 0x376   : > { %v2687_v54 = vmax.f32 %v2474_v62, 0.0  ;;  %3709 = vmatprep.mubr.bf16.mxu0 %v6814_v35  ;;  %v6888_v52 = vpack.c.bf16 %v2686_v48, %v2684_v15  ;;  %v2478_v38 = vadd.f32 %v2477_v57, %v6641_v13 }
 0x377   : > { %v2479_v33 = vpop.f32.mrf.mxu0 }
 0x378   : > { %v6886_v27 = vpack.c.bf16 %v2687_v54, %v2685_v55  ;;  %v2480_v22 = vadd.f32 %v2479_v33, %v6638_v36  ;;  %v2688_v56 = vmax.f32 %v2478_v38, 0.0 }
 0x379   : > { %v2481_v25 = vpop.f32.mrf.mxu0 }
 0x37a   : > { %v2482_v43 = vadd.f32 %v2481_v25, %v6641_v13  ;;  %3416 = vmatprep.mubr.bf16.mxu1 %v6886_v27  ;;  %v2689_v44 = vmax.f32 %v2480_v22, 0.0 }
 0x37b   : > { %v2483_v49 = vpop.f32.mrf.mxu0 }
 0x37c   : > { %v2484_v14 = vadd.f32 %v2483_v49, %v6638_v36  ;;  %3417 = vmatmul.mubr.bf16.gmra.mxu1 %v6888_v52  ;;  %v2690_v6 = vmax.f32 %v2482_v43, 0.0 }
 0x37d   : > { %v2487_v35 = vpop.f32.mrf.mxu0  ;;  %3710 = vmatmul.mubr.bf16.gmra.mxu0 %v6816_v0 }
 0x37e   : > { %v2691_v31 = vmax.f32 %v2484_v14, 0.0  ;;  %3719 = vmatprep.mubr.bf16.mxu0 %v6826_v45  ;;  %v6900_v59 = vpack.c.bf16 %v2690_v6, %v2688_v56  ;;  %v2488_v32 = vadd.f32 %v2487_v35, %v6641_v13 }
 0x37f   : > { %v2489_v42 = vpop.f32.mrf.mxu0 }
 0x380   : > { %v6898_v3 = vpack.c.bf16 %v2691_v31, %v2689_v44  ;;  %v2490_v2 = vadd.f32 %v2489_v42, %v6638_v36  ;;  %v2692_v30 = vmax.f32 %v2488_v32, 0.0 }
 0x381   : > { %v2491_v11 = vpop.f32.mrf.mxu0 }
 0x382   : > { %v2492_v10 = vadd.f32 %v2491_v11, %v6641_v13  ;;  %3426 = vmatprep.mubr.bf16.mxu1 %v6898_v3  ;;  %v2693_v16 = vmax.f32 %v2490_v2, 0.0 }
 0x383   : > { %v2493_v4 = vpop.f32.mrf.mxu0 }
 0x384   : > { %v2494_v0 = vadd.f32 %v2493_v4, %v6638_v36  ;;  %3427 = vmatmul.mubr.bf16.gmra.mxu1 %v6900_v59  ;;  %v2694_v39 = vmax.f32 %v2492_v10, 0.0 }
 0x385   : > { %v2497_v45 = vpop.f32.mrf.mxu0  ;;  %3720 = vmatmul.mubr.bf16.gmra.mxu0 %v6828_v34 }
 0x386   : > { %v2695_v53 = vmax.f32 %v2494_v0, 0.0  ;;  %3729 = vmatprep.mubr.bf16.mxu0 %v6838_v50  ;;  %v6912_v61 = vpack.c.bf16 %v2694_v39, %v2692_v30  ;;  %v2498_v19 = vadd.f32 %v2497_v45, %v6641_v13 }
 0x387   : > { %v2499_v24 = vpop.f32.mrf.mxu0 }
 0x388   : > { %v6910_v23 = vpack.c.bf16 %v2695_v53, %v2693_v16  ;;  %v2500_v5 = vadd.f32 %v2499_v24, %v6638_v36  ;;  %v2696_v18 = vmax.f32 %v2498_v19, 0.0 }
 0x389   : > { %v2501_v63 = vpop.f32.mrf.mxu0 }
 0x38a   : > { %v2502_v40 = vadd.f32 %v2501_v63, %v6641_v13  ;;  %3436 = vmatprep.mubr.bf16.mxu1 %v6910_v23  ;;  %v2697_v9 = vmax.f32 %v2500_v5, 0.0 }
 0x38b   : > { %v2503_v21 = vpop.f32.mrf.mxu0 }
 0x38c   : > { %v2504_v34 = vadd.f32 %v2503_v21, %v6638_v36  ;;  %3437 = vmatmul.mubr.bf16.gmra.mxu1 %v6912_v61  ;;  %v2698_v26 = vmax.f32 %v2502_v40, 0.0 }
 0x38d   : > { %v2507_v50 = vpop.f32.mrf.mxu0  ;;  %3730 = vmatmul.mubr.bf16.gmra.mxu0 %v6840_v51 }
 0x38e   : > { %v2699_v37 = vmax.f32 %v2504_v34, 0.0  ;;  %3739 = vmatprep.mubr.bf16.mxu0 %v6850_v60  ;;  %v6924_v58 = vpack.c.bf16 %v2698_v26, %v2696_v18  ;;  %v2508_v55 = vadd.f32 %v2507_v50, %v6641_v13  ;;  %v6969_v18 = vld [vmem:[#allocation13] sm:$0xf] }
 0x38f   : > { %v2509_v47 = vpop.f32.mrf.mxu0 }
 0x390   : > { %v6922_v17 = vpack.c.bf16 %v2699_v37, %v2697_v9  ;;  %v2510_v20 = vadd.f32 %v2509_v47, %v6638_v36  ;;  %v2700_v25 = vmax.f32 %v2508_v55, 0.0  ;;  %v6976_v55 = vrot.slane %v6969_v18, %v8046_v41 }
 0x391   : > { %v2511_v7 = vpop.f32.mrf.mxu0 }
 0x392   : > { %v2512_v62 = vadd.f32 %v2511_v7, %v6641_v13  ;;  %3446 = vmatprep.mubr.bf16.mxu1 %v6922_v17  ;;  %v2701_v48 = vmax.f32 %v2510_v20, 0.0 }
 0x393   : > { %v2513_v57 = vpop.f32.mrf.mxu0 }
 0x394   : > { %v2514_v51 = vadd.f32 %v2513_v57, %v6638_v36  ;;  %3447 = vmatmul.mubr.bf16.gmra.mxu1 %v6924_v58  ;;  %v2702_v54 = vmax.f32 %v2512_v62, 0.0 }
 0x395   : > { %v2517_v60 = vpop.f32.mrf.mxu0  ;;  %3740 = vmatmul.mubr.bf16.gmra.mxu0 %v6852_v29 }
 0x396   : > { %v2703_v33 = vmax.f32 %v2514_v51, 0.0  ;;  %3749 = vmatprep.mubr.bf16.mxu0 %v6862_v12  ;;  %v6936_v49 = vpack.c.bf16 %v2702_v54, %v2700_v25  ;;  %v2518_v44 = vadd.f32 %v2517_v60, %v6641_v13 }
 0x397   : > { %v2519_v15 = vpop.f32.mrf.mxu0 }
 0x398   : > { %v6934_v22 = vpack.c.bf16 %v2703_v33, %v2701_v48  ;;  %v2520_v38 = vadd.f32 %v2519_v15, %v6638_v36  ;;  %v2704_v11 = vmax.f32 %v2518_v44, 0.0 }
 0x399   : > { %v2521_v43 = vpop.f32.mrf.mxu0 }
 0x39a   : > { %v2522_v14 = vadd.f32 %v2521_v43, %v6641_v13  ;;  %3456 = vmatprep.mubr.bf16.mxu1 %v6934_v22  ;;  %v2705_v6 = vmax.f32 %v2520_v38, 0.0 }
 0x39b   : > { %v2523_v35 = vpop.f32.mrf.mxu0 }
 0x39c   : > { %v2524_v29 = vadd.f32 %v2523_v35, %v6638_v36  ;;  %3457 = vmatmul.mubr.bf16.gmra.mxu1 %v6936_v49  ;;  %v2706_v31 = vmax.f32 %v2522_v14, 0.0 }
 0x39d   : > { %v2527_v12 = vpop.f32.mrf.mxu0  ;;  %3750 = vmatmul.mubr.bf16.gmra.mxu0 %v6864_v8 }
 0x39e   : > { %v2707_v42 = vmax.f32 %v2524_v29, 0.0  ;;  %3759 = vmatprep.mubr.bf16.mxu0 %v6874_v46  ;;  %v6948_v4 = vpack.c.bf16 %v2706_v31, %v2704_v11  ;;  %v2528_v16 = vadd.f32 %v2527_v12, %v6641_v13 }
 0x39f   : > { %v2529_v56 = vpop.f32.mrf.mxu0 }
 0x3a0   : > { %v6946_v2 = vpack.c.bf16 %v2707_v42, %v2705_v6  ;;  %v2530_v32 = vadd.f32 %v2529_v56, %v6638_v36  ;;  %v2708_v63 = vmax.f32 %v2528_v16, 0.0  ;;  %v5157_v56 = vld [vmem:[%s5910_s9 + $0x8] sm:$0xff] }
 0x3a1   : > { %v2531_v10 = vpop.f32.mrf.mxu0 }
 0x3a2   : > { %v2532_v0 = vadd.f32 %v2531_v10, %v6641_v13  ;;  %3466 = vmatprep.mubr.bf16.mxu1 %v6946_v2  ;;  %v2709_v39 = vmax.f32 %v2530_v32, 0.0 }
 0x3a3   : > { %v2533_v45 = vpop.f32.mrf.mxu0 }
 0x3a4   : > { %v2534_v8 = vadd.f32 %v2533_v45, %v6638_v36  ;;  %3467 = vmatmul.mubr.bf16.gmra.mxu1 %v6948_v4  ;;  %v2710_v53 = vmax.f32 %v2532_v0, 0.0  ;;  %v5158_v45 = vld [vmem:[%s5910_s9 + $0x20] sm:$0xff] }
 0x3a5   : > { %v2537_v46 = vpop.f32.mrf.mxu0  ;;  %3760 = vmatmul.mubr.bf16.gmra.mxu0 %v6876_v28 }
 0x3a6   : > { %v2711_v24 = vmax.f32 %v2534_v8, 0.0  ;;  %3769 = vmatprep.mubr.bf16.mxu0 %v6886_v27  ;;  %v6960_v21 = vpack.c.bf16 %v2710_v53, %v2708_v63  ;;  %v2538_v9 = vadd.f32 %v2537_v46, %v6641_v13 }
 0x3a7   : > { %v2539_v30 = vpop.f32.mrf.mxu0 }
 0x3a8   : > { %v6958_v5 = vpack.c.bf16 %v2711_v24, %v2709_v39  ;;  %v2540_v19 = vadd.f32 %v2539_v30, %v6638_v36  ;;  %v2712_v20 = vmax.f32 %v2538_v9, 0.0  ;;  %v5159_v30 = vld [vmem:[%s5910_s9 + $0x28] sm:$0xff] }
 0x3a9   : > { %v2541_v40 = vpop.f32.mrf.mxu0 }
 0x3aa   : > { %v2542_v34 = vadd.f32 %v2541_v40, %v6641_v13  ;;  %3476 = vmatprep.mubr.bf16.mxu1 %v6958_v5  ;;  %v2713_v26 = vmax.f32 %v2540_v19, 0.0 }
 0x3ab   : > { %v2543_v50 = vpop.f32.mrf.mxu0 }
 0x3ac   : > { %v2544_v28 = vadd.f32 %v2543_v50, %v6638_v36  ;;  %3477 = vmatmul.mubr.bf16.gmra.mxu1 %v6960_v21  ;;  %v2714_v37 = vmax.f32 %v2542_v34, 0.0 }
 0x3ad   : > { %v2547_v27 = vpop.f32.mrf.mxu0  ;;  %3770 = vmatmul.mubr.bf16.gmra.mxu0 %v6888_v52 }
 0x3ae   : > { %v2715_v47 = vmax.f32 %v2544_v28, 0.0  ;;  %3779 = vmatprep.mubr.bf16.mxu0 %v6898_v3  ;;  %v6978_v51 = vpack.c.bf16 %v2714_v37, %v2712_v20  ;;  %v6985_v3 = vrot.slane %v6969_v18, %v8045_v1  ;;  %v2548_v54 = vadd.f32 %v2547_v27, %v6641_v13  ;;  %v5156_v1 = vld [vmem:[%s5910_s9] sm:$0xff] }
 0x3af   : > { %v2549_v7 = vpop.f32.mrf.mxu0 }
 0x3b0   : > { %v6972_v62 = vpack.c.bf16 %v2715_v47, %v2713_v26  ;;  %v2550_v60 = vadd.f32 %v2549_v7, %v6638_v36  ;;  %v2716_v12 = vmax.f32 %v2548_v54, 0.0  ;;  %v5160_v26 = vld [vmem:[%s5910_s9 + $0x40] sm:$0xff] }
 0x3b1   : > { %v2551_v57 = vpop.f32.mrf.mxu0 }
 0x3b2   : > { %v2552_v52 = vadd.f32 %v2551_v57, %v6641_v13  ;;  %3486 = vmatprep.mubr.bf16.mxu1 %v6972_v62  ;;  %v2717_v25 = vmax.f32 %v2550_v60, 0.0 }
 0x3b3   : > { %v2553_v48 = vpop.f32.mrf.mxu0  ;;  %v3248_v41 = vpop.f32.mrf.mxu1 }
 0x3b4   : > { %v2554_v33 = vadd.f32 %v2553_v48, %v6638_v36  ;;  %3487 = vmatmul.mubr.bf16.gmra.mxu1 %v6978_v51  ;;  %v3249_v15 = vadd.f32 %v3248_v41, %v6976_v55  ;;  %v2718_v43 = vmax.f32 %v2552_v52, 0.0  ;;  %v5161_v48 = vld [vmem:[%s5910_s9 + $0x48] sm:$0xff] }
 0x3b5   : > { %v2557_v14 = vpop.f32.mrf.mxu0  ;;  %v3250_v35 = vpop.f32.mrf.mxu1  ;;  %3780 = vmatmul.mubr.bf16.gmra.mxu0 %v6900_v59 }
 0x3b6   : > { %v2719_v38 = vmax.f32 %v2554_v33, 0.0  ;;  %v3920_v44 = vadd.f32 %v5156_v1, %v3249_v15  ;;  %v3251_v29 = vadd.f32 %v3250_v35, %v6985_v3  ;;  %3789 = vmatprep.mubr.bf16.mxu0 %v6910_v23  ;;  %v7004_v10 = vpack.c.bf16 %v2718_v43, %v2716_v12  ;;  %v5162_v15 = vld [vmem:[%s5910_s9 + $0x60] sm:$0xff] }
 0x3b7   : > { %v2559_v6 = vpop.f32.mrf.mxu0  ;;  %v3252_v31 = vpop.f32.mrf.mxu1  ;;  %v2558_v39 = vadd.f32 %v2557_v14, %v6641_v13 }
 0x3b8   : > { %v6995_v42 = vpack.c.bf16 %v2719_v38, %v2717_v25  ;;  %4176 = vst [vmem:[%s6999_s8] sm:$0xff] %v3920_v44  ;;  %v3921_v59 = vadd.f32 %v5157_v56, %v3251_v29  ;;  %v3253_v11 = vadd.f32 %v3252_v31, %v6976_v55  ;;  %v2560_v0 = vadd.f32 %v2559_v6, %v6638_v36  ;;  %v5163_v44 = vld [vmem:[%s5910_s9 + $0x68] sm:$0xff] }
 0x3b9   : > { %v2561_v23 = vpop.f32.mrf.mxu0  ;;  %v3254_v32 = vpop.f32.mrf.mxu1  ;;  %v2720_v47 = vmax.f32 %v2558_v39, 0.0 }
 0x3ba   : > { %3496 = vmatprep.mubr.bf16.mxu1 %v6995_v42  ;;  %4177 = vst [vmem:[%s6999_s8 + $0x8] sm:$0xff] %v3921_v59  ;;  %v3924_v16 = vadd.f32 %v5158_v45, %v3253_v11  ;;  %v2562_v8 = vadd.f32 %v2561_v23, %v6641_v13  ;;  %v3255_v46 = vadd.f32 %v3254_v32, %v6985_v3  ;;  %v2721_v28 = vmax.f32 %v2560_v0, 0.0  ;;  %v5164_v32 = vld [vmem:[%s5910_s9 + $0x80] sm:$0xff] }
 0x3bb   : > { %v2563_v53 = vpop.f32.mrf.mxu0  ;;  %v3258_v24 = vpop.f32.mrf.mxu1 }
 0x3bc   : > { %3497 = vmatmul.mubr.bf16.gmra.mxu1 %v7004_v10  ;;  %4180 = vst [vmem:[%s6999_s8 + $0x20] sm:$0xff] %v3924_v16  ;;  %v3925_v63 = vadd.f32 %v5159_v30, %v3255_v46  ;;  %v2564_v40 = vadd.f32 %v2563_v53, %v6638_v36  ;;  %v3259_v19 = vadd.f32 %v3258_v24, %v6976_v55  ;;  %v2722_v34 = vmax.f32 %v2562_v8, 0.0  ;;  %v5165_v24 = vld [vmem:[%s5910_s9 + $0x88] sm:$0xff] }
 0x3bd   : > { %v2567_v50 = vpop.f32.mrf.mxu0  ;;  %v3260_v9 = vpop.f32.mrf.mxu1  ;;  %3790 = vmatmul.mubr.bf16.gmra.mxu0 %v6912_v61 }
 0x3be   : > { %4181 = vst [vmem:[%s6999_s8 + $0x28] sm:$0xff] %v3925_v63  ;;  %v2723_v27 = vmax.f32 %v2564_v40, 0.0  ;;  %v3928_v37 = vadd.f32 %v5160_v26, %v3259_v19  ;;  %3799 = vmatprep.mubr.bf16.mxu0 %v6922_v17  ;;  %v3261_v7 = vadd.f32 %v3260_v9, %v6985_v3  ;;  %v7027_v61 = vpack.c.bf16 %v2722_v34, %v2720_v47  ;;  %v5166_v19 = vld [vmem:[%s5910_s9 + $0xa0] sm:$0xff] }
 0x3bf   : > { %v2569_v20 = vpop.f32.mrf.mxu0  ;;  %v3262_v57 = vpop.f32.mrf.mxu1  ;;  %v2568_v14 = vadd.f32 %v2567_v50, %v6641_v13 }
 0x3c0   : > { %4184 = vst [vmem:[%s6999_s8 + $0x40] sm:$0xff] %v3928_v37  ;;  %v3263_v60 = vadd.f32 %v3262_v57, %v6976_v55  ;;  %v7025_v52 = vpack.c.bf16 %v2723_v27, %v2721_v28  ;;  %v3929_v54 = vadd.f32 %v5161_v48, %v3261_v7  ;;  %v2570_v17 = vadd.f32 %v2569_v20, %v6638_v36  ;;  %v5167_v37 = vld [vmem:[%s5910_s9 + $0xa8] sm:$0xff] }
 0x3c1   : > { %v2571_v33 = vpop.f32.mrf.mxu0  ;;  %v3264_v41 = vpop.f32.mrf.mxu1  ;;  %v2724_v45 = vmax.f32 %v2568_v14, 0.0 }
 0x3c2   : > { %v3932_v25 = vadd.f32 %v5162_v15, %v3263_v60  ;;  %v2572_v43 = vadd.f32 %v2571_v33, %v6641_v13  ;;  %v3265_v38 = vadd.f32 %v3264_v41, %v6985_v3  ;;  %3506 = vmatprep.mubr.bf16.mxu1 %v7025_v52  ;;  %4185 = vst [vmem:[%s6999_s8 + $0x48] sm:$0xff] %v3929_v54  ;;  %v2725_v11 = vmax.f32 %v2570_v17, 0.0  ;;  %v5168_v41 = vld [vmem:[%s5910_s9 + $0xc0] sm:$0xff] }
 0x3c3   : > { %v2573_v35 = vpop.f32.mrf.mxu0  ;;  %v3268_v1 = vpop.f32.mrf.mxu1 }
 0x3c4   : > { %3507 = vmatmul.mubr.bf16.gmra.mxu1 %v7027_v61  ;;  %4188 = vst [vmem:[%s6999_s8 + $0x60] sm:$0xff] %v3932_v25  ;;  %v3933_v29 = vadd.f32 %v5163_v44, %v3265_v38  ;;  %v2574_v12 = vadd.f32 %v2573_v35, %v6638_v36  ;;  %v3269_v6 = vadd.f32 %v3268_v1, %v6976_v55  ;;  %v2726_v31 = vmax.f32 %v2572_v43, 0.0  ;;  %v5169_v1 = vld [vmem:[%s5910_s9 + $0xc8] sm:$0xff] }
 0x3c5   : > { %v2577_v56 = vpop.f32.mrf.mxu0  ;;  %v3270_v59 = vpop.f32.mrf.mxu1  ;;  %3800 = vmatmul.mubr.bf16.gmra.mxu0 %v6924_v58 }
 0x3c6   : > { %4189 = vst [vmem:[%s6999_s8 + $0x68] sm:$0xff] %v3933_v29  ;;  %v2727_v23 = vmax.f32 %v2574_v12, 0.0  ;;  %v3936_v0 = vadd.f32 %v5164_v32, %v3269_v6  ;;  %3809 = vmatprep.mubr.bf16.mxu0 %v6934_v22  ;;  %v3271_v16 = vadd.f32 %v3270_v59, %v6985_v3  ;;  %v7051_v58 = vpack.c.bf16 %v2726_v31, %v2724_v45  ;;  %v5170_v6 = vld [vmem:[%s5910_s9 + $0xe0] sm:$0xff] }
 0x3c7   : > { %v2579_v8 = vpop.f32.mrf.mxu0  ;;  %v3272_v46 = vpop.f32.mrf.mxu1  ;;  %v2578_v28 = vadd.f32 %v2577_v56, %v6641_v13 }
 0x3c8   : > { %4192 = vst [vmem:[%s6999_s8 + $0x80] sm:$0xff] %v3936_v0  ;;  %v3273_v39 = vadd.f32 %v3272_v46, %v6976_v55  ;;  %v7049_v53 = vpack.c.bf16 %v2727_v23, %v2725_v11  ;;  %v3937_v30 = vadd.f32 %v5165_v24, %v3271_v16  ;;  %v2580_v22 = vadd.f32 %v2579_v8, %v6638_v36  ;;  %v5171_v0 = vld [vmem:[%s5910_s9 + $0xe8] sm:$0xff] }
 0x3c9   : > { %v2581_v63 = vpop.f32.mrf.mxu0  ;;  %v3274_v40 = vpop.f32.mrf.mxu1  ;;  %v2728_v15 = vmax.f32 %v2578_v28, 0.0 }
 0x3ca   : > { %v3940_v34 = vadd.f32 %v5166_v19, %v3273_v39  ;;  %v2582_v50 = vadd.f32 %v2581_v63, %v6641_v13  ;;  %v3275_v9 = vadd.f32 %v3274_v40, %v6985_v3  ;;  %3516 = vmatprep.mubr.bf16.mxu1 %v7049_v53  ;;  %4193 = vst [vmem:[%s6999_s8 + $0x88] sm:$0xff] %v3937_v30  ;;  %v2729_v54 = vmax.f32 %v2580_v22, 0.0  ;;  %v5172_v40 = vld [vmem:[%s5910_s9 + $0x100] sm:$0xff] }
 0x3cb   : > { %v2583_v27 = vpop.f32.mrf.mxu0  ;;  %v3278_v26 = vpop.f32.mrf.mxu1 }
 0x3cc   : > { %3517 = vmatmul.mubr.bf16.gmra.mxu1 %v7051_v58  ;;  %4196 = vst [vmem:[%s6999_s8 + $0xa0] sm:$0xff] %v3940_v34  ;;  %v3941_v47 = vadd.f32 %v5167_v37, %v3275_v9  ;;  %v2584_v7 = vadd.f32 %v2583_v27, %v6638_v36  ;;  %v3279_v20 = vadd.f32 %v3278_v26, %v6976_v55  ;;  %v2730_v57 = vmax.f32 %v2582_v50, 0.0  ;;  %v5173_v26 = vld [vmem:[%s5910_s9 + $0x108] sm:$0xff] }
 0x3cd   : > { %v2587_v60 = vpop.f32.mrf.mxu0  ;;  %v3280_v48 = vpop.f32.mrf.mxu1  ;;  %3810 = vmatmul.mubr.bf16.gmra.mxu0 %v6936_v49 }
 0x3ce   : > { %4197 = vst [vmem:[%s6999_s8 + $0xa8] sm:$0xff] %v3941_v47  ;;  %v2731_v33 = vmax.f32 %v2584_v7, 0.0  ;;  %v3944_v17 = vadd.f32 %v5168_v41, %v3279_v20  ;;  %3819 = vmatprep.mubr.bf16.mxu0 %v6946_v2  ;;  %v3281_v25 = vadd.f32 %v3280_v48, %v6985_v3  ;;  %v7075_v49 = vpack.c.bf16 %v2730_v57, %v2728_v15  ;;  %v5174_v20 = vld [vmem:[%s5910_s9 + $0x120] sm:$0xff] }
 0x3cf   : > { %v2589_v43 = vpop.f32.mrf.mxu0  ;;  %v3282_v38 = vpop.f32.mrf.mxu1  ;;  %v2588_v11 = vadd.f32 %v2587_v60, %v6641_v13 }
 0x3d0   : > { %4200 = vst [vmem:[%s6999_s8 + $0xc0] sm:$0xff] %v3944_v17  ;;  %v3283_v14 = vadd.f32 %v3282_v38, %v6976_v55  ;;  %v7073_v35 = vpack.c.bf16 %v2731_v33, %v2729_v54  ;;  %v3945_v44 = vadd.f32 %v5169_v1, %v3281_v25  ;;  %v2590_v2 = vadd.f32 %v2589_v43, %v6638_v36  ;;  %v5175_v17 = vld [vmem:[%s5910_s9 + $0x128] sm:$0xff] }
 0x3d1   : > { %v2591_v29 = vpop.f32.mrf.mxu0  ;;  %v3284_v12 = vpop.f32.mrf.mxu1  ;;  %v2732_v19 = vmax.f32 %v2588_v11, 0.0 }
 0x3d2   : > { %v3948_v31 = vadd.f32 %v5170_v6, %v3283_v14  ;;  %v2592_v56 = vadd.f32 %v2591_v29, %v6641_v13  ;;  %v3285_v59 = vadd.f32 %v3284_v12, %v6985_v3  ;;  %3526 = vmatprep.mubr.bf16.mxu1 %v7073_v35  ;;  %4201 = vst [vmem:[%s6999_s8 + $0xc8] sm:$0xff] %v3945_v44  ;;  %v2733_v30 = vmax.f32 %v2590_v2, 0.0  ;;  %v5176_v12 = vld [vmem:[%s5910_s9 + $0x140] sm:$0xff]  ;;  %v8070_v6 = vld [vmem:[#allocation74_spill] sm:$0xff] }
 0x3d3   : > { %v2593_v23 = vpop.f32.mrf.mxu0 }
 0x3d4   : > { %v3288_v32 = vpop.f32.mrf.mxu1  ;;  %3527 = vmatmul.mubr.bf16.gmra.mxu1 %v7075_v49  ;;  %4204 = vst [vmem:[%s6999_s8 + $0xe0] sm:$0xff] %v3948_v31  ;;  %v3949_v45 = vadd.f32 %v5171_v0, %v3285_v59  ;;  %v2594_v16 = vadd.f32 %v2593_v23, %v6638_v36  ;;  %v2734_v46 = vmax.f32 %v2592_v56, 0.0  ;;  %v2884_v31 = vsub.s32 2, %v8070_v6 }
 0x3d5   : > { %v3289_v8 = vadd.f32 %v3288_v32, %v6976_v55  ;;  %v2597_v39 = vpop.f32.mrf.mxu0  ;;  %3820 = vmatmul.mubr.bf16.gmra.mxu0 %v6948_v4  ;;  %v2888_v32 = vsub.s32 3, %v8070_v6 }
 0x3d6   : > { %v3290_v24 = vpop.f32.mrf.mxu1  ;;  %4205 = vst [vmem:[%s6999_s8 + $0xe8] sm:$0xff] %v3949_v45  ;;  %v2735_v63 = vmax.f32 %v2594_v16, 0.0  ;;  %3829 = vmatprep.mubr.bf16.mxu0 %v6958_v5  ;;  %v7099_v4 = vpack.c.bf16 %v2734_v46, %v2732_v19  ;;  %v2598_v54 = vadd.f32 %v2597_v39, %v6641_v13  ;;  %v5177_v16 = vld [vmem:[%s5910_s9 + $0x148] sm:$0xff] }
 0x3d7   : > { %v3952_v22 = vadd.f32 %v5172_v40, %v3289_v8  ;;  %v3291_v34 = vadd.f32 %v3290_v24, %v6985_v3  ;;  %v2599_v50 = vpop.f32.mrf.mxu0  ;;  %v5178_v24 = vld [vmem:[%s5910_s9 + $0x160] sm:$0xff] }
 0x3d8   : > { %v3292_v9 = vpop.f32.mrf.mxu1  ;;  %v7097_v27 = vpack.c.bf16 %v2735_v63, %v2733_v30  ;;  %v2600_v5 = vadd.f32 %v2599_v50, %v6638_v36  ;;  %v2736_v56 = vmax.f32 %v2598_v54, 0.0  ;;  %v7137_v50 = vrot.slane %v6969_v18, %v2884_v31 }
 0x3d9   : > { %4208 = vst [vmem:[%s6999_s8 + $0x100] sm:$0xff] %v3952_v22  ;;  %v3293_v28 = vadd.f32 %v3292_v9, %v6976_v55  ;;  %v3953_v37 = vadd.f32 %v5173_v26, %v3291_v34  ;;  %v2601_v47 = vpop.f32.mrf.mxu0  ;;  %v5179_v9 = vld [vmem:[%s5910_s9 + $0x168] sm:$0xff] }
 0x3da   : > { %v3294_v7 = vpop.f32.mrf.mxu1  ;;  %v2602_v60 = vadd.f32 %v2601_v47, %v6641_v13  ;;  %3536 = vmatprep.mubr.bf16.mxu1 %v7097_v27  ;;  %v2737_v44 = vmax.f32 %v2600_v5, 0.0  ;;  %v7144_v47 = vrot.slane %v6969_v18, %v2888_v32 }
 0x3db   : > { %v3956_v57 = vadd.f32 %v5174_v20, %v3293_v28  ;;  %v3295_v48 = vadd.f32 %v3294_v7, %v6985_v3  ;;  %4209 = vst [vmem:[%s6999_s8 + $0x108] sm:$0xff] %v3953_v37  ;;  %v2603_v33 = vpop.f32.mrf.mxu0 }
 0x3dc   : > { %v3298_v41 = vpop.f32.mrf.mxu1  ;;  %3537 = vmatmul.mubr.bf16.gmra.mxu1 %v7099_v4  ;;  %v2604_v25 = vadd.f32 %v2603_v33, %v6638_v36  ;;  %v2738_v38 = vmax.f32 %v2602_v60, 0.0  ;;  %v5180_v60 = vld [vmem:[%s5910_s9 + $0x180] sm:$0xff] }
 0x3dd   : > { %4212 = vst [vmem:[%s6999_s8 + $0x120] sm:$0xff] %v3956_v57  ;;  %v3957_v15 = vadd.f32 %v5175_v17, %v3295_v48  ;;  %v3299_v43 = vadd.f32 %v3298_v41, %v6976_v55  ;;  %v2607_v14 = vpop.f32.mrf.mxu0  ;;  %3830 = vmatmul.mubr.bf16.gmra.mxu0 %v6960_v21 }
 0x3de   : > { %v3300_v1 = vpop.f32.mrf.mxu1  ;;  %v2739_v29 = vmax.f32 %v2604_v25, 0.0  ;;  %3839 = vmatprep.mubr.bf16.mxu0 %v6972_v62  ;;  %v7125_v45 = vpack.c.bf16 %v2738_v38, %v2736_v56  ;;  %v2608_v22 = vadd.f32 %v2607_v14, %v6641_v13 }
 0x3df   : > { %4213 = vst [vmem:[%s6999_s8 + $0x128] sm:$0xff] %v3957_v15  ;;  %v3960_v2 = vadd.f32 %v5176_v12, %v3299_v43  ;;  %v3301_v59 = vadd.f32 %v3300_v1, %v6985_v3  ;;  %v2609_v11 = vpop.f32.mrf.mxu0 }
 0x3e0   : > { %v3302_v23 = vpop.f32.mrf.mxu1  ;;  %v7123_v0 = vpack.c.bf16 %v2739_v29, %v2737_v44  ;;  %v2610_v39 = vadd.f32 %v2609_v11, %v6638_v36  ;;  %v2740_v18 = vmax.f32 %v2608_v22, 0.0  ;;  %v5183_v29 = vld [vmem:[%s5910_s9 + $0x1a0] sm:$0xff] }
 0x3e1   : > { %4216 = vst [vmem:[%s6999_s8 + $0x140] sm:$0xff] %v3960_v2  ;;  %v3303_v21 = vadd.f32 %v3302_v23, %v6976_v55  ;;  %v3961_v62 = vadd.f32 %v5177_v16, %v3301_v59  ;;  %v2611_v8 = vpop.f32.mrf.mxu0  ;;  %v5184_v2 = vld [vmem:[%s5910_s9 + $0x18] sm:$0xff]  ;;  %v5185_v23 = vld [vmem:[%s5910_s9 + $0x1a8] sm:$0xff] }
 0x3e2   : > { %v3304_v46 = vpop.f32.mrf.mxu1  ;;  %v2612_v63 = vadd.f32 %v2611_v8, %v6641_v13  ;;  %3546 = vmatprep.mubr.bf16.mxu1 %v7123_v0  ;;  %v2741_v20 = vmax.f32 %v2610_v39, 0.0 }
 0x3e3   : > { %v3964_v30 = vadd.f32 %v5178_v24, %v3303_v21  ;;  %v3305_v40 = vadd.f32 %v3304_v46, %v6985_v3  ;;  %4217 = vst [vmem:[%s6999_s8 + $0x148] sm:$0xff] %v3961_v62  ;;  %v2613_v19 = vpop.f32.mrf.mxu0  ;;  %v5186_v21 = vld [vmem:[%s5910_s9 + $0x30] sm:$0xff]  ;;  %v5187_v24 = vld [vmem:[%s5910_s9 + $0x1c0] sm:$0xff] }
 0x3e4   : > { %v3308_v34 = vpop.f32.mrf.mxu1  ;;  %3547 = vmatmul.mubr.bf16.gmra.mxu1 %v7125_v45  ;;  %v2614_v26 = vadd.f32 %v2613_v19, %v6638_v36  ;;  %v2742_v13 = vmax.f32 %v2612_v63, 0.0  ;;  %v5188_v63 = vld [vmem:[%s5910_s9 + $0x38] sm:$0xff] }
 0x3e5   : > { %4220 = vst [vmem:[%s6999_s8 + $0x160] sm:$0xff] %v3964_v30  ;;  %v3965_v28 = vadd.f32 %v5179_v9, %v3305_v40  ;;  %v3309_v37 = vadd.f32 %v3308_v34, %v6976_v55  ;;  %v3601_v5 = vpop.f32.mrf.mxu0  ;;  %3840 = vmatmul.mubr.bf16.gmra.mxu0 %v6978_v51  ;;  %v5181_v51 = vld [vmem:[%s5910_s9 + $0x188] sm:$0xff] }
 0x3e6   : > { %v3310_v7 = vpop.f32.mrf.mxu1  ;;  %v2743_v57 = vmax.f32 %v2614_v26, 0.0  ;;  %3849 = vmatprep.mubr.bf16.mxu0 %v6995_v42  ;;  %v3602_v54 = vadd.f32 %v3601_v5, %v7137_v50  ;;  %v7158_v38 = vpack.c.bf16 %v2742_v13, %v2740_v18  ;;  %v5182_v42 = vld [vmem:[%s5910_s9 + $0x10] sm:$0xff] }
 0x3e7   : > { %4221 = vst [vmem:[%s6999_s8 + $0x168] sm:$0xff] %v3965_v28  ;;  %v3968_v48 = vadd.f32 %v5180_v60, %v3309_v37  ;;  %v3311_v36 = vadd.f32 %v3310_v7, %v6985_v3  ;;  %v3603_v41 = vpop.f32.mrf.mxu0  ;;  %v5190_v26 = vld [vmem:[%s5910_s9 + $0x50] sm:$0xff]  ;;  %v5192_v60 = vld [vmem:[%s5910_s9 + $0x58] sm:$0xff] }
 0x3e8   : > { %v3312_v33 = vpop.f32.mrf.mxu1  ;;  %v3604_v25 = vadd.f32 %v3603_v41, %v7144_v47  ;;  %v7156_v43 = vpack.c.bf16 %v2743_v57, %v2741_v20  ;;  %v3922_v14 = vadd.f32 %v5182_v42, %v3602_v54  ;;  %v5193_v41 = vld [vmem:[%s5910_s9 + $0x1e8] sm:$0xff] }
 0x3e9   : > { %4224 = vst [vmem:[%s6999_s8 + $0x180] sm:$0xff] %v3968_v48  ;;  %v3969_v17 = vadd.f32 %v5181_v51, %v3311_v36  ;;  %v3313_v15 = vadd.f32 %v3312_v33, %v6976_v55  ;;  %v3605_v44 = vpop.f32.mrf.mxu0 }
 0x3ea   : > { %v3314_v1 = vpop.f32.mrf.mxu1  ;;  %v3923_v6 = vadd.f32 %v5184_v2, %v3604_v25  ;;  %v3606_v56 = vadd.f32 %v3605_v44, %v7137_v50  ;;  %3556 = vmatprep.mubr.bf16.mxu1 %v7156_v43  ;;  %4178 = vst [vmem:[%s6999_s8 + $0x10] sm:$0xff] %v3922_v14  ;;  %v5195_v44 = vld [vmem:[%s5910_s9 + $0x200] sm:$0xff] }
 0x3eb   : > { %4225 = vst [vmem:[%s6999_s8 + $0x188] sm:$0xff] %v3969_v17  ;;  %v3972_v12 = vadd.f32 %v5183_v29, %v3313_v15  ;;  %v3315_v31 = vadd.f32 %v3314_v1, %v6985_v3  ;;  %v3607_v11 = vpop.f32.mrf.mxu0  ;;  %v5194_v17 = vld [vmem:[%s5910_s9 + $0x70] sm:$0xff] }
 0x3ec   : > { %v3318_v59 = vpop.f32.mrf.mxu1  ;;  %3557 = vmatmul.mubr.bf16.gmra.mxu1 %v7158_v38  ;;  %4179 = vst [vmem:[%s6999_s8 + $0x18] sm:$0xff] %v3923_v6  ;;  %v3926_v16 = vadd.f32 %v5186_v21, %v3606_v56  ;;  %v3608_v8 = vadd.f32 %v3607_v11, %v7144_v47 }
 0x3ed   : > { %4228 = vst [vmem:[%s6999_s8 + $0x1a0] sm:$0xff] %v3972_v12  ;;  %v3973_v32 = vadd.f32 %v5185_v23, %v3315_v31  ;;  %v3319_v62 = vadd.f32 %v3318_v59, %v6976_v55  ;;  %v3611_v39 = vpop.f32.mrf.mxu0  ;;  %3850 = vmatmul.mubr.bf16.gmra.mxu0 %v7004_v10  ;;  %v5189_v10 = vld [vmem:[%s5910_s9 + $0x1c8] sm:$0xff]  ;;  %v5196_v12 = vld [vmem:[%s5910_s9 + $0x78] sm:$0xff]  ;;  %v5198_v23 = vld [vmem:[%s5910_s9 + $0x90] sm:$0xff] }
 0x3ee   : > { %v3320_v46 = vpop.f32.mrf.mxu1  ;;  %4182 = vst [vmem:[%s6999_s8 + $0x30] sm:$0xff] %v3926_v16  ;;  %v3927_v40 = vadd.f32 %v5188_v63, %v3608_v8  ;;  %v3612_v19 = vadd.f32 %v3611_v39, %v7137_v50  ;;  %3859 = vmatprep.mubr.bf16.mxu0 %v7025_v52  ;;  %v5191_v52 = vld [vmem:[%s5910_s9 + $0x1e0] sm:$0xff]  ;;  %v5200_v39 = vld [vmem:[%s5910_s9 + $0x98] sm:$0xff] }
 0x3ef   : > { %4229 = vst [vmem:[%s6999_s8 + $0x1a8] sm:$0xff] %v3973_v32  ;;  %v3976_v30 = vadd.f32 %v5187_v24, %v3319_v62  ;;  %v3321_v22 = vadd.f32 %v3320_v46, %v6985_v3  ;;  %v3613_v9 = vpop.f32.mrf.mxu0 }
 0x3f0   : > { %v3322_v34 = vpop.f32.mrf.mxu1  ;;  %4183 = vst [vmem:[%s6999_s8 + $0x38] sm:$0xff] %v3927_v40  ;;  %v3930_v37 = vadd.f32 %v5190_v26, %v3612_v19  ;;  %v3614_v7 = vadd.f32 %v3613_v9, %v7144_v47  ;;  %v5201_v19 = vld [vmem:[%s5910_s9 + $0x228] sm:$0xff]  ;;  %v5202_v9 = vld [vmem:[%s5910_s9 + $0xb0] sm:$0xff] }
 0x3f1   : > { %4232 = vst [vmem:[%s6999_s8 + $0x1c0] sm:$0xff] %v3976_v30  ;;  %v3977_v28 = vadd.f32 %v5189_v10, %v3321_v22  ;;  %v3323_v13 = vadd.f32 %v3322_v34, %v6976_v55  ;;  %v3615_v20 = vpop.f32.mrf.mxu0 }
 0x3f2   : > { %v3324_v5 = vpop.f32.mrf.mxu1  ;;  %4186 = vst [vmem:[%s6999_s8 + $0x50] sm:$0xff] %v3930_v37  ;;  %v3931_v48 = vadd.f32 %v5192_v60, %v3614_v7  ;;  %v3616_v18 = vadd.f32 %v3615_v20, %v7137_v50  ;;  %v5203_v7 = vld [vmem:[%s5910_s9 + $0x240] sm:$0xff]  ;;  %v5204_v20 = vld [vmem:[%s5910_s9 + $0xb8] sm:$0xff] }
 0x3f3   : > { %4233 = vst [vmem:[%s6999_s8 + $0x1c8] sm:$0xff] %v3977_v28  ;;  %v3980_v57 = vadd.f32 %v5191_v52, %v3323_v13  ;;  %v3325_v36 = vadd.f32 %v3324_v5, %v6985_v3  ;;  %v3617_v33 = vpop.f32.mrf.mxu0 }
 0x3f4   : > { %v3328_v54 = vpop.f32.mrf.mxu1  ;;  %4187 = vst [vmem:[%s6999_s8 + $0x58] sm:$0xff] %v3931_v48  ;;  %v3934_v15 = vadd.f32 %v5194_v17, %v3616_v18  ;;  %v3618_v42 = vadd.f32 %v3617_v33, %v7144_v47 }
 0x3f5   : > { %4236 = vst [vmem:[%s6999_s8 + $0x1e0] sm:$0xff] %v3980_v57  ;;  %v3981_v51 = vadd.f32 %v5193_v41, %v3325_v36  ;;  %v3329_v25 = vadd.f32 %v3328_v54, %v6976_v55  ;;  %v3621_v1 = vpop.f32.mrf.mxu0  ;;  %3860 = vmatmul.mubr.bf16.gmra.mxu0 %v7027_v61  ;;  %v5197_v61 = vld [vmem:[%s5910_s9 + $0x208] sm:$0xff]  ;;  %v5206_v54 = vld [vmem:[%s5910_s9 + $0xd0] sm:$0xff] }
 0x3f6   : > { %v3330_v14 = vpop.f32.mrf.mxu1  ;;  %4190 = vst [vmem:[%s6999_s8 + $0x70] sm:$0xff] %v3934_v15  ;;  %v3935_v2 = vadd.f32 %v5196_v12, %v3618_v42  ;;  %v3622_v31 = vadd.f32 %v3621_v1, %v7137_v50  ;;  %3869 = vmatprep.mubr.bf16.mxu0 %v7049_v53  ;;  %v5199_v53 = vld [vmem:[%s5910_s9 + $0x220] sm:$0xff]  ;;  %v5208_v42 = vld [vmem:[%s5910_s9 + $0xd8] sm:$0xff] }
 0x3f7   : > { %4237 = vst [vmem:[%s6999_s8 + $0x1e8] sm:$0xff] %v3981_v51  ;;  %v3984_v29 = vadd.f32 %v5195_v44, %v3329_v25  ;;  %v3331_v6 = vadd.f32 %v3330_v14, %v6985_v3  ;;  %v3623_v59 = vpop.f32.mrf.mxu0 }
 0x3f8   : > { %v3332_v56 = vpop.f32.mrf.mxu1  ;;  %4191 = vst [vmem:[%s6999_s8 + $0x78] sm:$0xff] %v3935_v2  ;;  %v3938_v32 = vadd.f32 %v5198_v23, %v3622_v31  ;;  %v3624_v16 = vadd.f32 %v3623_v59, %v7144_v47  ;;  %v5209_v2 = vld [vmem:[%s5910_s9 + $0x268] sm:$0xff]  ;;  %v5210_v31 = vld [vmem:[%s5910_s9 + $0xf0] sm:$0xff] }
 0x3f9   : > { %4240 = vst [vmem:[%s6999_s8 + $0x200] sm:$0xff] %v3984_v29  ;;  %v3985_v11 = vadd.f32 %v5197_v61, %v3331_v6  ;;  %v3333_v21 = vadd.f32 %v3332_v56, %v6976_v55  ;;  %v3625_v8 = vpop.f32.mrf.mxu0 }
 0x3fa   : > { %v3334_v62 = vpop.f32.mrf.mxu1  ;;  %4194 = vst [vmem:[%s6999_s8 + $0x90] sm:$0xff] %v3938_v32  ;;  %v3939_v24 = vadd.f32 %v5200_v39, %v3624_v16  ;;  %v3626_v63 = vadd.f32 %v3625_v8, %v7137_v50  ;;  %v5211_v32 = vld [vmem:[%s5910_s9 + $0x280] sm:$0xff]  ;;  %v5212_v16 = vld [vmem:[%s5910_s9 + $0xf8] sm:$0xff] }
 0x3fb   : > { %4241 = vst [vmem:[%s6999_s8 + $0x208] sm:$0xff] %v3985_v11  ;;  %v3988_v46 = vadd.f32 %v5199_v53, %v3333_v21  ;;  %v3335_v30 = vadd.f32 %v3334_v62, %v6985_v3  ;;  %v3627_v22 = vpop.f32.mrf.mxu0 }
 0x3fc   : > { %v3338_v40 = vpop.f32.mrf.mxu1  ;;  %4195 = vst [vmem:[%s6999_s8 + $0x98] sm:$0xff] %v3939_v24  ;;  %v3942_v10 = vadd.f32 %v5202_v9, %v3626_v63  ;;  %v3628_v26 = vadd.f32 %v3627_v22, %v7144_v47 }
 0x3fd   : > { %4244 = vst [vmem:[%s6999_s8 + $0x220] sm:$0xff] %v3988_v46  ;;  %v3989_v34 = vadd.f32 %v5201_v19, %v3335_v30  ;;  %v3339_v28 = vadd.f32 %v3338_v40, %v6976_v55  ;;  %v3631_v13 = vpop.f32.mrf.mxu0  ;;  %3870 = vmatmul.mubr.bf16.gmra.mxu0 %v7051_v58  ;;  %v5205_v58 = vld [vmem:[%s5910_s9 + $0x248] sm:$0xff]  ;;  %v5214_v30 = vld [vmem:[%s5910_s9 + $0x110] sm:$0xff] }
 0x3fe   : > { %v3340_v37 = vpop.f32.mrf.mxu1  ;;  %4198 = vst [vmem:[%s6999_s8 + $0xb0] sm:$0xff] %v3942_v10  ;;  %v3943_v52 = vadd.f32 %v5204_v20, %v3628_v26  ;;  %v3632_v60 = vadd.f32 %v3631_v13, %v7137_v50  ;;  %3879 = vmatprep.mubr.bf16.mxu0 %v7073_v35  ;;  %v5207_v35 = vld [vmem:[%s5910_s9 + $0x260] sm:$0xff]  ;;  %v5216_v10 = vld [vmem:[%s5910_s9 + $0x118] sm:$0xff] }
 0x3ff   : > { %4245 = vst [vmem:[%s6999_s8 + $0x228] sm:$0xff] %v3989_v34  ;;  %v3992_v5 = vadd.f32 %v5203_v7, %v3339_v28  ;;  %v3341_v57 = vadd.f32 %v3340_v37, %v6985_v3  ;;  %v3633_v36 = vpop.f32.mrf.mxu0 }
 0x400   : > { %v3342_v48 = vpop.f32.mrf.mxu1  ;;  %4199 = vst [vmem:[%s6999_s8 + $0xb8] sm:$0xff] %v3943_v52  ;;  %v3946_v33 = vadd.f32 %v5206_v54, %v3632_v60  ;;  %v3634_v51 = vadd.f32 %v3633_v36, %v7144_v47  ;;  %v5218_v52 = vld [vmem:[%s5910_s9 + $0x130] sm:$0xff] }
 0x401   : > { %4248 = vst [vmem:[%s6999_s8 + $0x240] sm:$0xff] %v3992_v5  ;;  %v3993_v18 = vadd.f32 %v5205_v58, %v3341_v57  ;;  %v3343_v41 = vadd.f32 %v3342_v48, %v6976_v55  ;;  %v3635_v15 = vpop.f32.mrf.mxu0  ;;  %v5217_v5 = vld [vmem:[%s5910_s9 + $0x2a8] sm:$0xff] }
 0x402   : > { %v3344_v17 = vpop.f32.mrf.mxu1  ;;  %4202 = vst [vmem:[%s6999_s8 + $0xd0] sm:$0xff] %v3946_v33  ;;  %v3947_v14 = vadd.f32 %v5208_v42, %v3634_v51  ;;  %v3636_v44 = vadd.f32 %v3635_v15, %v7137_v50  ;;  %v5220_v33 = vld [vmem:[%s5910_s9 + $0x138] sm:$0xff]  ;;  %v5222_v42 = vld [vmem:[%s5910_s9 + $0x150] sm:$0xff] }
 0x403   : > { %4249 = vst [vmem:[%s6999_s8 + $0x248] sm:$0xff] %v3993_v18  ;;  %v3996_v25 = vadd.f32 %v5207_v35, %v3343_v41  ;;  %v3345_v1 = vadd.f32 %v3344_v17, %v6985_v3  ;;  %v3637_v12 = vpop.f32.mrf.mxu0  ;;  %v5219_v18 = vld [vmem:[%s5910_s9 + $0x2c0] sm:$0xff] }
 0x404   : > { %v3348_v29 = vpop.f32.mrf.mxu1  ;;  %4203 = vst [vmem:[%s6999_s8 + $0xd8] sm:$0xff] %v3947_v14  ;;  %v3950_v56 = vadd.f32 %v5210_v31, %v3636_v44  ;;  %v3638_v61 = vadd.f32 %v3637_v12, %v7144_v47 }
 0x405   : > { %4252 = vst [vmem:[%s6999_s8 + $0x260] sm:$0xff] %v3996_v25  ;;  %v3997_v6 = vadd.f32 %v5209_v2, %v3345_v1  ;;  %v3349_v59 = vadd.f32 %v3348_v29, %v6976_v55  ;;  %v3641_v23 = vpop.f32.mrf.mxu0  ;;  %3880 = vmatmul.mubr.bf16.gmra.mxu0 %v7075_v49  ;;  %v5213_v49 = vld [vmem:[%s5910_s9 + $0x288] sm:$0xff] }
 0x406   : > { %v3350_v11 = vpop.f32.mrf.mxu1  ;;  %4206 = vst [vmem:[%s6999_s8 + $0xf0] sm:$0xff] %v3950_v56  ;;  %v3951_v62 = vadd.f32 %v5212_v16, %v3638_v61  ;;  %v3642_v53 = vadd.f32 %v3641_v23, %v7137_v50  ;;  %3889 = vmatprep.mubr.bf16.mxu0 %v7097_v27  ;;  %v5215_v27 = vld [vmem:[%s5910_s9 + $0x2a0] sm:$0xff]  ;;  %v5225_v23 = vld [vmem:[%s5910_s9 + $0x2e8] sm:$0xff] }
 0x407   : > { %4253 = vst [vmem:[%s6999_s8 + $0x268] sm:$0xff] %v3997_v6  ;;  %v4000_v21 = vadd.f32 %v5211_v32, %v3349_v59  ;;  %v3351_v8 = vadd.f32 %v3350_v11, %v6985_v3  ;;  %v3643_v39 = vpop.f32.mrf.mxu0  ;;  %v5224_v6 = vld [vmem:[%s5910_s9 + $0x158] sm:$0xff] }
 0x408   : > { %v3352_v46 = vpop.f32.mrf.mxu1  ;;  %4207 = vst [vmem:[%s6999_s8 + $0xf8] sm:$0xff] %v3951_v62  ;;  %v3954_v63 = vadd.f32 %v5214_v30, %v3642_v53  ;;  %v3644_v22 = vadd.f32 %v3643_v39, %v7144_v47  ;;  %v5227_v39 = vld [vmem:[%s5910_s9 + $0x300] sm:$0xff] }
 0x409   : > { %4256 = vst [vmem:[%s6999_s8 + $0x280] sm:$0xff] %v4000_v21  ;;  %v4001_v24 = vadd.f32 %v5213_v49, %v3351_v8  ;;  %v3353_v40 = vadd.f32 %v3352_v46, %v6976_v55  ;;  %v3645_v34 = vpop.f32.mrf.mxu0  ;;  %v5226_v21 = vld [vmem:[%s5910_s9 + $0x170] sm:$0xff] }
 0x40a   : > { %v3354_v19 = vpop.f32.mrf.mxu1  ;;  %4210 = vst [vmem:[%s6999_s8 + $0x110] sm:$0xff] %v3954_v63  ;;  %v3955_v28 = vadd.f32 %v5216_v10, %v3644_v22  ;;  %v3646_v37 = vadd.f32 %v3645_v34, %v7137_v50 }
 0x40b   : > { %4257 = vst [vmem:[%s6999_s8 + $0x288] sm:$0xff] %v4001_v24  ;;  %v4004_v9 = vadd.f32 %v5215_v27, %v3353_v40  ;;  %v3355_v26 = vadd.f32 %v3354_v19, %v6985_v3  ;;  %v3647_v7 = vpop.f32.mrf.mxu0  ;;  %v5228_v24 = vld [vmem:[%s5910_s9 + $0x178] sm:$0xff]  ;;  %v5230_v27 = vld [vmem:[%s5910_s9 + $0x190] sm:$0xff] }
 0x40c   : > { %v3358_v13 = vpop.f32.mrf.mxu1  ;;  %4211 = vst [vmem:[%s6999_s8 + $0x118] sm:$0xff] %v3955_v28  ;;  %v3958_v57 = vadd.f32 %v5218_v52, %v3646_v37  ;;  %v3648_v48 = vadd.f32 %v3647_v7, %v7144_v47  ;;  %v5232_v7 = vld [vmem:[%s5910_s9 + $0x198] sm:$0xff] }
 0x40d   : > { %4260 = vst [vmem:[%s6999_s8 + $0x2a0] sm:$0xff] %v4004_v9  ;;  %v4005_v20 = vadd.f32 %v5217_v5, %v3355_v26  ;;  %v3359_v60 = vadd.f32 %v3358_v13, %v6976_v55  ;;  %v3651_v58 = vpop.f32.mrf.mxu0  ;;  %3890 = vmatmul.mubr.bf16.gmra.mxu0 %v7099_v4  ;;  %v5221_v4 = vld [vmem:[%s5910_s9 + $0x2c8] sm:$0xff] }
 0x40e   : > { %v3360_v36 = vpop.f32.mrf.mxu1  ;;  %4214 = vst [vmem:[%s6999_s8 + $0x130] sm:$0xff] %v3958_v57  ;;  %v3959_v41 = vadd.f32 %v5220_v33, %v3648_v48  ;;  %v3652_v17 = vadd.f32 %v3651_v58, %v7137_v50  ;;  %3899 = vmatprep.mubr.bf16.mxu0 %v7123_v0  ;;  %v5223_v0 = vld [vmem:[%s5910_s9 + $0x2e0] sm:$0xff]  ;;  %v5233_v48 = vld [vmem:[%s5910_s9 + $0x328] sm:$0xff]  ;;  %v5234_v58 = vld [vmem:[%s5910_s9 + $0x1b0] sm:$0xff] }
 0x40f   : > { %4261 = vst [vmem:[%s6999_s8 + $0x2a8] sm:$0xff] %v4005_v20  ;;  %v4008_v54 = vadd.f32 %v5219_v18, %v3359_v60  ;;  %v3361_v51 = vadd.f32 %v3360_v36, %v6985_v3  ;;  %v3653_v35 = vpop.f32.mrf.mxu0 }
 0x410   : > { %v3362_v15 = vpop.f32.mrf.mxu1  ;;  %4215 = vst [vmem:[%s6999_s8 + $0x138] sm:$0xff] %v3959_v41  ;;  %v3962_v14 = vadd.f32 %v5222_v42, %v3652_v17  ;;  %v3654_v44 = vadd.f32 %v3653_v35, %v7144_v47  ;;  %v5235_v17 = vld [vmem:[%s5910_s9 + $0x340] sm:$0xff]  ;;  %v5236_v35 = vld [vmem:[%s5910_s9 + $0x1b8] sm:$0xff] }
 0x411   : > { %4264 = vst [vmem:[%s6999_s8 + $0x2c0] sm:$0xff] %v4008_v54  ;;  %v4009_v25 = vadd.f32 %v5221_v4, %v3361_v51  ;;  %v3363_v1 = vadd.f32 %v3362_v15, %v6976_v55  ;;  %v3655_v12 = vpop.f32.mrf.mxu0 }
 0x412   : > { %v3364_v29 = vpop.f32.mrf.mxu1  ;;  %4218 = vst [vmem:[%s6999_s8 + $0x150] sm:$0xff] %v3962_v14  ;;  %v3963_v31 = vadd.f32 %v5224_v6, %v3654_v44  ;;  %v3656_v59 = vadd.f32 %v3655_v12, %v7137_v50  ;;  %v5237_v44 = vld [vmem:[%s5910_s9 + $0x348] sm:$0xff] }
 0x413   : > { %4265 = vst [vmem:[%s6999_s8 + $0x2c8] sm:$0xff] %v4009_v25  ;;  %v4012_v2 = vadd.f32 %v5223_v0, %v3363_v1  ;;  %v3365_v56 = vadd.f32 %v3364_v29, %v6985_v3  ;;  %v3657_v11 = vpop.f32.mrf.mxu0  ;;  %v5238_v29 = vld [vmem:[%s5910_s9 + $0x1d0] sm:$0xff] }
 0x414   : > { %v3368_v61 = vpop.f32.mrf.mxu1  ;;  %4219 = vst [vmem:[%s6999_s8 + $0x158] sm:$0xff] %v3963_v31  ;;  %v3966_v16 = vadd.f32 %v5226_v21, %v3656_v59  ;;  %v3658_v8 = vadd.f32 %v3657_v11, %v7144_v47 }
 0x415   : > { %4268 = vst [vmem:[%s6999_s8 + $0x2e0] sm:$0xff] %v4012_v2  ;;  %v4013_v32 = vadd.f32 %v5225_v23, %v3365_v56  ;;  %v3369_v62 = vadd.f32 %v3368_v61, %v6976_v55  ;;  %v3661_v46 = vpop.f32.mrf.mxu0  ;;  %3900 = vmatmul.mubr.bf16.gmra.mxu0 %v7125_v45  ;;  %v5229_v45 = vld [vmem:[%s5910_s9 + $0x308] sm:$0xff]  ;;  %v5239_v56 = vld [vmem:[%s5910_s9 + $0x360] sm:$0xff]  ;;  %v5240_v61 = vld [vmem:[%s5910_s9 + $0x1d8] sm:$0xff] }
 0x416   : > { %v3370_v53 = vpop.f32.mrf.mxu1  ;;  %4222 = vst [vmem:[%s6999_s8 + $0x170] sm:$0xff] %v3966_v16  ;;  %v3967_v30 = vadd.f32 %v5228_v24, %v3658_v8  ;;  %v3662_v40 = vadd.f32 %v3661_v46, %v7137_v50  ;;  %3909 = vmatprep.mubr.bf16.mxu0 %v7156_v43  ;;  %v5231_v43 = vld [vmem:[%s5910_s9 + $0x320] sm:$0xff] }
 0x417   : > { %4269 = vst [vmem:[%s6999_s8 + $0x2e8] sm:$0xff] %v4013_v32  ;;  %v4016_v49 = vadd.f32 %v5227_v39, %v3369_v62  ;;  %v3371_v63 = vadd.f32 %v3370_v53, %v6985_v3  ;;  %v3663_v19 = vpop.f32.mrf.mxu0  ;;  %v5241_v62 = vld [vmem:[%s5910_s9 + $0x368] sm:$0xff]  ;;  %v5242_v53 = vld [vmem:[%s5910_s9 + $0x1f0] sm:$0xff] }
 0x418   : > { %v3372_v22 = vpop.f32.mrf.mxu1  ;;  %4223 = vst [vmem:[%s6999_s8 + $0x178] sm:$0xff] %v3967_v30  ;;  %v3970_v9 = vadd.f32 %v5230_v27, %v3662_v40  ;;  %v3664_v28 = vadd.f32 %v3663_v19, %v7144_v47 }
 0x419   : > { %4272 = vst [vmem:[%s6999_s8 + $0x300] sm:$0xff] %v4016_v49  ;;  %v4017_v34 = vadd.f32 %v5229_v45, %v3371_v63  ;;  %v3373_v10 = vadd.f32 %v3372_v22, %v6976_v55  ;;  %v3665_v37 = vpop.f32.mrf.mxu0  ;;  %v5243_v63 = vld [vmem:[%s5910_s9 + $0x380] sm:$0xff]  ;;  %v5244_v22 = vld [vmem:[%s5910_s9 + $0x1f8] sm:$0xff] }
 0x41a   : > { %v3374_v26 = vpop.f32.mrf.mxu1  ;;  %4226 = vst [vmem:[%s6999_s8 + $0x190] sm:$0xff] %v3970_v9  ;;  %v3971_v5 = vadd.f32 %v5232_v7, %v3664_v28  ;;  %v3666_v52 = vadd.f32 %v3665_v37, %v7137_v50 }
 0x41b   : > { %4273 = vst [vmem:[%s6999_s8 + $0x308] sm:$0xff] %v4017_v34  ;;  %v4020_v13 = vadd.f32 %v5231_v43, %v3373_v10  ;;  %v3375_v20 = vadd.f32 %v3374_v26, %v6985_v3  ;;  %v3667_v60 = vpop.f32.mrf.mxu0  ;;  %v5245_v10 = vld [vmem:[%s5910_s9 + $0x388] sm:$0xff]  ;;  %v5246_v26 = vld [vmem:[%s5910_s9 + $0x210] sm:$0xff] }
 0x41c   : > { %v3378_v57 = vpop.f32.mrf.mxu1  ;;  %4227 = vst [vmem:[%s6999_s8 + $0x198] sm:$0xff] %v3971_v5  ;;  %v3974_v18 = vadd.f32 %v5234_v58, %v3666_v52  ;;  %v3668_v33 = vadd.f32 %v3667_v60, %v7144_v47 }
 0x41d   : > { %4276 = vst [vmem:[%s6999_s8 + $0x320] sm:$0xff] %v4020_v13  ;;  %v4021_v36 = vadd.f32 %v5233_v48, %v3375_v20  ;;  %v3379_v54 = vadd.f32 %v3378_v57, %v6976_v55  ;;  %v3671_v51 = vpop.f32.mrf.mxu0  ;;  %3910 = vmatmul.mubr.bf16.gmra.mxu0 %v7158_v38  ;;  %v5247_v20 = vld [vmem:[%s5910_s9 + $0x3a0] sm:$0xff]  ;;  %v5248_v57 = vld [vmem:[%s5910_s9 + $0x218] sm:$0xff] }
 0x41e   : > { %v3380_v41 = vpop.f32.mrf.mxu1  ;;  %4230 = vst [vmem:[%s6999_s8 + $0x1b0] sm:$0xff] %v3974_v18  ;;  %v3975_v4 = vadd.f32 %v5236_v35, %v3668_v33  ;;  %v3672_v42 = vadd.f32 %v3671_v51, %v7137_v50 }
 0x41f   : > { %4277 = vst [vmem:[%s6999_s8 + $0x328] sm:$0xff] %v4021_v36  ;;  %v4024_v15 = vadd.f32 %v5235_v17, %v3379_v54  ;;  %v3381_v25 = vadd.f32 %v3380_v41, %v6985_v3  ;;  %v3673_v1 = vpop.f32.mrf.mxu0  ;;  %v5249_v54 = vld [vmem:[%s5910_s9 + $0x3a8] sm:$0xff]  ;;  %v5250_v41 = vld [vmem:[%s5910_s9 + $0x230] sm:$0xff] }
 0x420   : > { %v3382_v14 = vpop.f32.mrf.mxu1  ;;  %4231 = vst [vmem:[%s6999_s8 + $0x1b8] sm:$0xff] %v3975_v4  ;;  %v3978_v12 = vadd.f32 %v5238_v29, %v3672_v42  ;;  %v3674_v2 = vadd.f32 %v3673_v1, %v7144_v47 }
 0x421   : > { %4280 = vst [vmem:[%s6999_s8 + $0x340] sm:$0xff] %v4024_v15  ;;  %v4025_v38 = vadd.f32 %v5237_v44, %v3381_v25  ;;  %v3383_v0 = vadd.f32 %v3382_v14, %v6976_v55  ;;  %v3675_v31 = vpop.f32.mrf.mxu0  ;;  %v5251_v25 = vld [vmem:[%s5910_s9 + $0x3c0] sm:$0xff]  ;;  %v5252_v14 = vld [vmem:[%s5910_s9 + $0x238] sm:$0xff] }
 0x422   : > { %v3384_v6 = vpop.f32.mrf.mxu1  ;;  %4234 = vst [vmem:[%s6999_s8 + $0x1d0] sm:$0xff] %v3978_v12  ;;  %v3979_v11 = vadd.f32 %v5240_v61, %v3674_v2  ;;  %v3676_v32 = vadd.f32 %v3675_v31, %v7137_v50 }
 0x423   : > { %4281 = vst [vmem:[%s6999_s8 + $0x348] sm:$0xff] %v4025_v38  ;;  %v4028_v59 = vadd.f32 %v5239_v56, %v3383_v0  ;;  %v3385_v23 = vadd.f32 %v3384_v6, %v6985_v3  ;;  %v3677_v16 = vpop.f32.mrf.mxu0  ;;  %v5253_v0 = vld [vmem:[%s5910_s9 + $0x3c8] sm:$0xff]  ;;  %v5254_v6 = vld [vmem:[%s5910_s9 + $0x250] sm:$0xff] }
 0x424   : > { %v3388_v21 = vpop.f32.mrf.mxu1  ;;  %4235 = vst [vmem:[%s6999_s8 + $0x1d8] sm:$0xff] %v3979_v11  ;;  %v3982_v46 = vadd.f32 %v5242_v53, %v3676_v32  ;;  %v3678_v49 = vadd.f32 %v3677_v16, %v7144_v47 }
 0x425   : > { %4284 = vst [vmem:[%s6999_s8 + $0x360] sm:$0xff] %v4028_v59  ;;  %v4029_v8 = vadd.f32 %v5241_v62, %v3385_v23  ;;  %v3389_v39 = vadd.f32 %v3388_v21, %v6976_v55  ;;  %v3681_v30 = vpop.f32.mrf.mxu0  ;;  %v5255_v23 = vld [vmem:[%s5910_s9 + $0x3e0] sm:$0xff]  ;;  %v5256_v21 = vld [vmem:[%s5910_s9 + $0x258] sm:$0xff] }
 0x426   : > { %v3390_v24 = vpop.f32.mrf.mxu1  ;;  %4238 = vst [vmem:[%s6999_s8 + $0x1f0] sm:$0xff] %v3982_v46  ;;  %v3983_v19 = vadd.f32 %v5244_v22, %v3678_v49  ;;  %v3682_v34 = vadd.f32 %v3681_v30, %v7137_v50 }
 0x427   : > { %4285 = vst [vmem:[%s6999_s8 + $0x368] sm:$0xff] %v4029_v8  ;;  %v4032_v40 = vadd.f32 %v5243_v63, %v3389_v39  ;;  %v3391_v45 = vadd.f32 %v3390_v24, %v6985_v3  ;;  %v3683_v9 = vpop.f32.mrf.mxu0  ;;  %v5257_v39 = vld [vmem:[%s5910_s9 + $0x3e8] sm:$0xff]  ;;  %v5258_v24 = vld [vmem:[%s5910_s9 + $0x270] sm:$0xff] }
 0x428   : > { %v3392_v27 = vpop.f32.mrf.mxu1  ;;  %4239 = vst [vmem:[%s6999_s8 + $0x1f8] sm:$0xff] %v3983_v19  ;;  %v3986_v37 = vadd.f32 %v5246_v26, %v3682_v34  ;;  %v3684_v13 = vadd.f32 %v3683_v9, %v7144_v47 }
 0x429   : > { %4288 = vst [vmem:[%s6999_s8 + $0x380] sm:$0xff] %v4032_v40  ;;  %v4033_v28 = vadd.f32 %v5245_v10, %v3391_v45  ;;  %v3393_v43 = vadd.f32 %v3392_v27, %v6976_v55  ;;  %v3685_v5 = vpop.f32.mrf.mxu0  ;;  %v5259_v45 = vld [vmem:[%s5910_s9 + $0x400] sm:$0xff]  ;;  %v5260_v27 = vld [vmem:[%s5910_s9 + $0x278] sm:$0xff] }
 0x42a   : > { %v3394_v7 = vpop.f32.mrf.mxu1  ;;  %4242 = vst [vmem:[%s6999_s8 + $0x210] sm:$0xff] %v3986_v37  ;;  %v3987_v60 = vadd.f32 %v5248_v57, %v3684_v13  ;;  %v3686_v36 = vadd.f32 %v3685_v5, %v7137_v50 }
 0x42b   : > { %4289 = vst [vmem:[%s6999_s8 + $0x388] sm:$0xff] %v4033_v28  ;;  %v4036_v52 = vadd.f32 %v5247_v20, %v3393_v43  ;;  %v3395_v48 = vadd.f32 %v3394_v7, %v6985_v3  ;;  %v3687_v18 = vpop.f32.mrf.mxu0  ;;  %v5261_v43 = vld [vmem:[%s5910_s9 + $0x408] sm:$0xff]  ;;  %v5262_v7 = vld [vmem:[%s5910_s9 + $0x290] sm:$0xff] }
 0x42c   : > { %v3398_v58 = vpop.f32.mrf.mxu1  ;;  %4243 = vst [vmem:[%s6999_s8 + $0x218] sm:$0xff] %v3987_v60  ;;  %v3990_v51 = vadd.f32 %v5250_v41, %v3686_v36  ;;  %v3688_v15 = vadd.f32 %v3687_v18, %v7144_v47 }
 0x42d   : > { %4292 = vst [vmem:[%s6999_s8 + $0x3a0] sm:$0xff] %v4036_v52  ;;  %v4037_v33 = vadd.f32 %v5249_v54, %v3395_v48  ;;  %v3399_v17 = vadd.f32 %v3398_v58, %v6976_v55  ;;  %v3691_v4 = vpop.f32.mrf.mxu0  ;;  %v5263_v48 = vld [vmem:[%s5910_s9 + $0x420] sm:$0xff]  ;;  %v5264_v58 = vld [vmem:[%s5910_s9 + $0x298] sm:$0xff] }
 0x42e   : > { %v3400_v35 = vpop.f32.mrf.mxu1  ;;  %4246 = vst [vmem:[%s6999_s8 + $0x230] sm:$0xff] %v3990_v51  ;;  %v3991_v1 = vadd.f32 %v5252_v14, %v3688_v15  ;;  %v3692_v38 = vadd.f32 %v3691_v4, %v7137_v50 }
 0x42f   : > { %4293 = vst [vmem:[%s6999_s8 + $0x3a8] sm:$0xff] %v4037_v33  ;;  %v4040_v42 = vadd.f32 %v5251_v25, %v3399_v17  ;;  %v3401_v44 = vadd.f32 %v3400_v35, %v6985_v3  ;;  %v3693_v12 = vpop.f32.mrf.mxu0  ;;  %v5265_v17 = vld [vmem:[%s5910_s9 + $0x428] sm:$0xff]  ;;  %v5266_v35 = vld [vmem:[%s5910_s9 + $0x2b0] sm:$0xff] }
 0x430   : > { %v3402_v29 = vpop.f32.mrf.mxu1  ;;  %4247 = vst [vmem:[%s6999_s8 + $0x238] sm:$0xff] %v3991_v1  ;;  %v3994_v31 = vadd.f32 %v5254_v6, %v3692_v38  ;;  %v3694_v59 = vadd.f32 %v3693_v12, %v7144_v47 }
 0x431   : > { %4296 = vst [vmem:[%s6999_s8 + $0x3c0] sm:$0xff] %v4040_v42  ;;  %v4041_v2 = vadd.f32 %v5253_v0, %v3401_v44  ;;  %v3403_v56 = vadd.f32 %v3402_v29, %v6976_v55  ;;  %v3695_v11 = vpop.f32.mrf.mxu0  ;;  %v5267_v44 = vld [vmem:[%s5910_s9 + $0x440] sm:$0xff]  ;;  %v5268_v29 = vld [vmem:[%s5910_s9 + $0x2b8] sm:$0xff] }
 0x432   : > { %v3404_v61 = vpop.f32.mrf.mxu1  ;;  %4250 = vst [vmem:[%s6999_s8 + $0x250] sm:$0xff] %v3994_v31  ;;  %v3995_v16 = vadd.f32 %v5256_v21, %v3694_v59  ;;  %v3696_v8 = vadd.f32 %v3695_v11, %v7137_v50 }
 0x433   : > { %4297 = vst [vmem:[%s6999_s8 + $0x3c8] sm:$0xff] %v4041_v2  ;;  %v4044_v32 = vadd.f32 %v5255_v23, %v3403_v56  ;;  %v3405_v62 = vadd.f32 %v3404_v61, %v6985_v3  ;;  %v3697_v46 = vpop.f32.mrf.mxu0  ;;  %v5269_v56 = vld [vmem:[%s5910_s9 + $0x448] sm:$0xff]  ;;  %v5270_v61 = vld [vmem:[%s5910_s9 + $0x2d0] sm:$0xff] }
 0x434   : > { %v3408_v53 = vpop.f32.mrf.mxu1  ;;  %4251 = vst [vmem:[%s6999_s8 + $0x258] sm:$0xff] %v3995_v16  ;;  %v3998_v30 = vadd.f32 %v5258_v24, %v3696_v8  ;;  %v3698_v40 = vadd.f32 %v3697_v46, %v7144_v47 }
 0x435   : > { %4300 = vst [vmem:[%s6999_s8 + $0x3e0] sm:$0xff] %v4044_v32  ;;  %v4045_v49 = vadd.f32 %v5257_v39, %v3405_v62  ;;  %v3409_v63 = vadd.f32 %v3408_v53, %v6976_v55  ;;  %v3701_v19 = vpop.f32.mrf.mxu0  ;;  %v5271_v62 = vld [vmem:[%s5910_s9 + $0x460] sm:$0xff]  ;;  %v5272_v53 = vld [vmem:[%s5910_s9 + $0x2d8] sm:$0xff] }
 0x436   : > { %v3410_v22 = vpop.f32.mrf.mxu1  ;;  %4254 = vst [vmem:[%s6999_s8 + $0x270] sm:$0xff] %v3998_v30  ;;  %v3999_v9 = vadd.f32 %v5260_v27, %v3698_v40  ;;  %v3702_v28 = vadd.f32 %v3701_v19, %v7137_v50 }
 0x437   : > { %4301 = vst [vmem:[%s6999_s8 + $0x3e8] sm:$0xff] %v4045_v49  ;;  %v4048_v34 = vadd.f32 %v5259_v45, %v3409_v63  ;;  %v3411_v10 = vadd.f32 %v3410_v22, %v6985_v3  ;;  %v3703_v37 = vpop.f32.mrf.mxu0  ;;  %v5273_v63 = vld [vmem:[%s5910_s9 + $0x468] sm:$0xff]  ;;  %v5274_v22 = vld [vmem:[%s5910_s9 + $0x2f0] sm:$0xff] }
 0x438   : > { %v3412_v26 = vpop.f32.mrf.mxu1  ;;  %4255 = vst [vmem:[%s6999_s8 + $0x278] sm:$0xff] %v3999_v9  ;;  %v4002_v5 = vadd.f32 %v5262_v7, %v3702_v28  ;;  %v3704_v52 = vadd.f32 %v3703_v37, %v7144_v47 }
 0x439   : > { %4304 = vst [vmem:[%s6999_s8 + $0x400] sm:$0xff] %v4048_v34  ;;  %v4049_v13 = vadd.f32 %v5261_v43, %v3411_v10  ;;  %v3413_v20 = vadd.f32 %v3412_v26, %v6976_v55  ;;  %v3705_v60 = vpop.f32.mrf.mxu0  ;;  %v5275_v10 = vld [vmem:[%s5910_s9 + $0x480] sm:$0xff]  ;;  %v5276_v26 = vld [vmem:[%s5910_s9 + $0x2f8] sm:$0xff] }
 0x43a   : > { %v3414_v57 = vpop.f32.mrf.mxu1  ;;  %4258 = vst [vmem:[%s6999_s8 + $0x290] sm:$0xff] %v4002_v5  ;;  %v4003_v18 = vadd.f32 %v5264_v58, %v3704_v52  ;;  %v3706_v33 = vadd.f32 %v3705_v60, %v7137_v50 }
 0x43b   : > { %4305 = vst [vmem:[%s6999_s8 + $0x408] sm:$0xff] %v4049_v13  ;;  %v4052_v36 = vadd.f32 %v5263_v48, %v3413_v20  ;;  %v3415_v54 = vadd.f32 %v3414_v57, %v6985_v3  ;;  %v3707_v51 = vpop.f32.mrf.mxu0  ;;  %v5277_v20 = vld [vmem:[%s5910_s9 + $0x488] sm:$0xff]  ;;  %v5278_v57 = vld [vmem:[%s5910_s9 + $0x310] sm:$0xff] }
 0x43c   : > { %v3418_v41 = vpop.f32.mrf.mxu1  ;;  %4259 = vst [vmem:[%s6999_s8 + $0x298] sm:$0xff] %v4003_v18  ;;  %v4006_v4 = vadd.f32 %v5266_v35, %v3706_v33  ;;  %v3708_v42 = vadd.f32 %v3707_v51, %v7144_v47 }
 0x43d   : > { %4308 = vst [vmem:[%s6999_s8 + $0x420] sm:$0xff] %v4052_v36  ;;  %v4053_v15 = vadd.f32 %v5265_v17, %v3415_v54  ;;  %v3419_v25 = vadd.f32 %v3418_v41, %v6976_v55  ;;  %v3711_v1 = vpop.f32.mrf.mxu0  ;;  %v5279_v54 = vld [vmem:[%s5910_s9 + $0x4a0] sm:$0xff]  ;;  %v5280_v41 = vld [vmem:[%s5910_s9 + $0x318] sm:$0xff] }
 0x43e   : > { %v3420_v14 = vpop.f32.mrf.mxu1  ;;  %4262 = vst [vmem:[%s6999_s8 + $0x2b0] sm:$0xff] %v4006_v4  ;;  %v4007_v12 = vadd.f32 %v5268_v29, %v3708_v42  ;;  %v3712_v2 = vadd.f32 %v3711_v1, %v7137_v50 }
 0x43f   : > { %4309 = vst [vmem:[%s6999_s8 + $0x428] sm:$0xff] %v4053_v15  ;;  %v4056_v38 = vadd.f32 %v5267_v44, %v3419_v25  ;;  %v3421_v0 = vadd.f32 %v3420_v14, %v6985_v3  ;;  %v3713_v31 = vpop.f32.mrf.mxu0  ;;  %v5281_v25 = vld [vmem:[%s5910_s9 + $0x4a8] sm:$0xff]  ;;  %v5282_v14 = vld [vmem:[%s5910_s9 + $0x330] sm:$0xff] }
 0x440   : > { %v3422_v6 = vpop.f32.mrf.mxu1  ;;  %4263 = vst [vmem:[%s6999_s8 + $0x2b8] sm:$0xff] %v4007_v12  ;;  %v4010_v11 = vadd.f32 %v5270_v61, %v3712_v2  ;;  %v3714_v32 = vadd.f32 %v3713_v31, %v7144_v47 }
 0x441   : > { %4312 = vst [vmem:[%s6999_s8 + $0x440] sm:$0xff] %v4056_v38  ;;  %v4057_v59 = vadd.f32 %v5269_v56, %v3421_v0  ;;  %v3423_v23 = vadd.f32 %v3422_v6, %v6976_v55  ;;  %v3715_v16 = vpop.f32.mrf.mxu0  ;;  %v5283_v0 = vld [vmem:[%s5910_s9 + $0x4c0] sm:$0xff]  ;;  %v5284_v6 = vld [vmem:[%s5910_s9 + $0x338] sm:$0xff] }
 0x442   : > { %v3424_v21 = vpop.f32.mrf.mxu1  ;;  %4266 = vst [vmem:[%s6999_s8 + $0x2d0] sm:$0xff] %v4010_v11  ;;  %v4011_v46 = vadd.f32 %v5272_v53, %v3714_v32  ;;  %v3716_v49 = vadd.f32 %v3715_v16, %v7137_v50 }
 0x443   : > { %4313 = vst [vmem:[%s6999_s8 + $0x448] sm:$0xff] %v4057_v59  ;;  %v4060_v8 = vadd.f32 %v5271_v62, %v3423_v23  ;;  %v3425_v39 = vadd.f32 %v3424_v21, %v6985_v3  ;;  %v3717_v30 = vpop.f32.mrf.mxu0  ;;  %v5285_v23 = vld [vmem:[%s5910_s9 + $0x4c8] sm:$0xff]  ;;  %v5286_v21 = vld [vmem:[%s5910_s9 + $0x350] sm:$0xff] }
 0x444   : > { %v3428_v24 = vpop.f32.mrf.mxu1  ;;  %4267 = vst [vmem:[%s6999_s8 + $0x2d8] sm:$0xff] %v4011_v46  ;;  %v4014_v19 = vadd.f32 %v5274_v22, %v3716_v49  ;;  %v3718_v34 = vadd.f32 %v3717_v30, %v7144_v47 }
 0x445   : > { %4316 = vst [vmem:[%s6999_s8 + $0x460] sm:$0xff] %v4060_v8  ;;  %v4061_v40 = vadd.f32 %v5273_v63, %v3425_v39  ;;  %v3429_v45 = vadd.f32 %v3428_v24, %v6976_v55  ;;  %v3721_v9 = vpop.f32.mrf.mxu0  ;;  %v5287_v39 = vld [vmem:[%s5910_s9 + $0x4e0] sm:$0xff]  ;;  %v5288_v24 = vld [vmem:[%s5910_s9 + $0x358] sm:$0xff] }
 0x446   : > { %v3430_v27 = vpop.f32.mrf.mxu1  ;;  %4270 = vst [vmem:[%s6999_s8 + $0x2f0] sm:$0xff] %v4014_v19  ;;  %v4015_v37 = vadd.f32 %v5276_v26, %v3718_v34  ;;  %v3722_v13 = vadd.f32 %v3721_v9, %v7137_v50 }
 0x447   : > { %4317 = vst [vmem:[%s6999_s8 + $0x468] sm:$0xff] %v4061_v40  ;;  %v4064_v28 = vadd.f32 %v5275_v10, %v3429_v45  ;;  %v3431_v43 = vadd.f32 %v3430_v27, %v6985_v3  ;;  %v3723_v5 = vpop.f32.mrf.mxu0  ;;  %v5289_v45 = vld [vmem:[%s5910_s9 + $0x4e8] sm:$0xff]  ;;  %v5290_v27 = vld [vmem:[%s5910_s9 + $0x370] sm:$0xff] }
 0x448   : > { %v3432_v7 = vpop.f32.mrf.mxu1  ;;  %4271 = vst [vmem:[%s6999_s8 + $0x2f8] sm:$0xff] %v4015_v37  ;;  %v4018_v60 = vadd.f32 %v5278_v57, %v3722_v13  ;;  %v3724_v36 = vadd.f32 %v3723_v5, %v7144_v47 }
 0x449   : > { %4320 = vst [vmem:[%s6999_s8 + $0x480] sm:$0xff] %v4064_v28  ;;  %v4065_v52 = vadd.f32 %v5277_v20, %v3431_v43  ;;  %v3433_v48 = vadd.f32 %v3432_v7, %v6976_v55  ;;  %v3725_v18 = vpop.f32.mrf.mxu0  ;;  %v5291_v43 = vld [vmem:[%s5910_s9 + $0x500] sm:$0xff]  ;;  %v5292_v7 = vld [vmem:[%s5910_s9 + $0x378] sm:$0xff] }
 0x44a   : > { %v3434_v58 = vpop.f32.mrf.mxu1  ;;  %4274 = vst [vmem:[%s6999_s8 + $0x310] sm:$0xff] %v4018_v60  ;;  %v4019_v51 = vadd.f32 %v5280_v41, %v3724_v36  ;;  %v3726_v15 = vadd.f32 %v3725_v18, %v7137_v50 }
 0x44b   : > { %4321 = vst [vmem:[%s6999_s8 + $0x488] sm:$0xff] %v4065_v52  ;;  %v4068_v33 = vadd.f32 %v5279_v54, %v3433_v48  ;;  %v3435_v17 = vadd.f32 %v3434_v58, %v6985_v3  ;;  %v3727_v4 = vpop.f32.mrf.mxu0  ;;  %v5293_v48 = vld [vmem:[%s5910_s9 + $0x508] sm:$0xff]  ;;  %v5294_v58 = vld [vmem:[%s5910_s9 + $0x390] sm:$0xff] }
 0x44c   : > { %v3438_v35 = vpop.f32.mrf.mxu1  ;;  %4275 = vst [vmem:[%s6999_s8 + $0x318] sm:$0xff] %v4019_v51  ;;  %v4022_v1 = vadd.f32 %v5282_v14, %v3726_v15  ;;  %v3728_v38 = vadd.f32 %v3727_v4, %v7144_v47 }
 0x44d   : > { %4324 = vst [vmem:[%s6999_s8 + $0x4a0] sm:$0xff] %v4068_v33  ;;  %v4069_v42 = vadd.f32 %v5281_v25, %v3435_v17  ;;  %v3439_v44 = vadd.f32 %v3438_v35, %v6976_v55  ;;  %v3731_v12 = vpop.f32.mrf.mxu0  ;;  %v5295_v17 = vld [vmem:[%s5910_s9 + $0x520] sm:$0xff]  ;;  %v5296_v35 = vld [vmem:[%s5910_s9 + $0x398] sm:$0xff] }
 0x44e   : > { %v3440_v29 = vpop.f32.mrf.mxu1  ;;  %4278 = vst [vmem:[%s6999_s8 + $0x330] sm:$0xff] %v4022_v1  ;;  %v4023_v31 = vadd.f32 %v5284_v6, %v3728_v38  ;;  %v3732_v59 = vadd.f32 %v3731_v12, %v7137_v50 }
 0x44f   : > { %4325 = vst [vmem:[%s6999_s8 + $0x4a8] sm:$0xff] %v4069_v42  ;;  %v4072_v2 = vadd.f32 %v5283_v0, %v3439_v44  ;;  %v3441_v56 = vadd.f32 %v3440_v29, %v6985_v3  ;;  %v3733_v11 = vpop.f32.mrf.mxu0  ;;  %v5297_v44 = vld [vmem:[%s5910_s9 + $0x528] sm:$0xff]  ;;  %v5298_v29 = vld [vmem:[%s5910_s9 + $0x3b0] sm:$0xff] }
 0x450   : > { %v3442_v61 = vpop.f32.mrf.mxu1  ;;  %4279 = vst [vmem:[%s6999_s8 + $0x338] sm:$0xff] %v4023_v31  ;;  %v4026_v16 = vadd.f32 %v5286_v21, %v3732_v59  ;;  %v3734_v8 = vadd.f32 %v3733_v11, %v7144_v47 }
 0x451   : > { %4328 = vst [vmem:[%s6999_s8 + $0x4c0] sm:$0xff] %v4072_v2  ;;  %v4073_v32 = vadd.f32 %v5285_v23, %v3441_v56  ;;  %v3443_v62 = vadd.f32 %v3442_v61, %v6976_v55  ;;  %v3735_v46 = vpop.f32.mrf.mxu0  ;;  %v5299_v56 = vld [vmem:[%s5910_s9 + $0x540] sm:$0xff]  ;;  %v5300_v61 = vld [vmem:[%s5910_s9 + $0x3b8] sm:$0xff] }
 0x452   : > { %v3444_v53 = vpop.f32.mrf.mxu1  ;;  %4282 = vst [vmem:[%s6999_s8 + $0x350] sm:$0xff] %v4026_v16  ;;  %v4027_v30 = vadd.f32 %v5288_v24, %v3734_v8  ;;  %v3736_v40 = vadd.f32 %v3735_v46, %v7137_v50 }
 0x453   : > { %4329 = vst [vmem:[%s6999_s8 + $0x4c8] sm:$0xff] %v4073_v32  ;;  %v4076_v49 = vadd.f32 %v5287_v39, %v3443_v62  ;;  %v3445_v63 = vadd.f32 %v3444_v53, %v6985_v3  ;;  %v3737_v19 = vpop.f32.mrf.mxu0  ;;  %v5301_v62 = vld [vmem:[%s5910_s9 + $0x548] sm:$0xff]  ;;  %v5302_v53 = vld [vmem:[%s5910_s9 + $0x3d0] sm:$0xff] }
 0x454   : > { %v3448_v22 = vpop.f32.mrf.mxu1  ;;  %4283 = vst [vmem:[%s6999_s8 + $0x358] sm:$0xff] %v4027_v30  ;;  %v4030_v9 = vadd.f32 %v5290_v27, %v3736_v40  ;;  %v3738_v28 = vadd.f32 %v3737_v19, %v7144_v47 }
 0x455   : > { %4332 = vst [vmem:[%s6999_s8 + $0x4e0] sm:$0xff] %v4076_v49  ;;  %v4077_v34 = vadd.f32 %v5289_v45, %v3445_v63  ;;  %v3449_v10 = vadd.f32 %v3448_v22, %v6976_v55  ;;  %v3741_v37 = vpop.f32.mrf.mxu0  ;;  %v5303_v63 = vld [vmem:[%s5910_s9 + $0x560] sm:$0xff]  ;;  %v5304_v22 = vld [vmem:[%s5910_s9 + $0x3d8] sm:$0xff] }
 0x456   : > { %v3450_v26 = vpop.f32.mrf.mxu1  ;;  %4286 = vst [vmem:[%s6999_s8 + $0x370] sm:$0xff] %v4030_v9  ;;  %v4031_v5 = vadd.f32 %v5292_v7, %v3738_v28  ;;  %v3742_v52 = vadd.f32 %v3741_v37, %v7137_v50 }
 0x457   : > { %4333 = vst [vmem:[%s6999_s8 + $0x4e8] sm:$0xff] %v4077_v34  ;;  %v4080_v13 = vadd.f32 %v5291_v43, %v3449_v10  ;;  %v3451_v20 = vadd.f32 %v3450_v26, %v6985_v3  ;;  %v3743_v60 = vpop.f32.mrf.mxu0  ;;  %v5305_v10 = vld [vmem:[%s5910_s9 + $0x568] sm:$0xff]  ;;  %v5306_v26 = vld [vmem:[%s5910_s9 + $0x3f0] sm:$0xff] }
 0x458   : > { %v3452_v57 = vpop.f32.mrf.mxu1  ;;  %4287 = vst [vmem:[%s6999_s8 + $0x378] sm:$0xff] %v4031_v5  ;;  %v4034_v18 = vadd.f32 %v5294_v58, %v3742_v52  ;;  %v3744_v33 = vadd.f32 %v3743_v60, %v7144_v47 }
 0x459   : > { %4336 = vst [vmem:[%s6999_s8 + $0x500] sm:$0xff] %v4080_v13  ;;  %v4081_v36 = vadd.f32 %v5293_v48, %v3451_v20  ;;  %v3453_v54 = vadd.f32 %v3452_v57, %v6976_v55  ;;  %v3745_v51 = vpop.f32.mrf.mxu0  ;;  %v5307_v20 = vld [vmem:[%s5910_s9 + $0x580] sm:$0xff]  ;;  %v5308_v57 = vld [vmem:[%s5910_s9 + $0x3f8] sm:$0xff] }
 0x45a   : > { %v3454_v41 = vpop.f32.mrf.mxu1  ;;  %4290 = vst [vmem:[%s6999_s8 + $0x390] sm:$0xff] %v4034_v18  ;;  %v4035_v4 = vadd.f32 %v5296_v35, %v3744_v33  ;;  %v3746_v42 = vadd.f32 %v3745_v51, %v7137_v50 }
 0x45b   : > { %4337 = vst [vmem:[%s6999_s8 + $0x508] sm:$0xff] %v4081_v36  ;;  %v4084_v15 = vadd.f32 %v5295_v17, %v3453_v54  ;;  %v3455_v25 = vadd.f32 %v3454_v41, %v6985_v3  ;;  %v3747_v1 = vpop.f32.mrf.mxu0  ;;  %v5309_v54 = vld [vmem:[%s5910_s9 + $0x588] sm:$0xff]  ;;  %v5310_v41 = vld [vmem:[%s5910_s9 + $0x410] sm:$0xff] }
 0x45c   : > { %v3458_v14 = vpop.f32.mrf.mxu1  ;;  %4291 = vst [vmem:[%s6999_s8 + $0x398] sm:$0xff] %v4035_v4  ;;  %v4038_v12 = vadd.f32 %v5298_v29, %v3746_v42  ;;  %v3748_v2 = vadd.f32 %v3747_v1, %v7144_v47 }
 0x45d   : > { %4340 = vst [vmem:[%s6999_s8 + $0x520] sm:$0xff] %v4084_v15  ;;  %v4085_v38 = vadd.f32 %v5297_v44, %v3455_v25  ;;  %v3459_v0 = vadd.f32 %v3458_v14, %v6976_v55  ;;  %v3751_v31 = vpop.f32.mrf.mxu0  ;;  %v5311_v25 = vld [vmem:[%s5910_s9 + $0x5a0] sm:$0xff]  ;;  %v5312_v14 = vld [vmem:[%s5910_s9 + $0x418] sm:$0xff] }
 0x45e   : > { %v3460_v6 = vpop.f32.mrf.mxu1  ;;  %4294 = vst [vmem:[%s6999_s8 + $0x3b0] sm:$0xff] %v4038_v12  ;;  %v4039_v11 = vadd.f32 %v5300_v61, %v3748_v2  ;;  %v3752_v32 = vadd.f32 %v3751_v31, %v7137_v50 }
 0x45f   : > { %4341 = vst [vmem:[%s6999_s8 + $0x528] sm:$0xff] %v4085_v38  ;;  %v4088_v59 = vadd.f32 %v5299_v56, %v3459_v0  ;;  %v3461_v23 = vadd.f32 %v3460_v6, %v6985_v3  ;;  %v3753_v16 = vpop.f32.mrf.mxu0  ;;  %v5313_v0 = vld [vmem:[%s5910_s9 + $0x5a8] sm:$0xff]  ;;  %v5314_v6 = vld [vmem:[%s5910_s9 + $0x430] sm:$0xff] }
 0x460   : > { %v3462_v21 = vpop.f32.mrf.mxu1  ;;  %4295 = vst [vmem:[%s6999_s8 + $0x3b8] sm:$0xff] %v4039_v11  ;;  %v4042_v46 = vadd.f32 %v5302_v53, %v3752_v32  ;;  %v3754_v49 = vadd.f32 %v3753_v16, %v7144_v47 }
 0x461   : > { %4344 = vst [vmem:[%s6999_s8 + $0x540] sm:$0xff] %v4088_v59  ;;  %v4089_v8 = vadd.f32 %v5301_v62, %v3461_v23  ;;  %v3463_v39 = vadd.f32 %v3462_v21, %v6976_v55  ;;  %v3755_v30 = vpop.f32.mrf.mxu0  ;;  %v5315_v23 = vld [vmem:[%s5910_s9 + $0x5c0] sm:$0xff]  ;;  %v5316_v21 = vld [vmem:[%s5910_s9 + $0x438] sm:$0xff] }
 0x462   : > { %v3464_v24 = vpop.f32.mrf.mxu1  ;;  %4298 = vst [vmem:[%s6999_s8 + $0x3d0] sm:$0xff] %v4042_v46  ;;  %v4043_v19 = vadd.f32 %v5304_v22, %v3754_v49  ;;  %v3756_v34 = vadd.f32 %v3755_v30, %v7137_v50 }
 0x463   : > { %4345 = vst [vmem:[%s6999_s8 + $0x548] sm:$0xff] %v4089_v8  ;;  %v4092_v40 = vadd.f32 %v5303_v63, %v3463_v39  ;;  %v3465_v45 = vadd.f32 %v3464_v24, %v6985_v3  ;;  %v3757_v9 = vpop.f32.mrf.mxu0  ;;  %v5317_v39 = vld [vmem:[%s5910_s9 + $0x5c8] sm:$0xff]  ;;  %v5318_v24 = vld [vmem:[%s5910_s9 + $0x450] sm:$0xff] }
 0x464   : > { %v3468_v27 = vpop.f32.mrf.mxu1  ;;  %4299 = vst [vmem:[%s6999_s8 + $0x3d8] sm:$0xff] %v4043_v19  ;;  %v4046_v37 = vadd.f32 %v5306_v26, %v3756_v34  ;;  %v3758_v13 = vadd.f32 %v3757_v9, %v7144_v47 }
 0x465   : > { %4348 = vst [vmem:[%s6999_s8 + $0x560] sm:$0xff] %v4092_v40  ;;  %v4093_v28 = vadd.f32 %v5305_v10, %v3465_v45  ;;  %v3469_v43 = vadd.f32 %v3468_v27, %v6976_v55  ;;  %v3761_v5 = vpop.f32.mrf.mxu0  ;;  %v5319_v45 = vld [vmem:[%s5910_s9 + $0x5e0] sm:$0xff]  ;;  %v5320_v27 = vld [vmem:[%s5910_s9 + $0x458] sm:$0xff] }
 0x466   : > { %v3470_v7 = vpop.f32.mrf.mxu1  ;;  %4302 = vst [vmem:[%s6999_s8 + $0x3f0] sm:$0xff] %v4046_v37  ;;  %v4047_v60 = vadd.f32 %v5308_v57, %v3758_v13  ;;  %v3762_v36 = vadd.f32 %v3761_v5, %v7137_v50 }
 0x467   : > { %4349 = vst [vmem:[%s6999_s8 + $0x568] sm:$0xff] %v4093_v28  ;;  %v4096_v52 = vadd.f32 %v5307_v20, %v3469_v43  ;;  %v3471_v48 = vadd.f32 %v3470_v7, %v6985_v3  ;;  %v3763_v18 = vpop.f32.mrf.mxu0  ;;  %v5321_v43 = vld [vmem:[%s5910_s9 + $0x5e8] sm:$0xff]  ;;  %v5322_v7 = vld [vmem:[%s5910_s9 + $0x470] sm:$0xff] }
 0x468   : > { %v3472_v58 = vpop.f32.mrf.mxu1  ;;  %4303 = vst [vmem:[%s6999_s8 + $0x3f8] sm:$0xff] %v4047_v60  ;;  %v4050_v51 = vadd.f32 %v5310_v41, %v3762_v36  ;;  %v3764_v15 = vadd.f32 %v3763_v18, %v7144_v47 }
 0x469   : > { %4352 = vst [vmem:[%s6999_s8 + $0x580] sm:$0xff] %v4096_v52  ;;  %v4097_v33 = vadd.f32 %v5309_v54, %v3471_v48  ;;  %v3473_v17 = vadd.f32 %v3472_v58, %v6976_v55  ;;  %v3765_v4 = vpop.f32.mrf.mxu0  ;;  %v5323_v48 = vld [vmem:[%s5910_s9 + $0x600] sm:$0xff]  ;;  %v5324_v58 = vld [vmem:[%s5910_s9 + $0x478] sm:$0xff] }
 0x46a   : > { %v3474_v35 = vpop.f32.mrf.mxu1  ;;  %4306 = vst [vmem:[%s6999_s8 + $0x410] sm:$0xff] %v4050_v51  ;;  %v4051_v1 = vadd.f32 %v5312_v14, %v3764_v15  ;;  %v3766_v38 = vadd.f32 %v3765_v4, %v7137_v50 }
 0x46b   : > { %4353 = vst [vmem:[%s6999_s8 + $0x588] sm:$0xff] %v4097_v33  ;;  %v4100_v42 = vadd.f32 %v5311_v25, %v3473_v17  ;;  %v3475_v44 = vadd.f32 %v3474_v35, %v6985_v3  ;;  %v3767_v12 = vpop.f32.mrf.mxu0  ;;  %v5325_v17 = vld [vmem:[%s5910_s9 + $0x608] sm:$0xff]  ;;  %v5326_v35 = vld [vmem:[%s5910_s9 + $0x490] sm:$0xff] }
 0x46c   : > { %v3478_v29 = vpop.f32.mrf.mxu1  ;;  %4307 = vst [vmem:[%s6999_s8 + $0x418] sm:$0xff] %v4051_v1  ;;  %v4054_v31 = vadd.f32 %v5314_v6, %v3766_v38  ;;  %v3768_v59 = vadd.f32 %v3767_v12, %v7144_v47 }
 0x46d   : > { %4356 = vst [vmem:[%s6999_s8 + $0x5a0] sm:$0xff] %v4100_v42  ;;  %v4101_v2 = vadd.f32 %v5313_v0, %v3475_v44  ;;  %v3479_v56 = vadd.f32 %v3478_v29, %v6976_v55  ;;  %v3771_v11 = vpop.f32.mrf.mxu0  ;;  %v5327_v44 = vld [vmem:[%s5910_s9 + $0x620] sm:$0xff]  ;;  %v5328_v29 = vld [vmem:[%s5910_s9 + $0x498] sm:$0xff] }
 0x46e   : > { %v3480_v61 = vpop.f32.mrf.mxu1  ;;  %4310 = vst [vmem:[%s6999_s8 + $0x430] sm:$0xff] %v4054_v31  ;;  %v4055_v16 = vadd.f32 %v5316_v21, %v3768_v59  ;;  %v3772_v8 = vadd.f32 %v3771_v11, %v7137_v50 }
 0x46f   : > { %4357 = vst [vmem:[%s6999_s8 + $0x5a8] sm:$0xff] %v4101_v2  ;;  %v4104_v32 = vadd.f32 %v5315_v23, %v3479_v56  ;;  %v3481_v62 = vadd.f32 %v3480_v61, %v6985_v3  ;;  %v3773_v46 = vpop.f32.mrf.mxu0  ;;  %v5329_v56 = vld [vmem:[%s5910_s9 + $0x628] sm:$0xff]  ;;  %v5330_v61 = vld [vmem:[%s5910_s9 + $0x4b0] sm:$0xff] }
 0x470   : > { %v3482_v53 = vpop.f32.mrf.mxu1  ;;  %4311 = vst [vmem:[%s6999_s8 + $0x438] sm:$0xff] %v4055_v16  ;;  %v4058_v30 = vadd.f32 %v5318_v24, %v3772_v8  ;;  %v3774_v40 = vadd.f32 %v3773_v46, %v7144_v47 }
 0x471   : > { %4360 = vst [vmem:[%s6999_s8 + $0x5c0] sm:$0xff] %v4104_v32  ;;  %v4105_v49 = vadd.f32 %v5317_v39, %v3481_v62  ;;  %v3483_v63 = vadd.f32 %v3482_v53, %v6976_v55  ;;  %v3775_v19 = vpop.f32.mrf.mxu0  ;;  %v5331_v62 = vld [vmem:[%s5910_s9 + $0x640] sm:$0xff]  ;;  %v5332_v53 = vld [vmem:[%s5910_s9 + $0x4b8] sm:$0xff] }
 0x472   : > { %v3484_v22 = vpop.f32.mrf.mxu1  ;;  %4314 = vst [vmem:[%s6999_s8 + $0x450] sm:$0xff] %v4058_v30  ;;  %v4059_v9 = vadd.f32 %v5320_v27, %v3774_v40  ;;  %v3776_v28 = vadd.f32 %v3775_v19, %v7137_v50 }
 0x473   : > { %4361 = vst [vmem:[%s6999_s8 + $0x5c8] sm:$0xff] %v4105_v49  ;;  %v4108_v34 = vadd.f32 %v5319_v45, %v3483_v63  ;;  %v3485_v10 = vadd.f32 %v3484_v22, %v6985_v3  ;;  %v3777_v37 = vpop.f32.mrf.mxu0  ;;  %v5333_v63 = vld [vmem:[%s5910_s9 + $0x648] sm:$0xff]  ;;  %v5334_v22 = vld [vmem:[%s5910_s9 + $0x4d0] sm:$0xff] }
 0x474   : > { %v3488_v26 = vpop.f32.mrf.mxu1  ;;  %4315 = vst [vmem:[%s6999_s8 + $0x458] sm:$0xff] %v4059_v9  ;;  %v4062_v5 = vadd.f32 %v5322_v7, %v3776_v28  ;;  %v3778_v52 = vadd.f32 %v3777_v37, %v7144_v47 }
 0x475   : > { %4364 = vst [vmem:[%s6999_s8 + $0x5e0] sm:$0xff] %v4108_v34  ;;  %v4109_v13 = vadd.f32 %v5321_v43, %v3485_v10  ;;  %v3489_v20 = vadd.f32 %v3488_v26, %v6976_v55  ;;  %v3781_v60 = vpop.f32.mrf.mxu0  ;;  %v5335_v10 = vld [vmem:[%s5910_s9 + $0x660] sm:$0xff]  ;;  %v5336_v26 = vld [vmem:[%s5910_s9 + $0x4d8] sm:$0xff] }
 0x476   : > { %v3490_v57 = vpop.f32.mrf.mxu1  ;;  %4318 = vst [vmem:[%s6999_s8 + $0x470] sm:$0xff] %v4062_v5  ;;  %v4063_v18 = vadd.f32 %v5324_v58, %v3778_v52  ;;  %v3782_v33 = vadd.f32 %v3781_v60, %v7137_v50 }
 0x477   : > { %4365 = vst [vmem:[%s6999_s8 + $0x5e8] sm:$0xff] %v4109_v13  ;;  %v4112_v36 = vadd.f32 %v5323_v48, %v3489_v20  ;;  %v3491_v54 = vadd.f32 %v3490_v57, %v6985_v3  ;;  %v3783_v51 = vpop.f32.mrf.mxu0  ;;  %v5337_v20 = vld [vmem:[%s5910_s9 + $0x668] sm:$0xff]  ;;  %v5338_v57 = vld [vmem:[%s5910_s9 + $0x4f0] sm:$0xff] }
 0x478   : > { %v3492_v41 = vpop.f32.mrf.mxu1  ;;  %4319 = vst [vmem:[%s6999_s8 + $0x478] sm:$0xff] %v4063_v18  ;;  %v4066_v4 = vadd.f32 %v5326_v35, %v3782_v33  ;;  %v3784_v42 = vadd.f32 %v3783_v51, %v7144_v47 }
 0x479   : > { %4368 = vst [vmem:[%s6999_s8 + $0x600] sm:$0xff] %v4112_v36  ;;  %v4113_v15 = vadd.f32 %v5325_v17, %v3491_v54  ;;  %v3493_v25 = vadd.f32 %v3492_v41, %v6976_v55  ;;  %v3785_v1 = vpop.f32.mrf.mxu0  ;;  %v5339_v54 = vld [vmem:[%s5910_s9 + $0x680] sm:$0xff]  ;;  %v5340_v41 = vld [vmem:[%s5910_s9 + $0x4f8] sm:$0xff] }
 0x47a   : > { %v3494_v14 = vpop.f32.mrf.mxu1  ;;  %4322 = vst [vmem:[%s6999_s8 + $0x490] sm:$0xff] %v4066_v4  ;;  %v4067_v12 = vadd.f32 %v5328_v29, %v3784_v42  ;;  %v3786_v2 = vadd.f32 %v3785_v1, %v7137_v50 }
 0x47b   : > { %4369 = vst [vmem:[%s6999_s8 + $0x608] sm:$0xff] %v4113_v15  ;;  %v4116_v38 = vadd.f32 %v5327_v44, %v3493_v25  ;;  %v3495_v0 = vadd.f32 %v3494_v14, %v6985_v3  ;;  %v3787_v31 = vpop.f32.mrf.mxu0  ;;  %v5341_v25 = vld [vmem:[%s5910_s9 + $0x688] sm:$0xff]  ;;  %v5342_v14 = vld [vmem:[%s5910_s9 + $0x510] sm:$0xff] }
 0x47c   : > { %v3498_v6 = vpop.f32.mrf.mxu1  ;;  %4323 = vst [vmem:[%s6999_s8 + $0x498] sm:$0xff] %v4067_v12  ;;  %v4070_v11 = vadd.f32 %v5330_v61, %v3786_v2  ;;  %v3788_v32 = vadd.f32 %v3787_v31, %v7144_v47 }
 0x47d   : > { %4372 = vst [vmem:[%s6999_s8 + $0x620] sm:$0xff] %v4116_v38  ;;  %v4117_v59 = vadd.f32 %v5329_v56, %v3495_v0  ;;  %v3499_v23 = vadd.f32 %v3498_v6, %v6976_v55  ;;  %v3791_v16 = vpop.f32.mrf.mxu0  ;;  %v5343_v0 = vld [vmem:[%s5910_s9 + $0x6a0] sm:$0xff]  ;;  %v5344_v6 = vld [vmem:[%s5910_s9 + $0x518] sm:$0xff] }
 0x47e   : > { %v3500_v21 = vpop.f32.mrf.mxu1  ;;  %4326 = vst [vmem:[%s6999_s8 + $0x4b0] sm:$0xff] %v4070_v11  ;;  %v4071_v46 = vadd.f32 %v5332_v53, %v3788_v32  ;;  %v3792_v49 = vadd.f32 %v3791_v16, %v7137_v50 }
 0x47f   : > { %4373 = vst [vmem:[%s6999_s8 + $0x628] sm:$0xff] %v4117_v59  ;;  %v4120_v8 = vadd.f32 %v5331_v62, %v3499_v23  ;;  %v3501_v39 = vadd.f32 %v3500_v21, %v6985_v3  ;;  %v3793_v30 = vpop.f32.mrf.mxu0  ;;  %v5345_v23 = vld [vmem:[%s5910_s9 + $0x6a8] sm:$0xff]  ;;  %v5346_v21 = vld [vmem:[%s5910_s9 + $0x530] sm:$0xff] }
 0x480   : > { %v3502_v24 = vpop.f32.mrf.mxu1  ;;  %4327 = vst [vmem:[%s6999_s8 + $0x4b8] sm:$0xff] %v4071_v46  ;;  %v4074_v19 = vadd.f32 %v5334_v22, %v3792_v49  ;;  %v3794_v34 = vadd.f32 %v3793_v30, %v7144_v47 }
 0x481   : > { %4376 = vst [vmem:[%s6999_s8 + $0x640] sm:$0xff] %v4120_v8  ;;  %v4121_v40 = vadd.f32 %v5333_v63, %v3501_v39  ;;  %v3503_v45 = vadd.f32 %v3502_v24, %v6976_v55  ;;  %v3795_v9 = vpop.f32.mrf.mxu0  ;;  %v5347_v39 = vld [vmem:[%s5910_s9 + $0x6c0] sm:$0xff]  ;;  %v5348_v24 = vld [vmem:[%s5910_s9 + $0x538] sm:$0xff] }
 0x482   : > { %v3504_v27 = vpop.f32.mrf.mxu1  ;;  %4330 = vst [vmem:[%s6999_s8 + $0x4d0] sm:$0xff] %v4074_v19  ;;  %v4075_v37 = vadd.f32 %v5336_v26, %v3794_v34  ;;  %v3796_v13 = vadd.f32 %v3795_v9, %v7137_v50 }
 0x483   : > { %4377 = vst [vmem:[%s6999_s8 + $0x648] sm:$0xff] %v4121_v40  ;;  %v4124_v28 = vadd.f32 %v5335_v10, %v3503_v45  ;;  %v3505_v43 = vadd.f32 %v3504_v27, %v6985_v3  ;;  %v3797_v5 = vpop.f32.mrf.mxu0  ;;  %v5349_v45 = vld [vmem:[%s5910_s9 + $0x6c8] sm:$0xff]  ;;  %v5350_v27 = vld [vmem:[%s5910_s9 + $0x550] sm:$0xff] }
 0x484   : > { %v3508_v7 = vpop.f32.mrf.mxu1  ;;  %4331 = vst [vmem:[%s6999_s8 + $0x4d8] sm:$0xff] %v4075_v37  ;;  %v4078_v60 = vadd.f32 %v5338_v57, %v3796_v13  ;;  %v3798_v36 = vadd.f32 %v3797_v5, %v7144_v47 }
 0x485   : > { %4380 = vst [vmem:[%s6999_s8 + $0x660] sm:$0xff] %v4124_v28  ;;  %v4125_v52 = vadd.f32 %v5337_v20, %v3505_v43  ;;  %v3509_v48 = vadd.f32 %v3508_v7, %v6976_v55  ;;  %v3801_v18 = vpop.f32.mrf.mxu0  ;;  %v5351_v43 = vld [vmem:[%s5910_s9 + $0x6e0] sm:$0xff]  ;;  %v5352_v7 = vld [vmem:[%s5910_s9 + $0x558] sm:$0xff] }
 0x486   : > { %v3510_v58 = vpop.f32.mrf.mxu1  ;;  %4334 = vst [vmem:[%s6999_s8 + $0x4f0] sm:$0xff] %v4078_v60  ;;  %v4079_v51 = vadd.f32 %v5340_v41, %v3798_v36  ;;  %v3802_v15 = vadd.f32 %v3801_v18, %v7137_v50 }
 0x487   : > { %4381 = vst [vmem:[%s6999_s8 + $0x668] sm:$0xff] %v4125_v52  ;;  %v4128_v33 = vadd.f32 %v5339_v54, %v3509_v48  ;;  %v3511_v17 = vadd.f32 %v3510_v58, %v6985_v3  ;;  %v3803_v4 = vpop.f32.mrf.mxu0  ;;  %v5353_v48 = vld [vmem:[%s5910_s9 + $0x6e8] sm:$0xff]  ;;  %v5354_v58 = vld [vmem:[%s5910_s9 + $0x570] sm:$0xff] }
 0x488   : > { %v3512_v35 = vpop.f32.mrf.mxu1  ;;  %4335 = vst [vmem:[%s6999_s8 + $0x4f8] sm:$0xff] %v4079_v51  ;;  %v4082_v1 = vadd.f32 %v5342_v14, %v3802_v15  ;;  %v3804_v38 = vadd.f32 %v3803_v4, %v7144_v47 }
 0x489   : > { %4384 = vst [vmem:[%s6999_s8 + $0x680] sm:$0xff] %v4128_v33  ;;  %v4129_v42 = vadd.f32 %v5341_v25, %v3511_v17  ;;  %v3513_v44 = vadd.f32 %v3512_v35, %v6976_v55  ;;  %v3805_v12 = vpop.f32.mrf.mxu0  ;;  %v5355_v17 = vld [vmem:[%s5910_s9 + $0x700] sm:$0xff]  ;;  %v5356_v35 = vld [vmem:[%s5910_s9 + $0x578] sm:$0xff] }
 0x48a   : > { %v3514_v29 = vpop.f32.mrf.mxu1  ;;  %4338 = vst [vmem:[%s6999_s8 + $0x510] sm:$0xff] %v4082_v1  ;;  %v4083_v31 = vadd.f32 %v5344_v6, %v3804_v38  ;;  %v3806_v59 = vadd.f32 %v3805_v12, %v7137_v50 }
 0x48b   : > { %4385 = vst [vmem:[%s6999_s8 + $0x688] sm:$0xff] %v4129_v42  ;;  %v4132_v2 = vadd.f32 %v5343_v0, %v3513_v44  ;;  %v3515_v56 = vadd.f32 %v3514_v29, %v6985_v3  ;;  %v3807_v11 = vpop.f32.mrf.mxu0  ;;  %v5357_v44 = vld [vmem:[%s5910_s9 + $0x708] sm:$0xff]  ;;  %v5358_v29 = vld [vmem:[%s5910_s9 + $0x590] sm:$0xff] }
 0x48c   : > { %v3518_v61 = vpop.f32.mrf.mxu1  ;;  %4339 = vst [vmem:[%s6999_s8 + $0x518] sm:$0xff] %v4083_v31  ;;  %v4086_v16 = vadd.f32 %v5346_v21, %v3806_v59  ;;  %v3808_v8 = vadd.f32 %v3807_v11, %v7144_v47 }
 0x48d   : > { %4388 = vst [vmem:[%s6999_s8 + $0x6a0] sm:$0xff] %v4132_v2  ;;  %v4133_v32 = vadd.f32 %v5345_v23, %v3515_v56  ;;  %v3519_v62 = vadd.f32 %v3518_v61, %v6976_v55  ;;  %v3811_v46 = vpop.f32.mrf.mxu0  ;;  %v5359_v56 = vld [vmem:[%s5910_s9 + $0x720] sm:$0xff]  ;;  %v5360_v61 = vld [vmem:[%s5910_s9 + $0x598] sm:$0xff] }
 0x48e   : > { %v3520_v53 = vpop.f32.mrf.mxu1  ;;  %4342 = vst [vmem:[%s6999_s8 + $0x530] sm:$0xff] %v4086_v16  ;;  %v4087_v30 = vadd.f32 %v5348_v24, %v3808_v8  ;;  %v3812_v40 = vadd.f32 %v3811_v46, %v7137_v50 }
 0x48f   : > { %4389 = vst [vmem:[%s6999_s8 + $0x6a8] sm:$0xff] %v4133_v32  ;;  %v4136_v49 = vadd.f32 %v5347_v39, %v3519_v62  ;;  %v3521_v63 = vadd.f32 %v3520_v53, %v6985_v3  ;;  %v3813_v19 = vpop.f32.mrf.mxu0  ;;  %v5361_v62 = vld [vmem:[%s5910_s9 + $0x728] sm:$0xff]  ;;  %v5362_v53 = vld [vmem:[%s5910_s9 + $0x5b0] sm:$0xff] }
 0x490   : > { %v3522_v22 = vpop.f32.mrf.mxu1  ;;  %4343 = vst [vmem:[%s6999_s8 + $0x538] sm:$0xff] %v4087_v30  ;;  %v4090_v9 = vadd.f32 %v5350_v27, %v3812_v40  ;;  %v3814_v28 = vadd.f32 %v3813_v19, %v7144_v47 }
 0x491   : > { %4392 = vst [vmem:[%s6999_s8 + $0x6c0] sm:$0xff] %v4136_v49  ;;  %v4137_v34 = vadd.f32 %v5349_v45, %v3521_v63  ;;  %v3523_v10 = vadd.f32 %v3522_v22, %v6976_v55  ;;  %v3815_v37 = vpop.f32.mrf.mxu0  ;;  %v5363_v63 = vld [vmem:[%s5910_s9 + $0x740] sm:$0xff]  ;;  %v5364_v22 = vld [vmem:[%s5910_s9 + $0x5b8] sm:$0xff] }
 0x492   : > { %v3524_v26 = vpop.f32.mrf.mxu1  ;;  %4346 = vst [vmem:[%s6999_s8 + $0x550] sm:$0xff] %v4090_v9  ;;  %v4091_v5 = vadd.f32 %v5352_v7, %v3814_v28  ;;  %v3816_v52 = vadd.f32 %v3815_v37, %v7137_v50 }
 0x493   : > { %4393 = vst [vmem:[%s6999_s8 + $0x6c8] sm:$0xff] %v4137_v34  ;;  %v4140_v13 = vadd.f32 %v5351_v43, %v3523_v10  ;;  %v3525_v20 = vadd.f32 %v3524_v26, %v6985_v3  ;;  %v3817_v60 = vpop.f32.mrf.mxu0  ;;  %v5365_v10 = vld [vmem:[%s5910_s9 + $0x748] sm:$0xff]  ;;  %v5366_v26 = vld [vmem:[%s5910_s9 + $0x5d0] sm:$0xff] }
 0x494   : > { %v3528_v57 = vpop.f32.mrf.mxu1  ;;  %4347 = vst [vmem:[%s6999_s8 + $0x558] sm:$0xff] %v4091_v5  ;;  %v4094_v18 = vadd.f32 %v5354_v58, %v3816_v52  ;;  %v3818_v33 = vadd.f32 %v3817_v60, %v7144_v47 }
 0x495   : > { %4396 = vst [vmem:[%s6999_s8 + $0x6e0] sm:$0xff] %v4140_v13  ;;  %v4141_v36 = vadd.f32 %v5353_v48, %v3525_v20  ;;  %v3529_v54 = vadd.f32 %v3528_v57, %v6976_v55  ;;  %v3821_v51 = vpop.f32.mrf.mxu0  ;;  %v5367_v20 = vld [vmem:[%s5910_s9 + $0x760] sm:$0xff]  ;;  %v5368_v57 = vld [vmem:[%s5910_s9 + $0x5d8] sm:$0xff] }
 0x496   : > { %v3530_v41 = vpop.f32.mrf.mxu1  ;;  %4350 = vst [vmem:[%s6999_s8 + $0x570] sm:$0xff] %v4094_v18  ;;  %v4095_v4 = vadd.f32 %v5356_v35, %v3818_v33  ;;  %v3822_v42 = vadd.f32 %v3821_v51, %v7137_v50 }
 0x497   : > { %4397 = vst [vmem:[%s6999_s8 + $0x6e8] sm:$0xff] %v4141_v36  ;;  %v4144_v15 = vadd.f32 %v5355_v17, %v3529_v54  ;;  %v3531_v25 = vadd.f32 %v3530_v41, %v6985_v3  ;;  %v3823_v1 = vpop.f32.mrf.mxu0  ;;  %v5369_v54 = vld [vmem:[%s5910_s9 + $0x768] sm:$0xff]  ;;  %v5370_v41 = vld [vmem:[%s5910_s9 + $0x5f0] sm:$0xff] }
 0x498   : > { %v3532_v14 = vpop.f32.mrf.mxu1  ;;  %4351 = vst [vmem:[%s6999_s8 + $0x578] sm:$0xff] %v4095_v4  ;;  %v4098_v12 = vadd.f32 %v5358_v29, %v3822_v42  ;;  %v3824_v2 = vadd.f32 %v3823_v1, %v7144_v47 }
 0x499   : > { %4400 = vst [vmem:[%s6999_s8 + $0x700] sm:$0xff] %v4144_v15  ;;  %v4145_v38 = vadd.f32 %v5357_v44, %v3531_v25  ;;  %v3533_v0 = vadd.f32 %v3532_v14, %v6976_v55  ;;  %v3825_v31 = vpop.f32.mrf.mxu0  ;;  %v5371_v25 = vld [vmem:[%s5910_s9 + $0x780] sm:$0xff]  ;;  %v5372_v14 = vld [vmem:[%s5910_s9 + $0x5f8] sm:$0xff] }
 0x49a   : > { %v3534_v6 = vpop.f32.mrf.mxu1  ;;  %4354 = vst [vmem:[%s6999_s8 + $0x590] sm:$0xff] %v4098_v12  ;;  %v4099_v11 = vadd.f32 %v5360_v61, %v3824_v2  ;;  %v3826_v32 = vadd.f32 %v3825_v31, %v7137_v50 }
 0x49b   : > { %4401 = vst [vmem:[%s6999_s8 + $0x708] sm:$0xff] %v4145_v38  ;;  %v4148_v59 = vadd.f32 %v5359_v56, %v3533_v0  ;;  %v3535_v23 = vadd.f32 %v3534_v6, %v6985_v3  ;;  %v3827_v16 = vpop.f32.mrf.mxu0  ;;  %v5373_v0 = vld [vmem:[%s5910_s9 + $0x788] sm:$0xff]  ;;  %v5374_v6 = vld [vmem:[%s5910_s9 + $0x610] sm:$0xff] }
 0x49c   : > { %v3538_v21 = vpop.f32.mrf.mxu1  ;;  %4355 = vst [vmem:[%s6999_s8 + $0x598] sm:$0xff] %v4099_v11  ;;  %v4102_v46 = vadd.f32 %v5362_v53, %v3826_v32  ;;  %v3828_v49 = vadd.f32 %v3827_v16, %v7144_v47 }
 0x49d   : > { %4404 = vst [vmem:[%s6999_s8 + $0x720] sm:$0xff] %v4148_v59  ;;  %v4149_v8 = vadd.f32 %v5361_v62, %v3535_v23  ;;  %v3539_v39 = vadd.f32 %v3538_v21, %v6976_v55  ;;  %v3831_v30 = vpop.f32.mrf.mxu0  ;;  %v5375_v23 = vld [vmem:[%s5910_s9 + $0x7a0] sm:$0xff]  ;;  %v5376_v21 = vld [vmem:[%s5910_s9 + $0x618] sm:$0xff] }
 0x49e   : > { %v3540_v24 = vpop.f32.mrf.mxu1  ;;  %4358 = vst [vmem:[%s6999_s8 + $0x5b0] sm:$0xff] %v4102_v46  ;;  %v4103_v19 = vadd.f32 %v5364_v22, %v3828_v49  ;;  %v3832_v34 = vadd.f32 %v3831_v30, %v7137_v50 }
 0x49f   : > { %4405 = vst [vmem:[%s6999_s8 + $0x728] sm:$0xff] %v4149_v8  ;;  %v4152_v40 = vadd.f32 %v5363_v63, %v3539_v39  ;;  %v3541_v45 = vadd.f32 %v3540_v24, %v6985_v3  ;;  %v3833_v9 = vpop.f32.mrf.mxu0  ;;  %v5377_v39 = vld [vmem:[%s5910_s9 + $0x7a8] sm:$0xff]  ;;  %v5378_v24 = vld [vmem:[%s5910_s9 + $0x630] sm:$0xff] }
 0x4a0   : > { %v3542_v27 = vpop.f32.mrf.mxu1  ;;  %4359 = vst [vmem:[%s6999_s8 + $0x5b8] sm:$0xff] %v4103_v19  ;;  %v4106_v37 = vadd.f32 %v5366_v26, %v3832_v34  ;;  %v3834_v13 = vadd.f32 %v3833_v9, %v7144_v47 }
 0x4a1   : > { %4408 = vst [vmem:[%s6999_s8 + $0x740] sm:$0xff] %v4152_v40  ;;  %v4153_v28 = vadd.f32 %v5365_v10, %v3541_v45  ;;  %v3543_v43 = vadd.f32 %v3542_v27, %v6976_v55  ;;  %v3835_v5 = vpop.f32.mrf.mxu0  ;;  %v5379_v45 = vld [vmem:[%s5910_s9 + $0x7c0] sm:$0xff]  ;;  %v5380_v27 = vld [vmem:[%s5910_s9 + $0x638] sm:$0xff] }
 0x4a2   : > { %v3544_v7 = vpop.f32.mrf.mxu1  ;;  %4362 = vst [vmem:[%s6999_s8 + $0x5d0] sm:$0xff] %v4106_v37  ;;  %v4107_v60 = vadd.f32 %v5368_v57, %v3834_v13  ;;  %v3836_v36 = vadd.f32 %v3835_v5, %v7137_v50 }
 0x4a3   : > { %4409 = vst [vmem:[%s6999_s8 + $0x748] sm:$0xff] %v4153_v28  ;;  %v4156_v52 = vadd.f32 %v5367_v20, %v3543_v43  ;;  %v3545_v48 = vadd.f32 %v3544_v7, %v6985_v3  ;;  %v3837_v18 = vpop.f32.mrf.mxu0  ;;  %v5381_v43 = vld [vmem:[%s5910_s9 + $0x7c8] sm:$0xff]  ;;  %v5382_v7 = vld [vmem:[%s5910_s9 + $0x650] sm:$0xff] }
 0x4a4   : > { %v3548_v58 = vpop.f32.mrf.mxu1  ;;  %4363 = vst [vmem:[%s6999_s8 + $0x5d8] sm:$0xff] %v4107_v60  ;;  %v4110_v51 = vadd.f32 %v5370_v41, %v3836_v36  ;;  %v3838_v15 = vadd.f32 %v3837_v18, %v7144_v47  ;;  %v5385_v41 = vld [vmem:[%s5910_s9 + $0x7e8] sm:$0xff] }
 0x4a5   : > { %4412 = vst [vmem:[%s6999_s8 + $0x760] sm:$0xff] %v4156_v52  ;;  %v4157_v33 = vadd.f32 %v5369_v54, %v3545_v48  ;;  %v3549_v17 = vadd.f32 %v3548_v58, %v6976_v55  ;;  %v3841_v4 = vpop.f32.mrf.mxu0  ;;  %v5383_v48 = vld [vmem:[%s5910_s9 + $0x7e0] sm:$0xff]  ;;  %v5384_v58 = vld [vmem:[%s5910_s9 + $0x658] sm:$0xff] }
 0x4a6   : > { %v3550_v35 = vpop.f32.mrf.mxu1  ;;  %4366 = vst [vmem:[%s6999_s8 + $0x5f0] sm:$0xff] %v4110_v51  ;;  %v4111_v1 = vadd.f32 %v5372_v14, %v3838_v15  ;;  %v3842_v38 = vadd.f32 %v3841_v4, %v7137_v50 }
 0x4a7   : > { %4413 = vst [vmem:[%s6999_s8 + $0x768] sm:$0xff] %v4157_v33  ;;  %v4160_v42 = vadd.f32 %v5371_v25, %v3549_v17  ;;  %v3551_v44 = vadd.f32 %v3550_v35, %v6985_v3  ;;  %v3843_v12 = vpop.f32.mrf.mxu0  ;;  %v5386_v17 = vld [vmem:[%s5910_s9 + $0x670] sm:$0xff] }
 0x4a8   : > { %v3552_v29 = vpop.f32.mrf.mxu1  ;;  %4367 = vst [vmem:[%s6999_s8 + $0x5f8] sm:$0xff] %v4111_v1  ;;  %v4114_v31 = vadd.f32 %v5374_v6, %v3842_v38  ;;  %v3844_v59 = vadd.f32 %v3843_v12, %v7144_v47  ;;  %v5388_v1 = vld [vmem:[%s5910_s9 + $0x690] sm:$0xff]  ;;  %v5389_v12 = vld [vmem:[%s5910_s9 + $0x698] sm:$0xff] }
 0x4a9   : > { %4416 = vst [vmem:[%s6999_s8 + $0x780] sm:$0xff] %v4160_v42  ;;  %v4161_v2 = vadd.f32 %v5373_v0, %v3551_v44  ;;  %v3553_v56 = vadd.f32 %v3552_v29, %v6976_v55  ;;  %v3845_v11 = vpop.f32.mrf.mxu0 }
 0x4aa   : > { %v3554_v61 = vpop.f32.mrf.mxu1  ;;  %4370 = vst [vmem:[%s6999_s8 + $0x610] sm:$0xff] %v4114_v31  ;;  %v4115_v16 = vadd.f32 %v5376_v21, %v3844_v59  ;;  %v3846_v8 = vadd.f32 %v3845_v11, %v7137_v50  ;;  %v5390_v31 = vld [vmem:[%s5910_s9 + $0x6b0] sm:$0xff]  ;;  %v5391_v11 = vld [vmem:[%s5910_s9 + $0x6b8] sm:$0xff] }
 0x4ab   : > { %4417 = vst [vmem:[%s6999_s8 + $0x788] sm:$0xff] %v4161_v2  ;;  %v4164_v32 = vadd.f32 %v5375_v23, %v3553_v56  ;;  %v3555_v62 = vadd.f32 %v3554_v61, %v6985_v3  ;;  %v3847_v46 = vpop.f32.mrf.mxu0 }
 0x4ac   : > { %v3558_v53 = vpop.f32.mrf.mxu1  ;;  %4371 = vst [vmem:[%s6999_s8 + $0x618] sm:$0xff] %v4115_v16  ;;  %v4118_v30 = vadd.f32 %v5378_v24, %v3846_v8  ;;  %v3848_v40 = vadd.f32 %v3847_v46, %v7144_v47  ;;  %v5392_v16 = vld [vmem:[%s5910_s9 + $0x6d0] sm:$0xff]  ;;  %v5393_v46 = vld [vmem:[%s5910_s9 + $0x6d8] sm:$0xff] }
 0x4ad   : > { %4420 = vst [vmem:[%s6999_s8 + $0x7a0] sm:$0xff] %v4164_v32  ;;  %v4165_v49 = vadd.f32 %v5377_v39, %v3555_v62  ;;  %v3559_v63 = vadd.f32 %v3558_v53, %v6976_v55  ;;  %v3851_v19 = vpop.f32.mrf.mxu0 }
 0x4ae   : > { %v3560_v22 = vpop.f32.mrf.mxu1  ;;  %4374 = vst [vmem:[%s6999_s8 + $0x630] sm:$0xff] %v4118_v30  ;;  %v4119_v9 = vadd.f32 %v5380_v27, %v3848_v40  ;;  %v3852_v28 = vadd.f32 %v3851_v19, %v7137_v50  ;;  %v5394_v30 = vld [vmem:[%s5910_s9 + $0x6f0] sm:$0xff]  ;;  %v5395_v19 = vld [vmem:[%s5910_s9 + $0x6f8] sm:$0xff] }
 0x4af   : > { %4421 = vst [vmem:[%s6999_s8 + $0x7a8] sm:$0xff] %v4165_v49  ;;  %v4168_v34 = vadd.f32 %v5379_v45, %v3559_v63  ;;  %v3561_v10 = vadd.f32 %v3560_v22, %v6985_v3  ;;  %v3853_v37 = vpop.f32.mrf.mxu0 }
 0x4b0   : > { %v3562_v26 = vpop.f32.mrf.mxu1  ;;  %4375 = vst [vmem:[%s6999_s8 + $0x638] sm:$0xff] %v4119_v9  ;;  %v4122_v5 = vadd.f32 %v5382_v7, %v3852_v28  ;;  %v3854_v52 = vadd.f32 %v3853_v37, %v7144_v47  ;;  %v5396_v9 = vld [vmem:[%s5910_s9 + $0x710] sm:$0xff]  ;;  %v5397_v37 = vld [vmem:[%s5910_s9 + $0x718] sm:$0xff] }
 0x4b1   : > { %4424 = vst [vmem:[%s6999_s8 + $0x7c0] sm:$0xff] %v4168_v34  ;;  %v4169_v13 = vadd.f32 %v5381_v43, %v3561_v10  ;;  %v3563_v20 = vadd.f32 %v3562_v26, %v6976_v55  ;;  %v3855_v60 = vpop.f32.mrf.mxu0 }
 0x4b2   : > { %v3564_v57 = vpop.f32.mrf.mxu1  ;;  %4378 = vst [vmem:[%s6999_s8 + $0x650] sm:$0xff] %v4122_v5  ;;  %v4123_v18 = vadd.f32 %v5384_v58, %v3854_v52  ;;  %v3856_v33 = vadd.f32 %v3855_v60, %v7137_v50  ;;  %v5398_v5 = vld [vmem:[%s5910_s9 + $0x730] sm:$0xff]  ;;  %v5399_v60 = vld [vmem:[%s5910_s9 + $0x738] sm:$0xff] }
 0x4b3   : > { %4425 = vst [vmem:[%s6999_s8 + $0x7c8] sm:$0xff] %v4169_v13  ;;  %v4172_v36 = vadd.f32 %v5383_v48, %v3563_v20  ;;  %v3565_v54 = vadd.f32 %v3564_v57, %v6985_v3  ;;  %v3857_v55 = vpop.f32.mrf.mxu0  ;;  %v5387_v3 = vld [vmem:[%s5910_s9 + $0x678] sm:$0xff] }
 0x4b4   : > { %4379 = vst [vmem:[%s6999_s8 + $0x658] sm:$0xff] %v4123_v18  ;;  %v4126_v15 = vadd.f32 %v5386_v17, %v3856_v33  ;;  %v3858_v35 = vadd.f32 %v3857_v55, %v7144_v47  ;;  %v5400_v18 = vld [vmem:[%s5910_s9 + $0x750] sm:$0xff] }
 0x4b5   : > { %4428 = vst [vmem:[%s6999_s8 + $0x7e0] sm:$0xff] %v4172_v36  ;;  %v4173_v51 = vadd.f32 %v5385_v41, %v3565_v54  ;;  %v3861_v4 = vpop.f32.mrf.mxu0  ;;  %v5401_v41 = vld [vmem:[%s5910_s9 + $0x758] sm:$0xff] }
 0x4b6   : > { %4382 = vst [vmem:[%s6999_s8 + $0x670] sm:$0xff] %v4126_v15  ;;  %v4127_v25 = vadd.f32 %v5387_v3, %v3858_v35  ;;  %v3862_v42 = vadd.f32 %v3861_v4, %v7137_v50  ;;  %v5402_v35 = vld [vmem:[%s5910_s9 + $0x770] sm:$0xff] }
 0x4b7   : > { %4429 = vst [vmem:[%s6999_s8 + $0x7e8] sm:$0xff] %v4173_v51  ;;  %v3863_v14 = vpop.f32.mrf.mxu0 }
 0x4b8   : > { %4383 = vst [vmem:[%s6999_s8 + $0x678] sm:$0xff] %v4127_v25  ;;  %v4130_v44 = vadd.f32 %v5388_v1, %v3862_v42  ;;  %v3864_v38 = vadd.f32 %v3863_v14, %v7144_v47  ;;  %v5403_v42 = vld [vmem:[%s5910_s9 + $0x778] sm:$0xff] }
 0x4b9   : > { %v3865_v29 = vpop.f32.mrf.mxu0 }
 0x4ba   : > { %4386 = vst [vmem:[%s6999_s8 + $0x690] sm:$0xff] %v4130_v44  ;;  %v4131_v0 = vadd.f32 %v5389_v12, %v3864_v38  ;;  %v3866_v2 = vadd.f32 %v3865_v29, %v7137_v50  ;;  %v5404_v38 = vld [vmem:[%s5910_s9 + $0x790] sm:$0xff] }
 0x4bb   : > { %v3867_v6 = vpop.f32.mrf.mxu0 }
 0x4bc   : > { %4387 = vst [vmem:[%s6999_s8 + $0x698] sm:$0xff] %v4131_v0  ;;  %v4134_v56 = vadd.f32 %v5390_v31, %v3866_v2  ;;  %v3868_v59 = vadd.f32 %v3867_v6, %v7144_v47  ;;  %v5405_v2 = vld [vmem:[%s5910_s9 + $0x798] sm:$0xff] }
 0x4bd   : > { %v3871_v61 = vpop.f32.mrf.mxu0 }
 0x4be   : > { %4390 = vst [vmem:[%s6999_s8 + $0x6b0] sm:$0xff] %v4134_v56  ;;  %v4135_v23 = vadd.f32 %v5391_v11, %v3868_v59  ;;  %v3872_v32 = vadd.f32 %v3871_v61, %v7137_v50  ;;  %v5406_v59 = vld [vmem:[%s5910_s9 + $0x7b0] sm:$0xff] }
 0x4bf   : > { %v3873_v21 = vpop.f32.mrf.mxu0 }
 0x4c0   : > { %4391 = vst [vmem:[%s6999_s8 + $0x6b8] sm:$0xff] %v4135_v23  ;;  %v4138_v62 = vadd.f32 %v5392_v16, %v3872_v32  ;;  %v3874_v8 = vadd.f32 %v3873_v21, %v7144_v47  ;;  %v5407_v32 = vld [vmem:[%s5910_s9 + $0x7b8] sm:$0xff] }
 0x4c1   : > { %v3875_v53 = vpop.f32.mrf.mxu0 }
 0x4c2   : > { %4394 = vst [vmem:[%s6999_s8 + $0x6d0] sm:$0xff] %v4138_v62  ;;  %v4139_v39 = vadd.f32 %v5393_v46, %v3874_v8  ;;  %v3876_v49 = vadd.f32 %v3875_v53, %v7137_v50  ;;  %v5408_v8 = vld [vmem:[%s5910_s9 + $0x7d0] sm:$0xff] }
 0x4c3   : > { %v3877_v24 = vpop.f32.mrf.mxu0 }
 0x4c4   : > { %4395 = vst [vmem:[%s6999_s8 + $0x6d8] sm:$0xff] %v4139_v39  ;;  %v4142_v63 = vadd.f32 %v5394_v30, %v3876_v49  ;;  %v3878_v40 = vadd.f32 %v3877_v24, %v7144_v47  ;;  %v5409_v49 = vld [vmem:[%s5910_s9 + $0x7d8] sm:$0xff] }
 0x4c5   : > { %v3881_v22 = vpop.f32.mrf.mxu0 }
 0x4c6   : > { %4398 = vst [vmem:[%s6999_s8 + $0x6f0] sm:$0xff] %v4142_v63  ;;  %v4143_v45 = vadd.f32 %v5395_v19, %v3878_v40  ;;  %v3882_v34 = vadd.f32 %v3881_v22, %v7137_v50  ;;  %v5410_v40 = vld [vmem:[%s5910_s9 + $0x7f0] sm:$0xff] }
 0x4c7   : > { %v3883_v27 = vpop.f32.mrf.mxu0 }
 0x4c8   : > { %4399 = vst [vmem:[%s6999_s8 + $0x6f8] sm:$0xff] %v4143_v45  ;;  %v4146_v10 = vadd.f32 %v5396_v9, %v3882_v34  ;;  %v3884_v28 = vadd.f32 %v3883_v27, %v7144_v47 }
 0x4c9   : > { %v3885_v26 = vpop.f32.mrf.mxu0 }
 0x4ca   : > { %4402 = vst [vmem:[%s6999_s8 + $0x710] sm:$0xff] %v4146_v10  ;;  %v4147_v43 = vadd.f32 %v5397_v37, %v3884_v28  ;;  %v3886_v13 = vadd.f32 %v3885_v26, %v7137_v50 }
 0x4cb   : > { %v3887_v7 = vpop.f32.mrf.mxu0 }
 0x4cc   : > { %4403 = vst [vmem:[%s6999_s8 + $0x718] sm:$0xff] %v4147_v43  ;;  %v4150_v20 = vadd.f32 %v5398_v5, %v3886_v13  ;;  %v3888_v52 = vadd.f32 %v3887_v7, %v7144_v47 }
 0x4cd   : > { %v3891_v57 = vpop.f32.mrf.mxu0 }
 0x4ce   : > { %4406 = vst [vmem:[%s6999_s8 + $0x730] sm:$0xff] %v4150_v20  ;;  %v4151_v48 = vadd.f32 %v5399_v60, %v3888_v52  ;;  %v3892_v36 = vadd.f32 %v3891_v57, %v7137_v50 }
 0x4cf   : > { %v3893_v58 = vpop.f32.mrf.mxu0 }
 0x4d0   : > { %4407 = vst [vmem:[%s6999_s8 + $0x738] sm:$0xff] %v4151_v48  ;;  %v4154_v54 = vadd.f32 %v5400_v18, %v3892_v36  ;;  %v3894_v33 = vadd.f32 %v3893_v58, %v7144_v47 }
 0x4d1   : > { %v3895_v55 = vpop.f32.mrf.mxu0 }
 0x4d2   : > { %4410 = vst [vmem:[%s6999_s8 + $0x750] sm:$0xff] %v4154_v54  ;;  %v4155_v51 = vadd.f32 %v5401_v41, %v3894_v33  ;;  %v3896_v17 = vadd.f32 %v3895_v55, %v7137_v50 }
 0x4d3   : > { %v3897_v15 = vpop.f32.mrf.mxu0 }
 0x4d4   : > { %4411 = vst [vmem:[%s6999_s8 + $0x758] sm:$0xff] %v4155_v51  ;;  %v4158_v4 = vadd.f32 %v5402_v35, %v3896_v17  ;;  %v3898_v3 = vadd.f32 %v3897_v15, %v7144_v47 }
 0x4d5   : > { %v3901_v25 = vpop.f32.mrf.mxu0 }
 0x4d6   : > { %4414 = vst [vmem:[%s6999_s8 + $0x770] sm:$0xff] %v4158_v4  ;;  %v4159_v14 = vadd.f32 %v5403_v42, %v3898_v3  ;;  %v3902_v1 = vadd.f32 %v3901_v25, %v7137_v50 }
 0x4d7   : > { %v3903_v44 = vpop.f32.mrf.mxu0 }
 0x4d8   : > { %4415 = vst [vmem:[%s6999_s8 + $0x778] sm:$0xff] %v4159_v14  ;;  %v4162_v29 = vadd.f32 %v5404_v38, %v3902_v1  ;;  %v3904_v12 = vadd.f32 %v3903_v44, %v7144_v47 }
 0x4d9   : > { %v3905_v0 = vpop.f32.mrf.mxu0 }
 0x4da   : > { %4418 = vst [vmem:[%s6999_s8 + $0x790] sm:$0xff] %v4162_v29  ;;  %v4163_v6 = vadd.f32 %v5405_v2, %v3904_v12  ;;  %v3906_v31 = vadd.f32 %v3905_v0, %v7137_v50 }
 0x4db   : > { %v3907_v56 = vpop.f32.mrf.mxu0 }
 0x4dc   : > { %4419 = vst [vmem:[%s6999_s8 + $0x798] sm:$0xff] %v4163_v6  ;;  %v4166_v61 = vadd.f32 %v5406_v59, %v3906_v31  ;;  %v3908_v11 = vadd.f32 %v3907_v56, %v7144_v47 }
 0x4dd   : > { %v3911_v23 = vpop.f32.mrf.mxu0 }
 0x4de   : > { %4422 = vst [vmem:[%s6999_s8 + $0x7b0] sm:$0xff] %v4166_v61  ;;  %v4167_v21 = vadd.f32 %v5407_v32, %v3908_v11  ;;  %v3912_v16 = vadd.f32 %v3911_v23, %v7137_v50 }
 0x4df   : > { %v3913_v62 = vpop.f32.mrf.mxu0 }
 0x4e0   : > { %4423 = vst [vmem:[%s6999_s8 + $0x7b8] sm:$0xff] %v4167_v21  ;;  %v4170_v53 = vadd.f32 %v5408_v8, %v3912_v16  ;;  %v3914_v46 = vadd.f32 %v3913_v62, %v7144_v47 }
 0x4e1   : > { %v3915_v39 = vpop.f32.mrf.mxu0 }
 0x4e2   : > { %4426 = vst [vmem:[%s6999_s8 + $0x7d0] sm:$0xff] %v4170_v53  ;;  %v4171_v24 = vadd.f32 %v5409_v49, %v3914_v46  ;;  %v3916_v30 = vadd.f32 %v3915_v39, %v7137_v50  ;;  %v5411_v50 = vld [vmem:[%s5910_s9 + $0x7f8] sm:$0xff] }
 0x4e3   : > { %v3917_v63 = vpop.f32.mrf.mxu0 }
 0x4e4   : > { %4427 = vst [vmem:[%s6999_s8 + $0x7d8] sm:$0xff] %v4171_v24  ;;  %v4174_v22 = vadd.f32 %v5410_v40, %v3916_v30  ;;  %v3918_v19 = vadd.f32 %v3917_v63, %v7144_v47 }
 0x4e6   : > { %4430 = vst [vmem:[%s6999_s8 + $0x7f0] sm:$0xff] %v4174_v22  ;;  %v4175_v45 = vadd.f32 %v5411_v50, %v3918_v19 }
 0x4e8   : > { %4431 = vst [vmem:[%s6999_s8 + $0x7f8] sm:$0xff] %v4175_v45 }
 0x4e9   : > { %5609 = shalt.err (!%p5606_p5)
}
 0x4ea   : > { %s5610_s23 = scalar_lea.hbm %s7865_s10, 32768  ;;  %s5614_s9 = scalar_lea.hbm %s7919_s7, 131072 }
 0x4eb   : > { %p5611_p13 = scmp.ne.s32.totalorder %s7865_s10, %s5610_s23  ;;  %p5615_p4 = scmp.lt.s32.totalorder %s7865_s10, %s7919_s7 }
 0x4ec   : > { %p5616_p7 = scmp.lt.s32.totalorder %s5614_s9, %s5610_s23 }
 0x4ed   : > { %p5612_p0 = pnand %p5611_p13, %p8071_p10 }
 0x4ee   : > { %p5617_p8 = por %p5616_p7, %p5615_p4 }
 0x4ef   : > { %p5613_p2 = pneg %p5612_p0 }
 0x4f1   : > { %p5618_p9 = pnand %p5617_p8, %p5613_p2 }
 0x4f3   : > { %5621 = shalt.err (!%p5618_p9)
}
 0x4f4   : > { %s5688_s12 = smov 512   ;;  %s5689_s14 = smov 32  }
 0x4f5   : > { %4827 = dma.vmem_to_hbm [thread:$0]  (%p8071_p10), %s7867_s29, 32768, %s7865_s10, %s4433_s30, %s5688_s12, %s5688_s12, %s5689_s14  }
 0x4f6 PF: > { %p4869_p11 = scmp.ge.s32.totalorder %s5672_s27, 2  ;;  %s4462_s17 = sand.u32 1, %s5660_s24  }
 0x4f7   : > { %p8072_p12 = scmp.ne.s32.totalorder %s7939_s13, 0  ;;  %s4463_s19 = scalar_lea.sflag [#allocation4], %s4462_s17 }
 0x4f9   : > { %p4853_p1 = pnand %p4869_p11, %p8072_p12 }
 0x4fb   : > { %p4854_p6 = pneg %p4853_p1 }
 0x4fd   : > { %5655 = dma.done.wait (%p4854_p6), %s4463_s19, 32768  }
 0x4fe   : > { %5657 = vsyncadd (%p4854_p6), %s4463_s19, 4294934528  ;;  %p23_p3 = scmp.ge.s32.totalorder %s5832_s11, 6   ;;  %s8073_s24 = smov %s5664_s25 }
 0x4ff   : > { %s8074_s25 = smov %s5668_s26  ;;  %s8075_s26 = smov %s5843_s16 }
 0x500   : > { %s8076_s27 = smov %s5832_s11  ;;  %25 = sbr.rel (!%p23_p3) target bundleno = 10 (0xa), region = 117 }
 0x505   :  { %4468 = vsyncpa [#allocation3], 1 }
 0x506   :  { %4470 = vsyncpa [#allocation3 + $0x1], 1 }
 0x507   :  { %4471 = vsyncpa [#allocation6], 1 }
 0x508   :  { %4472 = vsyncpa [#allocation9], 1 }
 0x509   :  { %4473 = vsyncpa [#allocation12], 1 }
 0x50a   :  { %4474 = vsyncpa [#allocation4], 1 }
 0x50b   :  { %4476 = vsyncpa [#allocation4 + $0x1], 1 }

</bundles_post_ra>
